<compile_context>
chip_gen: v5e
topology: v5e:2x2
jax: 0.10.0
libtpu: 0.0.40
codegen_flags: <defaults>
</compile_context>

<pallas_src>
import jax
import jax.numpy as jnp
import numpy as np
from jax.experimental import pallas as pl
from jax.experimental.pallas import tpu as pltpu

_SUBLANE = 8     # f32 sublane multiple
_LANE = 128      # lane multiple


def _round_up(x, m):
    return (x + m - 1) // m * m


# --------------------------- Fused LSTM-stack + FC kernel ---------------------------
def make_fused_rnn_kernel(T, Bp, Hp, num_layers, unroll):
    """Fused kernel: `num_layers` stacked LSTM layers + FC head, padded shapes."""

    def kernel(*refs):
        # refs = [x, (w_ih, w_hh, b) * L, fc_w, fc_b, out, gates_scr, (seq_scr)]
        x_ref = refs[0]
        layer_refs = refs[1:1 + 3 * num_layers]
        rest = refs[1 + 3 * num_layers:]
        fc_w_ref, fc_b_ref, out_ref, gates_scr = rest[:4]
        seq_scr = rest[4] if num_layers > 1 else None

        h_last = None
        cur_in = x_ref                            # (T*Bp, D_in) of the current layer
        for l in range(num_layers):
            w_ih_ref = layer_refs[3 * l + 0]      # (D_in, 4*Hp)
            w_hh_ref = layer_refs[3 * l + 1]      # (Hp, 4*Hp)
            b_ref = layer_refs[3 * l + 2]         # (1, 4*Hp)
            is_last = l == num_layers - 1

            # Hoisted input projection: one matmul for all T*Bp rows (no serial dep).
            gates_scr[...] = (
                jnp.dot(cur_in[...], w_ih_ref[...],
                        preferred_element_type=jnp.float32)
                + b_ref[...]
            )

            w_hh = w_hh_ref[...]                  # hoist the weight load out of the loop

            def step(t, carry, w_hh=w_hh, write_seq=not is_last):
                h, c = carry
                row = pl.multiple_of(t * Bp, Bp)  # sublane-aligned dynamic offset
                g = gates_scr[pl.ds(row, Bp), :] + jnp.dot(
                    h, w_hh, preferred_element_type=jnp.float32)
                # Hp is a multiple of 128 => every gate slice is lane aligned.
                i_g = jax.nn.sigmoid(g[:, 0 * Hp:1 * Hp])
                f_g = jax.nn.sigmoid(g[:, 1 * Hp:2 * Hp])
                g_g = jnp.tanh(g[:, 2 * Hp:3 * Hp])
                o_g = jax.nn.sigmoid(g[:, 3 * Hp:4 * Hp])
                c_new = f_g * c + i_g * g_g
                h_new = o_g * jnp.tanh(c_new)
                if write_seq:                     # last layer only needs the final h
                    seq_scr[pl.ds(row, Bp), :] = h_new
                return (h_new, c_new)

            init = (jnp.zeros((Bp, Hp), jnp.float32),
                    jnp.zeros((Bp, Hp), jnp.float32))
            h_last, _ = jax.lax.fori_loop(0, T, step, init, unroll=unroll)
            cur_in = seq_scr                      # next layer consumes the VMEM sequence

        # Final Linear on the last hidden state, fused into the same kernel.
        out_ref[...] = (
            jnp.dot(h_last, fc_w_ref[...], preferred_element_type=jnp.float32)
            + fc_b_ref[...]
        )

    return kernel


# --------------------------------- Host-side wrapper ---------------------------------
def basic_rnn_forward(x, params, *, unroll=8):
    """x: (B, T, D) batch_first -> (B, output_dim) == fc(lstm(x)[:, -1, :])."""
    B, T, D = x.shape
    H = params["lstm"][0]["w_hh_t"].shape[0]
    O = params["fc_w_t"].shape[1]
    L = len(params["lstm"])

    Bp = _round_up(B, _SUBLANE)                   # sublane-padded batch
    Hp = _round_up(H, _LANE)                      # lane-padded hidden (gates lane-aligned)
    Op = _round_up(O, _LANE)                      # lane-dense output store

    # Pad batch, go time-major, flatten to a (T*Bp, D) slab (done host-side so no
    # in-kernel relayouts are needed).
    x_p = jnp.zeros((Bp, T, D), jnp.float32).at[:B].set(x.astype(jnp.float32))
    x_flat = jnp.transpose(x_p, (1, 0, 2)).reshape(T * Bp, D)

    # Zero-pad weights gate-block-wise so each padded gate block [k*Hp:(k+1)*Hp)
    # carries the real gate in its first H lanes and exact zeros elsewhere.
    inputs = [x_flat]
    for li, layer in enumerate(params["lstm"]):
        d_in = D if li == 0 else H
        d_in_p = D if li == 0 else Hp
        w_ih = jnp.zeros((d_in_p, 4 * Hp), jnp.float32)
        w_hh = jnp.zeros((Hp, 4 * Hp), jnp.float32)
        b = jnp.zeros((1, 4 * Hp), jnp.float32)
        for g in range(4):
            w_ih = w_ih.at[:d_in, g * Hp:g * Hp + H].set(
                layer["w_ih_t"][:, g * H:(g + 1) * H])
            w_hh = w_hh.at[:H, g * Hp:g * Hp + H].set(
                layer["w_hh_t"][:, g * H:(g + 1) * H])
            b = b.at[:, g * Hp:g * Hp + H].set(layer["b"][:, g * H:(g + 1) * H])
        inputs += [w_ih, w_hh, b]

    fc_w = jnp.zeros((Hp, Op), jnp.float32).at[:H, :O].set(params["fc_w_t"])
    fc_b = jnp.zeros((1, Op), jnp.float32).at[:, :O].set(params["fc_b"])
    inputs += [fc_w, fc_b]

    # Scratch: hoisted gate projections; inter-layer hidden sequence only if needed.
    scratch = [pltpu.VMEM((T * Bp, 4 * Hp), jnp.float32)]
    if L > 1:
        scratch.append(pltpu.VMEM((T * Bp, Hp), jnp.float32))

    # Explicit scoped-VMEM budget sized from the resident state (+ headroom).
    vmem_bytes = sum(int(a.size) * a.dtype.itemsize for a in inputs)
    vmem_bytes += Bp * Op * 4                       # output
    vmem_bytes += T * Bp * 4 * Hp * 4               # gates_scr
    if L > 1:
        vmem_bytes += T * Bp * Hp * 4               # seq_scr
    if vmem_bytes > 48 * 2**20:
        # TODO(synk): T-chunked emit_pipeline for the hoisted projection (x left in
        # HBM via memory_space=pl.ANY) once the all-resident design stops fitting
        # v7x's 64 MiB VMEM / v5e's 16 MiB default scoped limit.
        raise ValueError(
            f"all-resident LSTM state ({vmem_bytes} B) exceeds the VMEM budget; "
            "switch to the T-chunked pipeline")
    vmem_limit = int(min(100 * 2**20, max(32 * 2**20, 2 * vmem_bytes)))

    kernel = make_fused_rnn_kernel(T, Bp, Hp, L, unroll=max(1, min(T, unroll)))
    vmem_spec = pl.BlockSpec(memory_space=pltpu.MemorySpace.VMEM)
    out_p = pl.pallas_call(
        kernel,
        out_shape=jax.ShapeDtypeStruct((Bp, Op), jnp.float32),
        in_specs=[vmem_spec] * len(inputs),         # everything resident in VMEM
        out_specs=vmem_spec,
        scratch_shapes=scratch,
        compiler_params=pltpu.CompilerParams(vmem_limit_bytes=vmem_limit),
    )(*inputs)
    return out_p[:B, :O]                            # drop batch/output padding


# ---------------------------------- Params init -------------------------------------
def init_basic_rnn_params(key, input_dim, hidden_dim, num_layers, output_dim):
    """Deterministic synthetic init, U(-1/sqrt(H), 1/sqrt(H)) like torch.nn.LSTM."""
    k = 1.0 / np.sqrt(hidden_dim)
    params = {"lstm": []}
    for layer in range(num_layers):
        d_in = input_dim if layer == 0 else hidden_dim
        key, k1, k2, k3, k4 = jax.random.split(key, 5)
        w_ih = jax.random.uniform(k1, (4 * hidden_dim, d_in), jnp.float32, -k, k)
        w_hh = jax.random.uniform(k2, (4 * hidden_dim, hidden_dim), jnp.float32, -k, k)
        b_ih = jax.random.uniform(k3, (4 * hidden_dim,), jnp.float32, -k, k)
        b_hh = jax.random.uniform(k4, (4 * hidden_dim,), jnp.float32, -k, k)
        params["lstm"].append({
            "w_ih_t": w_ih.T,                     # (d_in, 4H), gate order [i,f,g,o]
            "w_hh_t": w_hh.T,                     # (H, 4H)
            "b": (b_ih + b_hh)[None, :],          # (1, 4H)
        })
    key, k5, k6 = jax.random.split(key, 3)
    kf = 1.0 / np.sqrt(hidden_dim)
    fc_w = jax.random.uniform(k5, (output_dim, hidden_dim), jnp.float32, -kf, kf)
    fc_b = jax.random.uniform(k6, (output_dim,), jnp.float32, -kf, kf)
    params["fc_w_t"] = fc_w.T                     # (H, O)
    params["fc_b"] = fc_b[None, :]                # (1, O)
    return params


# ------------------------------- Pure-JAX reference ---------------------------------
def _reference_forward(x, params):
    def one_layer(seq, layer):
        T, B, _ = seq.shape
        H = layer["w_hh_t"].shape[0]

        def step(carry, x_t):
            h, c = carry
            gates = x_t @ layer["w_ih_t"] + h @ layer["w_hh_t"] + layer["b"]
            i, f, g, o = jnp.split(gates, 4, axis=-1)
            c_new = jax.nn.sigmoid(f) * c + jax.nn.sigmoid(i) * jnp.tanh(g)
            h_new = jax.nn.sigmoid(o) * jnp.tanh(c_new)
            return (h_new, c_new), h_new

        init = (jnp.zeros((B, H), jnp.float32), jnp.zeros((B, H), jnp.float32))
        _, hs = jax.lax.scan(step, init, seq)
        return hs

    seq = jnp.transpose(x, (1, 0, 2))
    for layer in params["lstm"]:
        seq = one_layer(seq, layer)
    return seq[-1] @ params["fc_w_t"] + params["fc_b"]


# ------------------------------------- Main ------------------------------------------
if __name__ == "__main__":
    B, T, D, H, L, O = 2, 8, 8, 32, 2, 4   # batch, seq, input_dim, hidden, layers, output

    key = jax.random.PRNGKey(0)
    key, xkey = jax.random.split(key)
    x = jax.random.normal(xkey, (B, T, D), jnp.float32)

    params = init_basic_rnn_params(key, D, H, L, O)

    out = jax.block_until_ready(basic_rnn_forward(x, params))

    ref = _reference_forward(x, params)
    np.testing.assert_allclose(np.asarray(out), np.asarray(ref), rtol=1e-5, atol=1e-5)

    assert out.shape == (B, O)
    print("KERNEL_OK")
</pallas_src>

<mosaic_0001>
module attributes {stable_mosaic.version = 11 : i64} {
  func.func @kernel(%arg0: memref<64x8xf32, #tpu.memory_space<vmem>>, %arg1: memref<8x512xf32, #tpu.memory_space<vmem>>, %arg2: memref<128x512xf32, #tpu.memory_space<vmem>>, %arg3: memref<1x512xf32, #tpu.memory_space<vmem>>, %arg4: memref<128x512xf32, #tpu.memory_space<vmem>>, %arg5: memref<128x512xf32, #tpu.memory_space<vmem>>, %arg6: memref<1x512xf32, #tpu.memory_space<vmem>>, %arg7: memref<128x128xf32, #tpu.memory_space<vmem>>, %arg8: memref<1x128xf32, #tpu.memory_space<vmem>>, %arg9: memref<8x128xf32, #tpu.memory_space<vmem>>, %arg10: memref<64x512xf32, #tpu.memory_space<vmem>>, %arg11: memref<64x128xf32, #tpu.memory_space<vmem>>) attributes {dimension_semantics = [], scalar_prefetch = 0 : i64, scratch_operands = 2 : i64, tpu.core_type = #tpu.core_type<tc>} {
    %c0 = arith.constant 0 : index
    %c0_0 = arith.constant 0 : index
    %0 = vector.load %arg0[%c0, %c0_0] : memref<64x8xf32, #tpu.memory_space<vmem>>, vector<64x8xf32>
    %c0_1 = arith.constant 0 : index
    %c0_2 = arith.constant 0 : index
    %1 = vector.load %arg1[%c0_1, %c0_2] : memref<8x512xf32, #tpu.memory_space<vmem>>, vector<8x512xf32>
    %cst = arith.constant dense<0.000000e+00> : vector<64x512xf32>
    %2 = tpu.matmul %0, %1, %cst {dimension_numbers = #tpu.dot_dimension_numbers<[1], [0], [0], [1], [0, 0, 1, 1], [], []>} : vector<64x8xf32>, vector<8x512xf32>, vector<64x512xf32> -> vector<64x512xf32>
    %c0_3 = arith.constant 0 : index
    %c0_4 = arith.constant 0 : index
    %3 = vector.load %arg3[%c0_3, %c0_4] : memref<1x512xf32, #tpu.memory_space<vmem>>, vector<1x512xf32>
    %4 = vector.broadcast %3 : vector<1x512xf32> to vector<64x512xf32>
    %5 = arith.addf %2, %4 : vector<64x512xf32>
    %c0_5 = arith.constant 0 : index
    %c0_6 = arith.constant 0 : index
    %6 = vector.load %arg10[%c0_5, %c0_6] : memref<64x512xf32, #tpu.memory_space<vmem>>, vector<64x512xf32>
    tpu.vector_store %arg10[%c0_5, %c0_6], %5 {strides = array<i32>} : memref<64x512xf32, #tpu.memory_space<vmem>>, vector<64x512xf32>,
    %c0_7 = arith.constant 0 : index
    %c0_8 = arith.constant 0 : index
    %7 = vector.load %arg2[%c0_7, %c0_8] : memref<128x512xf32, #tpu.memory_space<vmem>>, vector<128x512xf32>
    %cst_9 = arith.constant 0.000000e+00 : f32
    %8 = vector.broadcast %cst_9 : f32 to vector<8x128xf32>
    %cst_10 = arith.constant 0.000000e+00 : f32
    %9 = vector.broadcast %cst_10 : f32 to vector<8x128xf32>
    %c0_i32 = arith.constant 0 : i32
    %c8_i32 = arith.constant 8 : i32
    %10 = arith.muli %c0_i32, %c8_i32 : i32
    %11 = tpu.assume_multiple %10, 8 : i32
    %12 = arith.index_cast %11 : i32 to index
    %c0_11 = arith.constant 0 : index
    %13 = vector.load %arg10[%12, %c0_11] : memref<64x512xf32, #tpu.memory_space<vmem>>, vector<8x512xf32>
    %cst_12 = arith.constant dense<0.000000e+00> : vector<8x512xf32>
    %14 = tpu.matmul %8, %7, %cst_12 {dimension_numbers = #tpu.dot_dimension_numbers<[1], [0], [0], [1], [0, 0, 1, 1], [], []>} : vector<8x128xf32>, vector<128x512xf32>, vector<8x512xf32> -> vector<8x512xf32>
    %15 = arith.addf %13, %14 : vector<8x512xf32>
    %16 = vector.extract_strided_slice %15 {offsets = [0, 0], sizes = [8, 128], strides = [1, 1]} : vector<8x512xf32> to vector<8x128xf32>
    %17 = arith.negf %16 : vector<8x128xf32>
    %18 = math.exp %17 : vector<8x128xf32>
    %cst_13 = arith.constant 1.000000e+00 : f32
    %19 = vector.broadcast %cst_13 : f32 to vector<8x128xf32>
    %20 = arith.addf %19, %18 : vector<8x128xf32>
    %21 = arith.divf %19, %20 : vector<8x128xf32>
    %22 = vector.extract_strided_slice %15 {offsets = [0, 128], sizes = [8, 128], strides = [1, 1]} : vector<8x512xf32> to vector<8x128xf32>
    %23 = arith.negf %22 : vector<8x128xf32>
    %24 = math.exp %23 : vector<8x128xf32>
    %cst_14 = arith.constant 1.000000e+00 : f32
    %25 = vector.broadcast %cst_14 : f32 to vector<8x128xf32>
    %26 = arith.addf %25, %24 : vector<8x128xf32>
    %27 = arith.divf %25, %26 : vector<8x128xf32>
    %28 = vector.extract_strided_slice %15 {offsets = [0, 256], sizes = [8, 128], strides = [1, 1]} : vector<8x512xf32> to vector<8x128xf32>
    %29 = math.tanh %28 : vector<8x128xf32>
    %30 = vector.extract_strided_slice %15 {offsets = [0, 384], sizes = [8, 128], strides = [1, 1]} : vector<8x512xf32> to vector<8x128xf32>
    %31 = arith.negf %30 : vector<8x128xf32>
    %32 = math.exp %31 : vector<8x128xf32>
    %cst_15 = arith.constant 1.000000e+00 : f32
    %33 = vector.broadcast %cst_15 : f32 to vector<8x128xf32>
    %34 = arith.addf %33, %32 : vector<8x128xf32>
    %35 = arith.divf %33, %34 : vector<8x128xf32>
    %36 = arith.mulf %27, %9 : vector<8x128xf32>
    %37 = arith.mulf %21, %29 : vector<8x128xf32>
    %38 = arith.addf %36, %37 : vector<8x128xf32>
    %39 = math.tanh %38 : vector<8x128xf32>
    %40 = arith.mulf %35, %39 : vector<8x128xf32>
    %41 = arith.index_cast %11 : i32 to index
    %c0_16 = arith.constant 0 : index
    %42 = vector.load %arg11[%41, %c0_16] : memref<64x128xf32, #tpu.memory_space<vmem>>, vector<8x128xf32>
    tpu.vector_store %arg11[%41, %c0_16], %40 {strides = array<i32>} : memref<64x128xf32, #tpu.memory_space<vmem>>, vector<8x128xf32>,
    %c1_i32 = arith.constant 1 : i32
    %c8_i32_17 = arith.constant 8 : i32
    %43 = arith.muli %c1_i32, %c8_i32_17 : i32
    %44 = tpu.assume_multiple %43, 8 : i32
    %45 = arith.index_cast %44 : i32 to index
    %c0_18 = arith.constant 0 : index
    %46 = vector.load %arg10[%45, %c0_18] : memref<64x512xf32, #tpu.memory_space<vmem>>, vector<8x512xf32>
    %cst_19 = arith.constant dense<0.000000e+00> : vector<8x512xf32>
    %47 = tpu.matmul %40, %7, %cst_19 {dimension_numbers = #tpu.dot_dimension_numbers<[1], [0], [0], [1], [0, 0, 1, 1], [], []>} : vector<8x128xf32>, vector<128x512xf32>, vector<8x512xf32> -> vector<8x512xf32>
    %48 = arith.addf %46, %47 : vector<8x512xf32>
    %49 = vector.extract_strided_slice %48 {offsets = [0, 0], sizes = [8, 128], strides = [1, 1]} : vector<8x512xf32> to vector<8x128xf32>
    %50 = arith.negf %49 : vector<8x128xf32>
    %51 = math.exp %50 : vector<8x128xf32>
    %cst_20 = arith.constant 1.000000e+00 : f32
    %52 = vector.broadcast %cst_20 : f32 to vector<8x128xf32>
    %53 = arith.addf %52, %51 : vector<8x128xf32>
    %54 = arith.divf %52, %53 : vector<8x128xf32>
    %55 = vector.extract_strided_slice %48 {offsets = [0, 128], sizes = [8, 128], strides = [1, 1]} : vector<8x512xf32> to vector<8x128xf32>
    %56 = arith.negf %55 : vector<8x128xf32>
    %57 = math.exp %56 : vector<8x128xf32>
    %cst_21 = arith.constant 1.000000e+00 : f32
    %58 = vector.broadcast %cst_21 : f32 to vector<8x128xf32>
    %59 = arith.addf %58, %57 : vector<8x128xf32>
    %60 = arith.divf %58, %59 : vector<8x128xf32>
    %61 = vector.extract_strided_slice %48 {offsets = [0, 256], sizes = [8, 128], strides = [1, 1]} : vector<8x512xf32> to vector<8x128xf32>
    %62 = math.tanh %61 : vector<8x128xf32>
    %63 = vector.extract_strided_slice %48 {offsets = [0, 384], sizes = [8, 128], strides = [1, 1]} : vector<8x512xf32> to vector<8x128xf32>
    %64 = arith.negf %63 : vector<8x128xf32>
    %65 = math.exp %64 : vector<8x128xf32>
    %cst_22 = arith.constant 1.000000e+00 : f32
    %66 = vector.broadcast %cst_22 : f32 to vector<8x128xf32>
    %67 = arith.addf %66, %65 : vector<8x128xf32>
    %68 = arith.divf %66, %67 : vector<8x128xf32>
    %69 = arith.mulf %60, %38 : vector<8x128xf32>
    %70 = arith.mulf %54, %62 : vector<8x128xf32>
    %71 = arith.addf %69, %70 : vector<8x128xf32>
    %72 = math.tanh %71 : vector<8x128xf32>
    %73 = arith.mulf %68, %72 : vector<8x128xf32>
    %74 = arith.index_cast %44 : i32 to index
    %c0_23 = arith.constant 0 : index
    %75 = vector.load %arg11[%74, %c0_23] : memref<64x128xf32, #tpu.memory_space<vmem>>, vector<8x128xf32>
    tpu.vector_store %arg11[%74, %c0_23], %73 {strides = array<i32>} : memref<64x128xf32, #tpu.memory_space<vmem>>, vector<8x128xf32>,
    %c2_i32 = arith.constant 2 : i32
    %c8_i32_24 = arith.constant 8 : i32
    %76 = arith.muli %c2_i32, %c8_i32_24 : i32
    %77 = tpu.assume_multiple %76, 8 : i32
    %78 = arith.index_cast %77 : i32 to index
    %c0_25 = arith.constant 0 : index
    %79 = vector.load %arg10[%78, %c0_25] : memref<64x512xf32, #tpu.memory_space<vmem>>, vector<8x512xf32>
    %cst_26 = arith.constant dense<0.000000e+00> : vector<8x512xf32>
    %80 = tpu.matmul %73, %7, %cst_26 {dimension_numbers = #tpu.dot_dimension_numbers<[1], [0], [0], [1], [0, 0, 1, 1], [], []>} : vector<8x128xf32>, vector<128x512xf32>, vector<8x512xf32> -> vector<8x512xf32>
    %81 = arith.addf %79, %80 : vector<8x512xf32>
    %82 = vector.extract_strided_slice %81 {offsets = [0, 0], sizes = [8, 128], strides = [1, 1]} : vector<8x512xf32> to vector<8x128xf32>
    %83 = arith.negf %82 : vector<8x128xf32>
    %84 = math.exp %83 : vector<8x128xf32>
    %cst_27 = arith.constant 1.000000e+00 : f32
    %85 = vector.broadcast %cst_27 : f32 to vector<8x128xf32>
    %86 = arith.addf %85, %84 : vector<8x128xf32>
    %87 = arith.divf %85, %86 : vector<8x128xf32>
    %88 = vector.extract_strided_slice %81 {offsets = [0, 128], sizes = [8, 128], strides = [1, 1]} : vector<8x512xf32> to vector<8x128xf32>
    %89 = arith.negf %88 : vector<8x128xf32>
    %90 = math.exp %89 : vector<8x128xf32>
    %cst_28 = arith.constant 1.000000e+00 : f32
    %91 = vector.broadcast %cst_28 : f32 to vector<8x128xf32>
    %92 = arith.addf %91, %90 : vector<8x128xf32>
    %93 = arith.divf %91, %92 : vector<8x128xf32>
    %94 = vector.extract_strided_slice %81 {offsets = [0, 256], sizes = [8, 128], strides = [1, 1]} : vector<8x512xf32> to vector<8x128xf32>
    %95 = math.tanh %94 : vector<8x128xf32>
    %96 = vector.extract_strided_slice %81 {offsets = [0, 384], sizes = [8, 128], strides = [1, 1]} : vector<8x512xf32> to vector<8x128xf32>
    %97 = arith.negf %96 : vector<8x128xf32>
    %98 = math.exp %97 : vector<8x128xf32>
    %cst_29 = arith.constant 1.000000e+00 : f32
    %99 = vector.broadcast %cst_29 : f32 to vector<8x128xf32>
    %100 = arith.addf %99, %98 : vector<8x128xf32>
    %101 = arith.divf %99, %100 : vector<8x128xf32>
    %102 = arith.mulf %93, %71 : vector<8x128xf32>
    %103 = arith.mulf %87, %95 : vector<8x128xf32>
    %104 = arith.addf %102, %103 : vector<8x128xf32>
    %105 = math.tanh %104 : vector<8x128xf32>
    %106 = arith.mulf %101, %105 : vector<8x128xf32>
    %107 = arith.index_cast %77 : i32 to index
    %c0_30 = arith.constant 0 : index
    %108 = vector.load %arg11[%107, %c0_30] : memref<64x128xf32, #tpu.memory_space<vmem>>, vector<8x128xf32>
    tpu.vector_store %arg11[%107, %c0_30], %106 {strides = array<i32>} : memref<64x128xf32, #tpu.memory_space<vmem>>, vector<8x128xf32>,
    %c3_i32 = arith.constant 3 : i32
    %c8_i32_31 = arith.constant 8 : i32
    %109 = arith.muli %c3_i32, %c8_i32_31 : i32
    %110 = tpu.assume_multiple %109, 8 : i32
    %111 = arith.index_cast %110 : i32 to index
    %c0_32 = arith.constant 0 : index
    %112 = vector.load %arg10[%111, %c0_32] : memref<64x512xf32, #tpu.memory_space<vmem>>, vector<8x512xf32>
    %cst_33 = arith.constant dense<0.000000e+00> : vector<8x512xf32>
    %113 = tpu.matmul %106, %7, %cst_33 {dimension_numbers = #tpu.dot_dimension_numbers<[1], [0], [0], [1], [0, 0, 1, 1], [], []>} : vector<8x128xf32>, vector<128x512xf32>, vector<8x512xf32> -> vector<8x512xf32>
    %114 = arith.addf %112, %113 : vector<8x512xf32>
    %115 = vector.extract_strided_slice %114 {offsets = [0, 0], sizes = [8, 128], strides = [1, 1]} : vector<8x512xf32> to vector<8x128xf32>
    %116 = arith.negf %115 : vector<8x128xf32>
    %117 = math.exp %116 : vector<8x128xf32>
    %cst_34 = arith.constant 1.000000e+00 : f32
    %118 = vector.broadcast %cst_34 : f32 to vector<8x128xf32>
    %119 = arith.addf %118, %117 : vector<8x128xf32>
    %120 = arith.divf %118, %119 : vector<8x128xf32>
    %121 = vector.extract_strided_slice %114 {offsets = [0, 128], sizes = [8, 128], strides = [1, 1]} : vector<8x512xf32> to vector<8x128xf32>
    %122 = arith.negf %121 : vector<8x128xf32>
    %123 = math.exp %122 : vector<8x128xf32>
    %cst_35 = arith.constant 1.000000e+00 : f32
    %124 = vector.broadcast %cst_35 : f32 to vector<8x128xf32>
    %125 = arith.addf %124, %123 : vector<8x128xf32>
    %126 = arith.divf %124, %125 : vector<8x128xf32>
    %127 = vector.extract_strided_slice %114 {offsets = [0, 256], sizes = [8, 128], strides = [1, 1]} : vector<8x512xf32> to vector<8x128xf32>
    %128 = math.tanh %127 : vector<8x128xf32>
    %129 = vector.extract_strided_slice %114 {offsets = [0, 384], sizes = [8, 128], strides = [1, 1]} : vector<8x512xf32> to vector<8x128xf32>
    %130 = arith.negf %129 : vector<8x128xf32>
    %131 = math.exp %130 : vector<8x128xf32>
    %cst_36 = arith.constant 1.000000e+00 : f32
    %132 = vector.broadcast %cst_36 : f32 to vector<8x128xf32>
    %133 = arith.addf %132, %131 : vector<8x128xf32>
    %134 = arith.divf %132, %133 : vector<8x128xf32>
    %135 = arith.mulf %126, %104 : vector<8x128xf32>
    %136 = arith.mulf %120, %128 : vector<8x128xf32>
    %137 = arith.addf %135, %136 : vector<8x128xf32>
    %138 = math.tanh %137 : vector<8x128xf32>
    %139 = arith.mulf %134, %138 : vector<8x128xf32>
    %140 = arith.index_cast %110 : i32 to index
    %c0_37 = arith.constant 0 : index
    %141 = vector.load %arg11[%140, %c0_37] : memref<64x128xf32, #tpu.memory_space<vmem>>, vector<8x128xf32>
    tpu.vector_store %arg11[%140, %c0_37], %139 {strides = array<i32>} : memref<64x128xf32, #tpu.memory_space<vmem>>, vector<8x128xf32>,
    %c4_i32 = arith.constant 4 : i32
    %c8_i32_38 = arith.constant 8 : i32
    %142 = arith.muli %c4_i32, %c8_i32_38 : i32
    %143 = tpu.assume_multiple %142, 8 : i32
    %144 = arith.index_cast %143 : i32 to index
    %c0_39 = arith.constant 0 : index
    %145 = vector.load %arg10[%144, %c0_39] : memref<64x512xf32, #tpu.memory_space<vmem>>, vector<8x512xf32>
    %cst_40 = arith.constant dense<0.000000e+00> : vector<8x512xf32>
    %146 = tpu.matmul %139, %7, %cst_40 {dimension_numbers = #tpu.dot_dimension_numbers<[1], [0], [0], [1], [0, 0, 1, 1], [], []>} : vector<8x128xf32>, vector<128x512xf32>, vector<8x512xf32> -> vector<8x512xf32>
    %147 = arith.addf %145, %146 : vector<8x512xf32>
    %148 = vector.extract_strided_slice %147 {offsets = [0, 0], sizes = [8, 128], strides = [1, 1]} : vector<8x512xf32> to vector<8x128xf32>
    %149 = arith.negf %148 : vector<8x128xf32>
    %150 = math.exp %149 : vector<8x128xf32>
    %cst_41 = arith.constant 1.000000e+00 : f32
    %151 = vector.broadcast %cst_41 : f32 to vector<8x128xf32>
    %152 = arith.addf %151, %150 : vector<8x128xf32>
    %153 = arith.divf %151, %152 : vector<8x128xf32>
    %154 = vector.extract_strided_slice %147 {offsets = [0, 128], sizes = [8, 128], strides = [1, 1]} : vector<8x512xf32> to vector<8x128xf32>
    %155 = arith.negf %154 : vector<8x128xf32>
    %156 = math.exp %155 : vector<8x128xf32>
    %cst_42 = arith.constant 1.000000e+00 : f32
    %157 = vector.broadcast %cst_42 : f32 to vector<8x128xf32>
    %158 = arith.addf %157, %156 : vector<8x128xf32>
    %159 = arith.divf %157, %158 : vector<8x128xf32>
    %160 = vector.extract_strided_slice %147 {offsets = [0, 256], sizes = [8, 128], strides = [1, 1]} : vector<8x512xf32> to vector<8x128xf32>
    %161 = math.tanh %160 : vector<8x128xf32>
    %162 = vector.extract_strided_slice %147 {offsets = [0, 384], sizes = [8, 128], strides = [1, 1]} : vector<8x512xf32> to vector<8x128xf32>
    %163 = arith.negf %162 : vector<8x128xf32>
    %164 = math.exp %163 : vector<8x128xf32>
    %cst_43 = arith.constant 1.000000e+00 : f32
    %165 = vector.broadcast %cst_43 : f32 to vector<8x128xf32>
    %166 = arith.addf %165, %164 : vector<8x128xf32>
    %167 = arith.divf %165, %166 : vector<8x128xf32>
    %168 = arith.mulf %159, %137 : vector<8x128xf32>
    %169 = arith.mulf %153, %161 : vector<8x128xf32>
    %170 = arith.addf %168, %169 : vector<8x128xf32>
    %171 = math.tanh %170 : vector<8x128xf32>
    %172 = arith.mulf %167, %171 : vector<8x128xf32>
    %173 = arith.index_cast %143 : i32 to index
    %c0_44 = arith.constant 0 : index
    %174 = vector.load %arg11[%173, %c0_44] : memref<64x128xf32, #tpu.memory_space<vmem>>, vector<8x128xf32>
    tpu.vector_store %arg11[%173, %c0_44], %172 {strides = array<i32>} : memref<64x128xf32, #tpu.memory_space<vmem>>, vector<8x128xf32>,
    %c5_i32 = arith.constant 5 : i32
    %c8_i32_45 = arith.constant 8 : i32
    %175 = arith.muli %c5_i32, %c8_i32_45 : i32
    %176 = tpu.assume_multiple %175, 8 : i32
    %177 = arith.index_cast %176 : i32 to index
    %c0_46 = arith.constant 0 : index
    %178 = vector.load %arg10[%177, %c0_46] : memref<64x512xf32, #tpu.memory_space<vmem>>, vector<8x512xf32>
    %cst_47 = arith.constant dense<0.000000e+00> : vector<8x512xf32>
    %179 = tpu.matmul %172, %7, %cst_47 {dimension_numbers = #tpu.dot_dimension_numbers<[1], [0], [0], [1], [0, 0, 1, 1], [], []>} : vector<8x128xf32>, vector<128x512xf32>, vector<8x512xf32> -> vector<8x512xf32>
    %180 = arith.addf %178, %179 : vector<8x512xf32>
    %181 = vector.extract_strided_slice %180 {offsets = [0, 0], sizes = [8, 128], strides = [1, 1]} : vector<8x512xf32> to vector<8x128xf32>
    %182 = arith.negf %181 : vector<8x128xf32>
    %183 = math.exp %182 : vector<8x128xf32>
    %cst_48 = arith.constant 1.000000e+00 : f32
    %184 = vector.broadcast %cst_48 : f32 to vector<8x128xf32>
    %185 = arith.addf %184, %183 : vector<8x128xf32>
    %186 = arith.divf %184, %185 : vector<8x128xf32>
    %187 = vector.extract_strided_slice %180 {offsets = [0, 128], sizes = [8, 128], strides = [1, 1]} : vector<8x512xf32> to vector<8x128xf32>
    %188 = arith.negf %187 : vector<8x128xf32>
    %189 = math.exp %188 : vector<8x128xf32>
    %cst_49 = arith.constant 1.000000e+00 : f32
    %190 = vector.broadcast %cst_49 : f32 to vector<8x128xf32>
    %191 = arith.addf %190, %189 : vector<8x128xf32>
    %192 = arith.divf %190, %191 : vector<8x128xf32>
    %193 = vector.extract_strided_slice %180 {offsets = [0, 256], sizes = [8, 128], strides = [1, 1]} : vector<8x512xf32> to vector<8x128xf32>
    %194 = math.tanh %193 : vector<8x128xf32>
    %195 = vector.extract_strided_slice %180 {offsets = [0, 384], sizes = [8, 128], strides = [1, 1]} : vector<8x512xf32> to vector<8x128xf32>
    %196 = arith.negf %195 : vector<8x128xf32>
    %197 = math.exp %196 : vector<8x128xf32>
    %cst_50 = arith.constant 1.000000e+00 : f32
    %198 = vector.broadcast %cst_50 : f32 to vector<8x128xf32>
    %199 = arith.addf %198, %197 : vector<8x128xf32>
    %200 = arith.divf %198, %199 : vector<8x128xf32>
    %201 = arith.mulf %192, %170 : vector<8x128xf32>
    %202 = arith.mulf %186, %194 : vector<8x128xf32>
    %203 = arith.addf %201, %202 : vector<8x128xf32>
    %204 = math.tanh %203 : vector<8x128xf32>
    %205 = arith.mulf %200, %204 : vector<8x128xf32>
    %206 = arith.index_cast %176 : i32 to index
    %c0_51 = arith.constant 0 : index
    %207 = vector.load %arg11[%206, %c0_51] : memref<64x128xf32, #tpu.memory_space<vmem>>, vector<8x128xf32>
    tpu.vector_store %arg11[%206, %c0_51], %205 {strides = array<i32>} : memref<64x128xf32, #tpu.memory_space<vmem>>, vector<8x128xf32>,
    %c6_i32 = arith.constant 6 : i32
    %c8_i32_52 = arith.constant 8 : i32
    %208 = arith.muli %c6_i32, %c8_i32_52 : i32
    %209 = tpu.assume_multiple %208, 8 : i32
    %210 = arith.index_cast %209 : i32 to index
    %c0_53 = arith.constant 0 : index
    %211 = vector.load %arg10[%210, %c0_53] : memref<64x512xf32, #tpu.memory_space<vmem>>, vector<8x512xf32>
    %cst_54 = arith.constant dense<0.000000e+00> : vector<8x512xf32>
    %212 = tpu.matmul %205, %7, %cst_54 {dimension_numbers = #tpu.dot_dimension_numbers<[1], [0], [0], [1], [0, 0, 1, 1], [], []>} : vector<8x128xf32>, vector<128x512xf32>, vector<8x512xf32> -> vector<8x512xf32>
    %213 = arith.addf %211, %212 : vector<8x512xf32>
    %214 = vector.extract_strided_slice %213 {offsets = [0, 0], sizes = [8, 128], strides = [1, 1]} : vector<8x512xf32> to vector<8x128xf32>
    %215 = arith.negf %214 : vector<8x128xf32>
    %216 = math.exp %215 : vector<8x128xf32>
    %cst_55 = arith.constant 1.000000e+00 : f32
    %217 = vector.broadcast %cst_55 : f32 to vector<8x128xf32>
    %218 = arith.addf %217, %216 : vector<8x128xf32>
    %219 = arith.divf %217, %218 : vector<8x128xf32>
    %220 = vector.extract_strided_slice %213 {offsets = [0, 128], sizes = [8, 128], strides = [1, 1]} : vector<8x512xf32> to vector<8x128xf32>
    %221 = arith.negf %220 : vector<8x128xf32>
    %222 = math.exp %221 : vector<8x128xf32>
    %cst_56 = arith.constant 1.000000e+00 : f32
    %223 = vector.broadcast %cst_56 : f32 to vector<8x128xf32>
    %224 = arith.addf %223, %222 : vector<8x128xf32>
    %225 = arith.divf %223, %224 : vector<8x128xf32>
    %226 = vector.extract_strided_slice %213 {offsets = [0, 256], sizes = [8, 128], strides = [1, 1]} : vector<8x512xf32> to vector<8x128xf32>
    %227 = math.tanh %226 : vector<8x128xf32>
    %228 = vector.extract_strided_slice %213 {offsets = [0, 384], sizes = [8, 128], strides = [1, 1]} : vector<8x512xf32> to vector<8x128xf32>
    %229 = arith.negf %228 : vector<8x128xf32>
    %230 = math.exp %229 : vector<8x128xf32>
    %cst_57 = arith.constant 1.000000e+00 : f32
    %231 = vector.broadcast %cst_57 : f32 to vector<8x128xf32>
    %232 = arith.addf %231, %230 : vector<8x128xf32>
    %233 = arith.divf %231, %232 : vector<8x128xf32>
    %234 = arith.mulf %225, %203 : vector<8x128xf32>
    %235 = arith.mulf %219, %227 : vector<8x128xf32>
    %236 = arith.addf %234, %235 : vector<8x128xf32>
    %237 = math.tanh %236 : vector<8x128xf32>
    %238 = arith.mulf %233, %237 : vector<8x128xf32>
    %239 = arith.index_cast %209 : i32 to index
    %c0_58 = arith.constant 0 : index
    %240 = vector.load %arg11[%239, %c0_58] : memref<64x128xf32, #tpu.memory_space<vmem>>, vector<8x128xf32>
    tpu.vector_store %arg11[%239, %c0_58], %238 {strides = array<i32>} : memref<64x128xf32, #tpu.memory_space<vmem>>, vector<8x128xf32>,
    %c7_i32 = arith.constant 7 : i32
    %c8_i32_59 = arith.constant 8 : i32
    %241 = arith.muli %c7_i32, %c8_i32_59 : i32
    %242 = tpu.assume_multiple %241, 8 : i32
    %243 = arith.index_cast %242 : i32 to index
    %c0_60 = arith.constant 0 : index
    %244 = vector.load %arg10[%243, %c0_60] : memref<64x512xf32, #tpu.memory_space<vmem>>, vector<8x512xf32>
    %cst_61 = arith.constant dense<0.000000e+00> : vector<8x512xf32>
    %245 = tpu.matmul %238, %7, %cst_61 {dimension_numbers = #tpu.dot_dimension_numbers<[1], [0], [0], [1], [0, 0, 1, 1], [], []>} : vector<8x128xf32>, vector<128x512xf32>, vector<8x512xf32> -> vector<8x512xf32>
    %246 = arith.addf %244, %245 : vector<8x512xf32>
    %247 = vector.extract_strided_slice %246 {offsets = [0, 0], sizes = [8, 128], strides = [1, 1]} : vector<8x512xf32> to vector<8x128xf32>
    %248 = arith.negf %247 : vector<8x128xf32>
    %249 = math.exp %248 : vector<8x128xf32>
    %cst_62 = arith.constant 1.000000e+00 : f32
    %250 = vector.broadcast %cst_62 : f32 to vector<8x128xf32>
    %251 = arith.addf %250, %249 : vector<8x128xf32>
    %252 = arith.divf %250, %251 : vector<8x128xf32>
    %253 = vector.extract_strided_slice %246 {offsets = [0, 128], sizes = [8, 128], strides = [1, 1]} : vector<8x512xf32> to vector<8x128xf32>
    %254 = arith.negf %253 : vector<8x128xf32>
    %255 = math.exp %254 : vector<8x128xf32>
    %cst_63 = arith.constant 1.000000e+00 : f32
    %256 = vector.broadcast %cst_63 : f32 to vector<8x128xf32>
    %257 = arith.addf %256, %255 : vector<8x128xf32>
    %258 = arith.divf %256, %257 : vector<8x128xf32>
    %259 = vector.extract_strided_slice %246 {offsets = [0, 256], sizes = [8, 128], strides = [1, 1]} : vector<8x512xf32> to vector<8x128xf32>
    %260 = math.tanh %259 : vector<8x128xf32>
    %261 = vector.extract_strided_slice %246 {offsets = [0, 384], sizes = [8, 128], strides = [1, 1]} : vector<8x512xf32> to vector<8x128xf32>
    %262 = arith.negf %261 : vector<8x128xf32>
    %263 = math.exp %262 : vector<8x128xf32>
    %cst_64 = arith.constant 1.000000e+00 : f32
    %264 = vector.broadcast %cst_64 : f32 to vector<8x128xf32>
    %265 = arith.addf %264, %263 : vector<8x128xf32>
    %266 = arith.divf %264, %265 : vector<8x128xf32>
    %267 = arith.mulf %258, %236 : vector<8x128xf32>
    %268 = arith.mulf %252, %260 : vector<8x128xf32>
    %269 = arith.addf %267, %268 : vector<8x128xf32>
    %270 = math.tanh %269 : vector<8x128xf32>
    %271 = arith.mulf %266, %270 : vector<8x128xf32>
    %272 = arith.index_cast %242 : i32 to index
    %c0_65 = arith.constant 0 : index
    %273 = vector.load %arg11[%272, %c0_65] : memref<64x128xf32, #tpu.memory_space<vmem>>, vector<8x128xf32>
    tpu.vector_store %arg11[%272, %c0_65], %271 {strides = array<i32>} : memref<64x128xf32, #tpu.memory_space<vmem>>, vector<8x128xf32>,
    %c8_i32_66 = arith.constant 8 : i32
    %c0_67 = arith.constant 0 : index
    %c0_68 = arith.constant 0 : index
    %274 = vector.load %arg11[%c0_67, %c0_68] : memref<64x128xf32, #tpu.memory_space<vmem>>, vector<64x128xf32>
    %c0_69 = arith.constant 0 : index
    %c0_70 = arith.constant 0 : index
    %275 = vector.load %arg4[%c0_69, %c0_70] : memref<128x512xf32, #tpu.memory_space<vmem>>, vector<128x512xf32>
    %cst_71 = arith.constant dense<0.000000e+00> : vector<64x512xf32>
    %276 = tpu.matmul %274, %275, %cst_71 {dimension_numbers = #tpu.dot_dimension_numbers<[1], [0], [0], [1], [0, 0, 1, 1], [], []>} : vector<64x128xf32>, vector<128x512xf32>, vector<64x512xf32> -> vector<64x512xf32>
    %c0_72 = arith.constant 0 : index
    %c0_73 = arith.constant 0 : index
    %277 = vector.load %arg6[%c0_72, %c0_73] : memref<1x512xf32, #tpu.memory_space<vmem>>, vector<1x512xf32>
    %278 = vector.broadcast %277 : vector<1x512xf32> to vector<64x512xf32>
    %279 = arith.addf %276, %278 : vector<64x512xf32>
    %c0_74 = arith.constant 0 : index
    %c0_75 = arith.constant 0 : index
    %280 = vector.load %arg10[%c0_74, %c0_75] : memref<64x512xf32, #tpu.memory_space<vmem>>, vector<64x512xf32>
    tpu.vector_store %arg10[%c0_74, %c0_75], %279 {strides = array<i32>} : memref<64x512xf32, #tpu.memory_space<vmem>>, vector<64x512xf32>,
    %c0_76 = arith.constant 0 : index
    %c0_77 = arith.constant 0 : index
    %281 = vector.load %arg5[%c0_76, %c0_77] : memref<128x512xf32, #tpu.memory_space<vmem>>, vector<128x512xf32>
    %cst_78 = arith.constant 0.000000e+00 : f32
    %282 = vector.broadcast %cst_78 : f32 to vector<8x128xf32>
    %cst_79 = arith.constant 0.000000e+00 : f32
    %283 = vector.broadcast %cst_79 : f32 to vector<8x128xf32>
    %c0_i32_80 = arith.constant 0 : i32
    %c8_i32_81 = arith.constant 8 : i32
    %284 = arith.muli %c0_i32_80, %c8_i32_81 : i32
    %285 = tpu.assume_multiple %284, 8 : i32
    %286 = arith.index_cast %285 : i32 to index
    %c0_82 = arith.constant 0 : index
    %287 = vector.load %arg10[%286, %c0_82] : memref<64x512xf32, #tpu.memory_space<vmem>>, vector<8x512xf32>
    %cst_83 = arith.constant dense<0.000000e+00> : vector<8x512xf32>
    %288 = tpu.matmul %282, %281, %cst_83 {dimension_numbers = #tpu.dot_dimension_numbers<[1], [0], [0], [1], [0, 0, 1, 1], [], []>} : vector<8x128xf32>, vector<128x512xf32>, vector<8x512xf32> -> vector<8x512xf32>
    %289 = arith.addf %287, %288 : vector<8x512xf32>
    %290 = vector.extract_strided_slice %289 {offsets = [0, 0], sizes = [8, 128], strides = [1, 1]} : vector<8x512xf32> to vector<8x128xf32>
    %291 = arith.negf %290 : vector<8x128xf32>
    %292 = math.exp %291 : vector<8x128xf32>
    %cst_84 = arith.constant 1.000000e+00 : f32
    %293 = vector.broadcast %cst_84 : f32 to vector<8x128xf32>
    %294 = arith.addf %293, %292 : vector<8x128xf32>
    %295 = arith.divf %293, %294 : vector<8x128xf32>
    %296 = vector.extract_strided_slice %289 {offsets = [0, 128], sizes = [8, 128], strides = [1, 1]} : vector<8x512xf32> to vector<8x128xf32>
    %297 = arith.negf %296 : vector<8x128xf32>
    %298 = math.exp %297 : vector<8x128xf32>
    %cst_85 = arith.constant 1.000000e+00 : f32
    %299 = vector.broadcast %cst_85 : f32 to vector<8x128xf32>
    %300 = arith.addf %299, %298 : vector<8x128xf32>
    %301 = arith.divf %299, %300 : vector<8x128xf32>
    %302 = vector.extract_strided_slice %289 {offsets = [0, 256], sizes = [8, 128], strides = [1, 1]} : vector<8x512xf32> to vector<8x128xf32>
    %303 = math.tanh %302 : vector<8x128xf32>
    %304 = vector.extract_strided_slice %289 {offsets = [0, 384], sizes = [8, 128], strides = [1, 1]} : vector<8x512xf32> to vector<8x128xf32>
    %305 = arith.negf %304 : vector<8x128xf32>
    %306 = math.exp %305 : vector<8x128xf32>
    %cst_86 = arith.constant 1.000000e+00 : f32
    %307 = vector.broadcast %cst_86 : f32 to vector<8x128xf32>
    %308 = arith.addf %307, %306 : vector<8x128xf32>
    %309 = arith.divf %307, %308 : vector<8x128xf32>
    %310 = arith.mulf %301, %283 : vector<8x128xf32>
    %311 = arith.mulf %295, %303 : vector<8x128xf32>
    %312 = arith.addf %310, %311 : vector<8x128xf32>
    %313 = math.tanh %312 : vector<8x128xf32>
    %314 = arith.mulf %309, %313 : vector<8x128xf32>
    %c1_i32_87 = arith.constant 1 : i32
    %c8_i32_88 = arith.constant 8 : i32
    %315 = arith.muli %c1_i32_87, %c8_i32_88 : i32
    %316 = tpu.assume_multiple %315, 8 : i32
    %317 = arith.index_cast %316 : i32 to index
    %c0_89 = arith.constant 0 : index
    %318 = vector.load %arg10[%317, %c0_89] : memref<64x512xf32, #tpu.memory_space<vmem>>, vector<8x512xf32>
    %cst_90 = arith.constant dense<0.000000e+00> : vector<8x512xf32>
    %319 = tpu.matmul %314, %281, %cst_90 {dimension_numbers = #tpu.dot_dimension_numbers<[1], [0], [0], [1], [0, 0, 1, 1], [], []>} : vector<8x128xf32>, vector<128x512xf32>, vector<8x512xf32> -> vector<8x512xf32>
    %320 = arith.addf %318, %319 : vector<8x512xf32>
    %321 = vector.extract_strided_slice %320 {offsets = [0, 0], sizes = [8, 128], strides = [1, 1]} : vector<8x512xf32> to vector<8x128xf32>
    %322 = arith.negf %321 : vector<8x128xf32>
    %323 = math.exp %322 : vector<8x128xf32>
    %cst_91 = arith.constant 1.000000e+00 : f32
    %324 = vector.broadcast %cst_91 : f32 to vector<8x128xf32>
    %325 = arith.addf %324, %323 : vector<8x128xf32>
    %326 = arith.divf %324, %325 : vector<8x128xf32>
    %327 = vector.extract_strided_slice %320 {offsets = [0, 128], sizes = [8, 128], strides = [1, 1]} : vector<8x512xf32> to vector<8x128xf32>
    %328 = arith.negf %327 : vector<8x128xf32>
    %329 = math.exp %328 : vector<8x128xf32>
    %cst_92 = arith.constant 1.000000e+00 : f32
    %330 = vector.broadcast %cst_92 : f32 to vector<8x128xf32>
    %331 = arith.addf %330, %329 : vector<8x128xf32>
    %332 = arith.divf %330, %331 : vector<8x128xf32>
    %333 = vector.extract_strided_slice %320 {offsets = [0, 256], sizes = [8, 128], strides = [1, 1]} : vector<8x512xf32> to vector<8x128xf32>
    %334 = math.tanh %333 : vector<8x128xf32>
    %335 = vector.extract_strided_slice %320 {offsets = [0, 384], sizes = [8, 128], strides = [1, 1]} : vector<8x512xf32> to vector<8x128xf32>
    %336 = arith.negf %335 : vector<8x128xf32>
    %337 = math.exp %336 : vector<8x128xf32>
    %cst_93 = arith.constant 1.000000e+00 : f32
    %338 = vector.broadcast %cst_93 : f32 to vector<8x128xf32>
    %339 = arith.addf %338, %337 : vector<8x128xf32>
    %340 = arith.divf %338, %339 : vector<8x128xf32>
    %341 = arith.mulf %332, %312 : vector<8x128xf32>
    %342 = arith.mulf %326, %334 : vector<8x128xf32>
    %343 = arith.addf %341, %342 : vector<8x128xf32>
    %344 = math.tanh %343 : vector<8x128xf32>
    %345 = arith.mulf %340, %344 : vector<8x128xf32>
    %c2_i32_94 = arith.constant 2 : i32
    %c8_i32_95 = arith.constant 8 : i32
    %346 = arith.muli %c2_i32_94, %c8_i32_95 : i32
    %347 = tpu.assume_multiple %346, 8 : i32
    %348 = arith.index_cast %347 : i32 to index
    %c0_96 = arith.constant 0 : index
    %349 = vector.load %arg10[%348, %c0_96] : memref<64x512xf32, #tpu.memory_space<vmem>>, vector<8x512xf32>
    %cst_97 = arith.constant dense<0.000000e+00> : vector<8x512xf32>
    %350 = tpu.matmul %345, %281, %cst_97 {dimension_numbers = #tpu.dot_dimension_numbers<[1], [0], [0], [1], [0, 0, 1, 1], [], []>} : vector<8x128xf32>, vector<128x512xf32>, vector<8x512xf32> -> vector<8x512xf32>
    %351 = arith.addf %349, %350 : vector<8x512xf32>
    %352 = vector.extract_strided_slice %351 {offsets = [0, 0], sizes = [8, 128], strides = [1, 1]} : vector<8x512xf32> to vector<8x128xf32>
    %353 = arith.negf %352 : vector<8x128xf32>
    %354 = math.exp %353 : vector<8x128xf32>
    %cst_98 = arith.constant 1.000000e+00 : f32
    %355 = vector.broadcast %cst_98 : f32 to vector<8x128xf32>
    %356 = arith.addf %355, %354 : vector<8x128xf32>
    %357 = arith.divf %355, %356 : vector<8x128xf32>
    %358 = vector.extract_strided_slice %351 {offsets = [0, 128], sizes = [8, 128], strides = [1, 1]} : vector<8x512xf32> to vector<8x128xf32>
    %359 = arith.negf %358 : vector<8x128xf32>
    %360 = math.exp %359 : vector<8x128xf32>
    %cst_99 = arith.constant 1.000000e+00 : f32
    %361 = vector.broadcast %cst_99 : f32 to vector<8x128xf32>
    %362 = arith.addf %361, %360 : vector<8x128xf32>
    %363 = arith.divf %361, %362 : vector<8x128xf32>
    %364 = vector.extract_strided_slice %351 {offsets = [0, 256], sizes = [8, 128], strides = [1, 1]} : vector<8x512xf32> to vector<8x128xf32>
    %365 = math.tanh %364 : vector<8x128xf32>
    %366 = vector.extract_strided_slice %351 {offsets = [0, 384], sizes = [8, 128], strides = [1, 1]} : vector<8x512xf32> to vector<8x128xf32>
    %367 = arith.negf %366 : vector<8x128xf32>
    %368 = math.exp %367 : vector<8x128xf32>
    %cst_100 = arith.constant 1.000000e+00 : f32
    %369 = vector.broadcast %cst_100 : f32 to vector<8x128xf32>
    %370 = arith.addf %369, %368 : vector<8x128xf32>
    %371 = arith.divf %369, %370 : vector<8x128xf32>
    %372 = arith.mulf %363, %343 : vector<8x128xf32>
    %373 = arith.mulf %357, %365 : vector<8x128xf32>
    %374 = arith.addf %372, %373 : vector<8x128xf32>
    %375 = math.tanh %374 : vector<8x128xf32>
    %376 = arith.mulf %371, %375 : vector<8x128xf32>
    %c3_i32_101 = arith.constant 3 : i32
    %c8_i32_102 = arith.constant 8 : i32
    %377 = arith.muli %c3_i32_101, %c8_i32_102 : i32
    %378 = tpu.assume_multiple %377, 8 : i32
    %379 = arith.index_cast %378 : i32 to index
    %c0_103 = arith.constant 0 : index
    %380 = vector.load %arg10[%379, %c0_103] : memref<64x512xf32, #tpu.memory_space<vmem>>, vector<8x512xf32>
    %cst_104 = arith.constant dense<0.000000e+00> : vector<8x512xf32>
    %381 = tpu.matmul %376, %281, %cst_104 {dimension_numbers = #tpu.dot_dimension_numbers<[1], [0], [0], [1], [0, 0, 1, 1], [], []>} : vector<8x128xf32>, vector<128x512xf32>, vector<8x512xf32> -> vector<8x512xf32>
    %382 = arith.addf %380, %381 : vector<8x512xf32>
    %383 = vector.extract_strided_slice %382 {offsets = [0, 0], sizes = [8, 128], strides = [1, 1]} : vector<8x512xf32> to vector<8x128xf32>
    %384 = arith.negf %383 : vector<8x128xf32>
    %385 = math.exp %384 : vector<8x128xf32>
    %cst_105 = arith.constant 1.000000e+00 : f32
    %386 = vector.broadcast %cst_105 : f32 to vector<8x128xf32>
    %387 = arith.addf %386, %385 : vector<8x128xf32>
    %388 = arith.divf %386, %387 : vector<8x128xf32>
    %389 = vector.extract_strided_slice %382 {offsets = [0, 128], sizes = [8, 128], strides = [1, 1]} : vector<8x512xf32> to vector<8x128xf32>
    %390 = arith.negf %389 : vector<8x128xf32>
    %391 = math.exp %390 : vector<8x128xf32>
    %cst_106 = arith.constant 1.000000e+00 : f32
    %392 = vector.broadcast %cst_106 : f32 to vector<8x128xf32>
    %393 = arith.addf %392, %391 : vector<8x128xf32>
    %394 = arith.divf %392, %393 : vector<8x128xf32>
    %395 = vector.extract_strided_slice %382 {offsets = [0, 256], sizes = [8, 128], strides = [1, 1]} : vector<8x512xf32> to vector<8x128xf32>
    %396 = math.tanh %395 : vector<8x128xf32>
    %397 = vector.extract_strided_slice %382 {offsets = [0, 384], sizes = [8, 128], strides = [1, 1]} : vector<8x512xf32> to vector<8x128xf32>
    %398 = arith.negf %397 : vector<8x128xf32>
    %399 = math.exp %398 : vector<8x128xf32>
    %cst_107 = arith.constant 1.000000e+00 : f32
    %400 = vector.broadcast %cst_107 : f32 to vector<8x128xf32>
    %401 = arith.addf %400, %399 : vector<8x128xf32>
    %402 = arith.divf %400, %401 : vector<8x128xf32>
    %403 = arith.mulf %394, %374 : vector<8x128xf32>
    %404 = arith.mulf %388, %396 : vector<8x128xf32>
    %405 = arith.addf %403, %404 : vector<8x128xf32>
    %406 = math.tanh %405 : vector<8x128xf32>
    %407 = arith.mulf %402, %406 : vector<8x128xf32>
    %c4_i32_108 = arith.constant 4 : i32
    %c8_i32_109 = arith.constant 8 : i32
    %408 = arith.muli %c4_i32_108, %c8_i32_109 : i32
    %409 = tpu.assume_multiple %408, 8 : i32
    %410 = arith.index_cast %409 : i32 to index
    %c0_110 = arith.constant 0 : index
    %411 = vector.load %arg10[%410, %c0_110] : memref<64x512xf32, #tpu.memory_space<vmem>>, vector<8x512xf32>
    %cst_111 = arith.constant dense<0.000000e+00> : vector<8x512xf32>
    %412 = tpu.matmul %407, %281, %cst_111 {dimension_numbers = #tpu.dot_dimension_numbers<[1], [0], [0], [1], [0, 0, 1, 1], [], []>} : vector<8x128xf32>, vector<128x512xf32>, vector<8x512xf32> -> vector<8x512xf32>
    %413 = arith.addf %411, %412 : vector<8x512xf32>
    %414 = vector.extract_strided_slice %413 {offsets = [0, 0], sizes = [8, 128], strides = [1, 1]} : vector<8x512xf32> to vector<8x128xf32>
    %415 = arith.negf %414 : vector<8x128xf32>
    %416 = math.exp %415 : vector<8x128xf32>
    %cst_112 = arith.constant 1.000000e+00 : f32
    %417 = vector.broadcast %cst_112 : f32 to vector<8x128xf32>
    %418 = arith.addf %417, %416 : vector<8x128xf32>
    %419 = arith.divf %417, %418 : vector<8x128xf32>
    %420 = vector.extract_strided_slice %413 {offsets = [0, 128], sizes = [8, 128], strides = [1, 1]} : vector<8x512xf32> to vector<8x128xf32>
    %421 = arith.negf %420 : vector<8x128xf32>
    %422 = math.exp %421 : vector<8x128xf32>
    %cst_113 = arith.constant 1.000000e+00 : f32
    %423 = vector.broadcast %cst_113 : f32 to vector<8x128xf32>
    %424 = arith.addf %423, %422 : vector<8x128xf32>
    %425 = arith.divf %423, %424 : vector<8x128xf32>
    %426 = vector.extract_strided_slice %413 {offsets = [0, 256], sizes = [8, 128], strides = [1, 1]} : vector<8x512xf32> to vector<8x128xf32>
    %427 = math.tanh %426 : vector<8x128xf32>
    %428 = vector.extract_strided_slice %413 {offsets = [0, 384], sizes = [8, 128], strides = [1, 1]} : vector<8x512xf32> to vector<8x128xf32>
    %429 = arith.negf %428 : vector<8x128xf32>
    %430 = math.exp %429 : vector<8x128xf32>
    %cst_114 = arith.constant 1.000000e+00 : f32
    %431 = vector.broadcast %cst_114 : f32 to vector<8x128xf32>
    %432 = arith.addf %431, %430 : vector<8x128xf32>
    %433 = arith.divf %431, %432 : vector<8x128xf32>
    %434 = arith.mulf %425, %405 : vector<8x128xf32>
    %435 = arith.mulf %419, %427 : vector<8x128xf32>
    %436 = arith.addf %434, %435 : vector<8x128xf32>
    %437 = math.tanh %436 : vector<8x128xf32>
    %438 = arith.mulf %433, %437 : vector<8x128xf32>
    %c5_i32_115 = arith.constant 5 : i32
    %c8_i32_116 = arith.constant 8 : i32
    %439 = arith.muli %c5_i32_115, %c8_i32_116 : i32
    %440 = tpu.assume_multiple %439, 8 : i32
    %441 = arith.index_cast %440 : i32 to index
    %c0_117 = arith.constant 0 : index
    %442 = vector.load %arg10[%441, %c0_117] : memref<64x512xf32, #tpu.memory_space<vmem>>, vector<8x512xf32>
    %cst_118 = arith.constant dense<0.000000e+00> : vector<8x512xf32>
    %443 = tpu.matmul %438, %281, %cst_118 {dimension_numbers = #tpu.dot_dimension_numbers<[1], [0], [0], [1], [0, 0, 1, 1], [], []>} : vector<8x128xf32>, vector<128x512xf32>, vector<8x512xf32> -> vector<8x512xf32>
    %444 = arith.addf %442, %443 : vector<8x512xf32>
    %445 = vector.extract_strided_slice %444 {offsets = [0, 0], sizes = [8, 128], strides = [1, 1]} : vector<8x512xf32> to vector<8x128xf32>
    %446 = arith.negf %445 : vector<8x128xf32>
    %447 = math.exp %446 : vector<8x128xf32>
    %cst_119 = arith.constant 1.000000e+00 : f32
    %448 = vector.broadcast %cst_119 : f32 to vector<8x128xf32>
    %449 = arith.addf %448, %447 : vector<8x128xf32>
    %450 = arith.divf %448, %449 : vector<8x128xf32>
    %451 = vector.extract_strided_slice %444 {offsets = [0, 128], sizes = [8, 128], strides = [1, 1]} : vector<8x512xf32> to vector<8x128xf32>
    %452 = arith.negf %451 : vector<8x128xf32>
    %453 = math.exp %452 : vector<8x128xf32>
    %cst_120 = arith.constant 1.000000e+00 : f32
    %454 = vector.broadcast %cst_120 : f32 to vector<8x128xf32>
    %455 = arith.addf %454, %453 : vector<8x128xf32>
    %456 = arith.divf %454, %455 : vector<8x128xf32>
    %457 = vector.extract_strided_slice %444 {offsets = [0, 256], sizes = [8, 128], strides = [1, 1]} : vector<8x512xf32> to vector<8x128xf32>
    %458 = math.tanh %457 : vector<8x128xf32>
    %459 = vector.extract_strided_slice %444 {offsets = [0, 384], sizes = [8, 128], strides = [1, 1]} : vector<8x512xf32> to vector<8x128xf32>
    %460 = arith.negf %459 : vector<8x128xf32>
    %461 = math.exp %460 : vector<8x128xf32>
    %cst_121 = arith.constant 1.000000e+00 : f32
    %462 = vector.broadcast %cst_121 : f32 to vector<8x128xf32>
    %463 = arith.addf %462, %461 : vector<8x128xf32>
    %464 = arith.divf %462, %463 : vector<8x128xf32>
    %465 = arith.mulf %456, %436 : vector<8x128xf32>
    %466 = arith.mulf %450, %458 : vector<8x128xf32>
    %467 = arith.addf %465, %466 : vector<8x128xf32>
    %468 = math.tanh %467 : vector<8x128xf32>
    %469 = arith.mulf %464, %468 : vector<8x128xf32>
    %c6_i32_122 = arith.constant 6 : i32
    %c8_i32_123 = arith.constant 8 : i32
    %470 = arith.muli %c6_i32_122, %c8_i32_123 : i32
    %471 = tpu.assume_multiple %470, 8 : i32
    %472 = arith.index_cast %471 : i32 to index
    %c0_124 = arith.constant 0 : index
    %473 = vector.load %arg10[%472, %c0_124] : memref<64x512xf32, #tpu.memory_space<vmem>>, vector<8x512xf32>
    %cst_125 = arith.constant dense<0.000000e+00> : vector<8x512xf32>
    %474 = tpu.matmul %469, %281, %cst_125 {dimension_numbers = #tpu.dot_dimension_numbers<[1], [0], [0], [1], [0, 0, 1, 1], [], []>} : vector<8x128xf32>, vector<128x512xf32>, vector<8x512xf32> -> vector<8x512xf32>
    %475 = arith.addf %473, %474 : vector<8x512xf32>
    %476 = vector.extract_strided_slice %475 {offsets = [0, 0], sizes = [8, 128], strides = [1, 1]} : vector<8x512xf32> to vector<8x128xf32>
    %477 = arith.negf %476 : vector<8x128xf32>
    %478 = math.exp %477 : vector<8x128xf32>
    %cst_126 = arith.constant 1.000000e+00 : f32
    %479 = vector.broadcast %cst_126 : f32 to vector<8x128xf32>
    %480 = arith.addf %479, %478 : vector<8x128xf32>
    %481 = arith.divf %479, %480 : vector<8x128xf32>
    %482 = vector.extract_strided_slice %475 {offsets = [0, 128], sizes = [8, 128], strides = [1, 1]} : vector<8x512xf32> to vector<8x128xf32>
    %483 = arith.negf %482 : vector<8x128xf32>
    %484 = math.exp %483 : vector<8x128xf32>
    %cst_127 = arith.constant 1.000000e+00 : f32
    %485 = vector.broadcast %cst_127 : f32 to vector<8x128xf32>
    %486 = arith.addf %485, %484 : vector<8x128xf32>
    %487 = arith.divf %485, %486 : vector<8x128xf32>
    %488 = vector.extract_strided_slice %475 {offsets = [0, 256], sizes = [8, 128], strides = [1, 1]} : vector<8x512xf32> to vector<8x128xf32>
    %489 = math.tanh %488 : vector<8x128xf32>
    %490 = vector.extract_strided_slice %475 {offsets = [0, 384], sizes = [8, 128], strides = [1, 1]} : vector<8x512xf32> to vector<8x128xf32>
    %491 = arith.negf %490 : vector<8x128xf32>
    %492 = math.exp %491 : vector<8x128xf32>
    %cst_128 = arith.constant 1.000000e+00 : f32
    %493 = vector.broadcast %cst_128 : f32 to vector<8x128xf32>
    %494 = arith.addf %493, %492 : vector<8x128xf32>
    %495 = arith.divf %493, %494 : vector<8x128xf32>
    %496 = arith.mulf %487, %467 : vector<8x128xf32>
    %497 = arith.mulf %481, %489 : vector<8x128xf32>
    %498 = arith.addf %496, %497 : vector<8x128xf32>
    %499 = math.tanh %498 : vector<8x128xf32>
    %500 = arith.mulf %495, %499 : vector<8x128xf32>
    %c7_i32_129 = arith.constant 7 : i32
    %c8_i32_130 = arith.constant 8 : i32
    %501 = arith.muli %c7_i32_129, %c8_i32_130 : i32
    %502 = tpu.assume_multiple %501, 8 : i32
    %503 = arith.index_cast %502 : i32 to index
    %c0_131 = arith.constant 0 : index
    %504 = vector.load %arg10[%503, %c0_131] : memref<64x512xf32, #tpu.memory_space<vmem>>, vector<8x512xf32>
    %cst_132 = arith.constant dense<0.000000e+00> : vector<8x512xf32>
    %505 = tpu.matmul %500, %281, %cst_132 {dimension_numbers = #tpu.dot_dimension_numbers<[1], [0], [0], [1], [0, 0, 1, 1], [], []>} : vector<8x128xf32>, vector<128x512xf32>, vector<8x512xf32> -> vector<8x512xf32>
    %506 = arith.addf %504, %505 : vector<8x512xf32>
    %507 = vector.extract_strided_slice %506 {offsets = [0, 0], sizes = [8, 128], strides = [1, 1]} : vector<8x512xf32> to vector<8x128xf32>
    %508 = arith.negf %507 : vector<8x128xf32>
    %509 = math.exp %508 : vector<8x128xf32>
    %cst_133 = arith.constant 1.000000e+00 : f32
    %510 = vector.broadcast %cst_133 : f32 to vector<8x128xf32>
    %511 = arith.addf %510, %509 : vector<8x128xf32>
    %512 = arith.divf %510, %511 : vector<8x128xf32>
    %513 = vector.extract_strided_slice %506 {offsets = [0, 128], sizes = [8, 128], strides = [1, 1]} : vector<8x512xf32> to vector<8x128xf32>
    %514 = arith.negf %513 : vector<8x128xf32>
    %515 = math.exp %514 : vector<8x128xf32>
    %cst_134 = arith.constant 1.000000e+00 : f32
    %516 = vector.broadcast %cst_134 : f32 to vector<8x128xf32>
    %517 = arith.addf %516, %515 : vector<8x128xf32>
    %518 = arith.divf %516, %517 : vector<8x128xf32>
    %519 = vector.extract_strided_slice %506 {offsets = [0, 256], sizes = [8, 128], strides = [1, 1]} : vector<8x512xf32> to vector<8x128xf32>
    %520 = math.tanh %519 : vector<8x128xf32>
    %521 = vector.extract_strided_slice %506 {offsets = [0, 384], sizes = [8, 128], strides = [1, 1]} : vector<8x512xf32> to vector<8x128xf32>
    %522 = arith.negf %521 : vector<8x128xf32>
    %523 = math.exp %522 : vector<8x128xf32>
    %cst_135 = arith.constant 1.000000e+00 : f32
    %524 = vector.broadcast %cst_135 : f32 to vector<8x128xf32>
    %525 = arith.addf %524, %523 : vector<8x128xf32>
    %526 = arith.divf %524, %525 : vector<8x128xf32>
    %527 = arith.mulf %518, %498 : vector<8x128xf32>
    %528 = arith.mulf %512, %520 : vector<8x128xf32>
    %529 = arith.addf %527, %528 : vector<8x128xf32>
    %530 = math.tanh %529 : vector<8x128xf32>
    %531 = arith.mulf %526, %530 : vector<8x128xf32>
    %c8_i32_136 = arith.constant 8 : i32
    %c0_137 = arith.constant 0 : index
    %c0_138 = arith.constant 0 : index
    %532 = vector.load %arg7[%c0_137, %c0_138] : memref<128x128xf32, #tpu.memory_space<vmem>>, vector<128x128xf32>
    %cst_139 = arith.constant dense<0.000000e+00> : vector<8x128xf32>
    %533 = tpu.matmul %531, %532, %cst_139 {dimension_numbers = #tpu.dot_dimension_numbers<[1], [0], [0], [1], [0, 0, 1, 1], [], []>} : vector<8x128xf32>, vector<128x128xf32>, vector<8x128xf32> -> vector<8x128xf32>
    %c0_140 = arith.constant 0 : index
    %c0_141 = arith.constant 0 : index
    %534 = vector.load %arg8[%c0_140, %c0_141] : memref<1x128xf32, #tpu.memory_space<vmem>>, vector<1x128xf32>
    %535 = vector.broadcast %534 : vector<1x128xf32> to vector<8x128xf32>
    %536 = arith.addf %533, %535 : vector<8x128xf32>
    %c0_142 = arith.constant 0 : index
    %c0_143 = arith.constant 0 : index
    %537 = vector.load %arg9[%c0_142, %c0_143] : memref<8x128xf32, #tpu.memory_space<vmem>>, vector<8x128xf32>
    tpu.vector_store %arg9[%c0_142, %c0_143], %536 {strides = array<i32>} : memref<8x128xf32, #tpu.memory_space<vmem>>, vector<8x128xf32>,
    return
  }
}

</mosaic_0001>

<bundles_post_ra>
// kernel: tpu_custom_call.1
= control target key start
LH: loop header
LB: loop body
LE: loop exit
PB: predicated region body
PF: predicated region fallthrough
CT: control target
= control target key end

     0   :  { %14 = vsyncpa [#allocation5], 0  ;;  %s5995_s0 = inlined_call_operand.vmem [shape: f32[64,8], index: 0, kind: input, shape index: {}]   ;;  %s5996_s1 = inlined_call_operand.vmem [shape: f32[8,512], index: 1, kind: input, shape index: {}]   ;;  %s5997_s2 = inlined_call_operand.hbm [shape: f32[128,512], index: 2, kind: input, shape index: {}]   ;;  %s5998_s3 = inlined_call_operand.vmem [shape: f32[1,512], index: 3, kind: input, shape index: {}]   ;;  %s5999_s4 = inlined_call_operand.hbm [shape: f32[128,512], index: 4, kind: input, shape index: {}]   ;;  %s6000_s5 = inlined_call_operand.hbm [shape: f32[128,512], index: 5, kind: input, shape index: {}]   ;;  %s6001_s6 = inlined_call_operand.vmem [shape: f32[1,512], index: 6, kind: input, shape index: {}]   ;;  %s6002_s7 = inlined_call_operand.hbm [shape: f32[128,128], index: 7, kind: input, shape index: {}]   ;;  %s6003_s8 = inlined_call_operand.vmem [shape: f32[1,128], index: 8, kind: input, shape index: {}]   ;;  %s6004_s9 = inlined_call_operand.hbm [shape: f32[8,128], index: 9, kind: output, shape index: {}]  }
   0x1   :  { %15 = vsyncpa [#allocation8], 0 }
   0x2   :  { %16 = vsyncpa [#allocation11], 0 }
   0x3   :  { %17 = vsyncpa [#allocation6], 0  ;;  %s41_s11 = sshll.u32 %s5999_s4, 4  ;;  %s3873_s12 = smov [#allocation7]   ;;  %s42_s11 = int_to_ptr.hbm [resolvable:$true] %s41_s11 }
   0x4   :  { %s43_s13 = sshll.u32 %s3873_s12, 4  ;;  %s26_s16 = sshll.u32 %s5997_s2, 4  ;;  %s44_s13 = int_to_ptr.vmem [resolvable:$true] %s43_s13  ;;  %s27_s16 = int_to_ptr.hbm [resolvable:$true] %s26_s16 }
   0x5   :  { %s3874_s17 = smov 512   ;;  %s3875_s18 = smov 32  }
   0x6   :  { %49 = dma.hbm_to_vmem [thread:$0]  %s42_s11, 8192, %s44_s13, [#allocation8], %s3874_s17, %s3874_s17, %s3875_s18  }
   0x7   :  { %s3876_s19 = smov [#allocation4]   ;;  %s54_s23 = sshll.u32 %s6000_s5, 4  ;;  %s55_s23 = int_to_ptr.hbm [resolvable:$true] %s54_s23 }
   0x8   :  { %s28_s20 = sshll.u32 %s3876_s19, 4  ;;  %s69_s25 = sshll.u32 %s6002_s7, 4  ;;  %s29_s20 = int_to_ptr.vmem [resolvable:$true] %s28_s20  ;;  %s70_s25 = int_to_ptr.hbm [resolvable:$true] %s69_s25 }
   0x9   :  { %34 = dma.hbm_to_vmem [thread:$0]  %s27_s16, 8192, %s29_s20, [#allocation5], %s3874_s17, %s3874_s17, %s3875_s18  }
   0xa   :  { %s3877_s26 = smov [#allocation9]   ;;  %s3878_s2 = smov [#allocation10]  }
   0xb   :  { %s56_s27 = sshll.u32 %s3877_s26, 4  ;;  %s71_s28 = sshll.u32 %s3878_s2, 4  ;;  %s57_s27 = int_to_ptr.vmem [resolvable:$true] %s56_s27  ;;  %s72_s28 = int_to_ptr.vmem [resolvable:$true] %s71_s28 }
   0xc   :  { %62 = dma.hbm_to_vmem [thread:$0]  %s55_s23, 8192, %s57_s27, [#allocation8], %s3874_s17, %s3874_s17, %s3875_s18  }
   0xd   :  { %s3879_s29 = smov 128   ;;  %s3880_s30 = smov 8  }
   0xe   :  { %77 = dma.hbm_to_vmem [thread:$0]  %s70_s25, 2048, %s72_s28, [#allocation11], %s3879_s29, %s3879_s29, %s3880_s30  }
   0xf   :  { %3865 = dma.done.wait [#allocation5], 8192  }
  0x10   :  { %3866 = vsyncadd [#allocation5], 4294959104 }
  0x11   :  { %3867 = dma.done.wait [#allocation8], 16384  }
  0x12   :  { %3868 = vsyncadd [#allocation8], 4294950912 }
  0x13   :  { %3869 = dma.done.wait [#allocation11], 2048  }
  0x14   :  { %3870 = vsyncadd [#allocation11], 4294965248  ;;  %v104_v0 = vld [vmem:[%s5996_s1] sm:$0xff]  ;;  %vm118_vm0 = vcmask 64512   ;;  %v3954_v2 = vld [vmem:[%s5995_s0 + $0x28] sm:$0xff]  ;;  %s3882_s10 = smov [#allocation12]  }
  0x15   :  { %v96_v1 = vld [vmem:[%s5995_s0] sm:$0xff]  ;;  %158 = vmatpush.msra.mxu0 %v104_v0  ;;  %3347 = vmatpush.msra.mxu1 %v104_v0  ;;  %v3959_v3 = vld [vmem:[%s5995_s0 + $0x30] sm:$0xff]  ;;  %v3964_v4 = vld [vmem:[%s5995_s0 + $0x38] sm:$0xff]  ;;  %s3246_s7 = sshll.u32 %s3882_s10, 4  ;;  %s3248_s13 = sshll.u32 %s6004_s9, 4  ;;  %s3247_s7 = int_to_ptr.vmem [resolvable:$true] %s3246_s7  ;;  %s3249_s13 = int_to_ptr.hbm [resolvable:$true] %s3248_s13 }
  0x16   :  { %3348 = vmatpush.msra.mxu2 %v104_v0  ;;  %3349 = vmatpush.msra.mxu3 %v104_v0  ;;  %v105_v5 = vld [vmem:[%s5996_s1 + $0x8] sm:$0xff]  ;;  %v107_v6 = vld [vmem:[%s5996_s1 + $0x18] sm:$0xff]  ;;  %v106_v7 = vld [vmem:[%s5996_s1 + $0x10] sm:$0xff] }
  0x17   :  { %3267 = vmatmul.msk.f32.vlgmr.msra.gmra.mxu0 %vm118_vm0, %v96_v1  ;;  %3272 = vmatmul.msk.f32.vlgmr.msra.gmra.mxu1 %vm118_vm0, %v3954_v2  ;;  %v3978_v8 = vld [vmem:[#allocation4 + $0x1e8] sm:$0xff]  ;;  %v3984_v9 = vld [vmem:[#allocation4 + $0x1e0] sm:$0xff]  ;;  %v3986_v10 = vld [vmem:[#allocation4 + $0x1f8] sm:$0xff] }
  0x18   :  { %3273 = vmatmul.msk.f32.vlgmr.msra.gmra.mxu2 %vm118_vm0, %v3959_v3  ;;  %3274 = vmatmul.msk.f32.vlgmr.msra.gmra.mxu3 %vm118_vm0, %v3964_v4  ;;  %v3988_v11 = vld [vmem:[#allocation4 + $0x1c8] sm:$0xff]  ;;  %v3991_v12 = vld [vmem:[#allocation4 + $0x1c0] sm:$0xff]  ;;  %v3993_v13 = vld [vmem:[#allocation4 + $0x1d8] sm:$0xff] }
  0x19   :  { %199 = vmatpush.msrb.mxu1 %v105_v5  ;;  %281 = vmatpush.msrb.mxu3 %v107_v6  ;;  %v3997_v14 = vld [vmem:[#allocation4 + $0x1a8] sm:$0xff]  ;;  %v4003_v16 = vld [vmem:[#allocation4 + $0x1f0] sm:$0xff]  ;;  %v4007_v17 = vld [vmem:[#allocation4 + $0x1a0] sm:$0xff] }
  0x1a   :  { %240 = vmatpush.msrb.mxu2 %v106_v7  ;;  %410 = vmatpush.msrb.mxu0 %v3984_v9  ;;  %v97_v15 = vld [vmem:[%s5995_s0 + $0x8] sm:$0xff]  ;;  %v4015_v19 = vld [vmem:[#allocation4 + $0x1b8] sm:$0xff]  ;;  %v4017_v20 = vld [vmem:[#allocation4 + $0x1d0] sm:$0xff] }
  0x1b   :  { %430 = vmatpush.msra.mxu1 %v3978_v8  ;;  %470 = vmatpush.msra.mxu3 %v3986_v10  ;;  %v4010_v18 = vld [vmem:[#allocation4 + $0x188] sm:$0xff]  ;;  %v4021_v21 = vld [vmem:[#allocation4 + $0x180] sm:$0xff]  ;;  %v4027_v23 = vld [vmem:[#allocation4 + $0x198] sm:$0xff] }
  0x1c   :  { %411 = vmatpush.msrb.mxu0 %v3991_v12  ;;  %450 = vmatpush.msra.mxu2 %v4003_v16  ;;  %v4023_v22 = vld [vmem:[#allocation4 + $0x168] sm:$0xff]  ;;  %v4029_v24 = vld [vmem:[#allocation4 + $0x1b0] sm:$0xff]  ;;  %v4031_v25 = vld [vmem:[#allocation4 + $0x160] sm:$0xff] }
  0x1d   :  { %431 = vmatpush.msra.mxu1 %v3988_v11  ;;  %471 = vmatpush.msra.mxu3 %v3993_v13  ;;  %v4035_v26 = vld [vmem:[#allocation4 + $0x148] sm:$0xff]  ;;  %v4039_v27 = vld [vmem:[#allocation4 + $0x178] sm:$0xff]  ;;  %v4041_v28 = vld [vmem:[#allocation4 + $0x190] sm:$0xff] }
  0x1e   :  { %412 = vmatpush.msrb.mxu0 %v4007_v17  ;;  %451 = vmatpush.msra.mxu2 %v4017_v20  ;;  %v98_v29 = vld [vmem:[%s5995_s0 + $0x10] sm:$0xff]  ;;  %v4050_v30 = vld [vmem:[#allocation4 + $0x140] sm:$0xff]  ;;  %v4053_v31 = vld [vmem:[#allocation4 + $0x128] sm:$0xff] }
  0x1f   :  { %432 = vmatpush.msra.mxu1 %v3997_v14  ;;  %3268 = vmatmul.msk.f32.gmra.mxu0 %vm118_vm0, %v97_v15  ;;  %v4058_v32 = vld [vmem:[#allocation4 + $0x158] sm:$0xff]  ;;  %v4060_v33 = vld [vmem:[#allocation4 + $0x170] sm:$0xff]  ;;  %v4064_v34 = vld [vmem:[#allocation4 + $0x120] sm:$0xff] }
  0x20   :  { %3275 = vmatmul.msk.f32.vlgmr.msrb.gmra.mxu1 %vm118_vm0, %v96_v1  ;;  %3283 = vmatmul.msk.f32.vlgmr.msrb.gmra.mxu2 %vm118_vm0, %v96_v1  ;;  %v4066_v35 = vld [vmem:[#allocation4 + $0x108] sm:$0xff]  ;;  %v4070_v36 = vld [vmem:[#allocation4 + $0x138] sm:$0xff]  ;;  %v4072_v37 = vld [vmem:[#allocation4 + $0x150] sm:$0xff] }
  0x21   :  { %3291 = vmatmul.msk.f32.vlgmr.msrb.gmra.mxu3 %vm118_vm0, %v96_v1  ;;  %433 = vmatpush.msra.mxu1 %v4010_v18  ;;  %v4074_v38 = vld [vmem:[#allocation4 + $0x100] sm:$0xff]  ;;  %v4078_v39 = vld [vmem:[#allocation4 + $0xe8] sm:$0xff]  ;;  %v4082_v40 = vld [vmem:[#allocation4 + $0x118] sm:$0xff] }
  0x22   :  { %472 = vmatpush.msra.mxu3 %v4015_v19  ;;  %413 = vmatpush.msrb.mxu0 %v4021_v21  ;;  %v4084_v41 = vld [vmem:[#allocation4 + $0x130] sm:$0xff]  ;;  %v99_v42 = vld [vmem:[%s5995_s0 + $0x18] sm:$0xff]  ;;  %v4093_v43 = vld [vmem:[#allocation4 + $0xe0] sm:$0xff] }
  0x23   :  { %434 = vmatpush.msra.mxu1 %v4023_v22  ;;  %452 = vmatpush.msra.mxu2 %v4029_v24  ;;  %v4096_v44 = vld [vmem:[#allocation4 + $0xc8] sm:$0xff]  ;;  %v4101_v45 = vld [vmem:[#allocation4 + $0xf8] sm:$0xff]  ;;  %v4103_v46 = vld [vmem:[#allocation4 + $0x110] sm:$0xff] }
  0x24   :  { %473 = vmatpush.msra.mxu3 %v4027_v23  ;;  %414 = vmatpush.msrb.mxu0 %v4031_v25  ;;  %v4107_v47 = vld [vmem:[#allocation4 + $0xc0] sm:$0xff]  ;;  %v4109_v48 = vld [vmem:[#allocation4 + $0xa8] sm:$0xff]  ;;  %v4113_v49 = vld [vmem:[#allocation4 + $0xd8] sm:$0xff] }
  0x25   :  { %435 = vmatpush.msra.mxu1 %v4035_v26  ;;  %453 = vmatpush.msra.mxu2 %v4041_v28  ;;  %6272 = vst [vmem:[#allocation17_spill] sm:$0xff] %v4109_v48  ;;  %v4115_v50 = vld [vmem:[#allocation4 + $0xf0] sm:$0xff]  ;;  %v4117_v51 = vld [vmem:[#allocation4 + $0xa0] sm:$0xff]  ;;  %v4121_v52 = vld [vmem:[#allocation4 + $0x88] sm:$0xff] }
  0x26   :  { %474 = vmatpush.msra.mxu3 %v4039_v27  ;;  %415 = vmatpush.msrb.mxu0 %v4050_v30  ;;  %6273 = vst [vmem:[#allocation18_spill] sm:$0xff] %v4113_v49  ;;  %v4125_v53 = vld [vmem:[#allocation4 + $0xb8] sm:$0xff]  ;;  %v4127_v54 = vld [vmem:[#allocation4 + $0xd0] sm:$0xff]  ;;  %v4129_v55 = vld [vmem:[#allocation4 + $0x80] sm:$0xff] }
  0x27   :  { %3269 = vmatmul.msk.f32.gmra.mxu0 %vm118_vm0, %v98_v29  ;;  %436 = vmatpush.msra.mxu1 %v4053_v31  ;;  %6274 = vst [vmem:[#allocation19_spill] sm:$0xff] %v4117_v51  ;;  %v100_v56 = vld [vmem:[%s5995_s0 + $0x20] sm:$0xff]  ;;  %v4144_v58 = vld [vmem:[#allocation4 + $0x68] sm:$0xff]  ;;  %v4146_v59 = vld [vmem:[#allocation4 + $0x98] sm:$0xff] }
  0x28   :  { %3276 = vmatmul.msk.f32.gmra.mxu1 %vm118_vm0, %v97_v15  ;;  %3284 = vmatmul.msk.f32.gmra.mxu2 %vm118_vm0, %v97_v15  ;;  %6275 = vst [vmem:[#allocation20_spill] sm:$0xff] %v4121_v52  ;;  %v4138_v57 = vld [vmem:[#allocation4 + $0x60] sm:$0xff]  ;;  %v4152_v61 = vld [vmem:[#allocation4 + $0xb0] sm:$0xff]  ;;  %v4156_v62 = vld [vmem:[#allocation4 + $0x48] sm:$0xff] }
  0x29   :  { %3292 = vmatmul.msk.f32.gmra.mxu3 %vm118_vm0, %v97_v15  ;;  %454 = vmatpush.msra.mxu2 %v4060_v33  ;;  %6276 = vst [vmem:[#allocation21_spill] sm:$0xff] %v4125_v53  ;;  %v4150_v60 = vld [vmem:[#allocation4 + $0x40] sm:$0xff]  ;;  %v4158_v63 = vld [vmem:[#allocation4 + $0x78] sm:$0xff]  ;;  %v4164_v1 = vld [vmem:[#allocation4 + $0x90] sm:$0xff] }
  0x2a   :  { %475 = vmatpush.msra.mxu3 %v4058_v32  ;;  %416 = vmatpush.msrb.mxu0 %v4064_v34  ;;  %6277 = vst [vmem:[#allocation22_spill] sm:$0xff] %v4129_v55  ;;  %v4160_v0 = vld [vmem:[#allocation4 + $0x20] sm:$0xff]  ;;  %v4168_v5 = vld [vmem:[#allocation4 + $0x28] sm:$0xff]  ;;  %v4170_v6 = vld [vmem:[#allocation4 + $0x58] sm:$0xff] }
  0x2b   :  { %437 = vmatpush.msra.mxu1 %v4066_v35  ;;  %455 = vmatpush.msra.mxu2 %v4072_v37  ;;  %6278 = vst [vmem:[#allocation23_spill] sm:$0xff] %v4138_v57  ;;  %v4172_v7 = vld [vmem:[#allocation4] sm:$0xff]  ;;  %v4179_v15 = vld [vmem:[#allocation4 + $0x70] sm:$0xff] }
  0x2c   :  { %476 = vmatpush.msra.mxu3 %v4070_v36  ;;  %417 = vmatpush.msrb.mxu0 %v4074_v38  ;;  %6279 = vst [vmem:[#allocation24_spill] sm:$0xff] %v4144_v58 }
  0x2d   :  { %438 = vmatpush.msra.mxu1 %v4078_v39  ;;  %456 = vmatpush.msra.mxu2 %v4084_v41  ;;  %6280 = vst [vmem:[#allocation25_spill] sm:$0xff] %v4146_v59 }
  0x2e   :  { %477 = vmatpush.msra.mxu3 %v4082_v40  ;;  %418 = vmatpush.msrb.mxu0 %v4093_v43  ;;  %6281 = vst [vmem:[#allocation26_spill] sm:$0xff] %v4150_v60 }
  0x2f   :  { %3270 = vmatmul.msk.f32.gmra.mxu0 %vm118_vm0, %v99_v42  ;;  %439 = vmatpush.msra.mxu1 %v4096_v44  ;;  %6282 = vst [vmem:[#allocation27_spill] sm:$0xff] %v4152_v61 }
  0x30   :  { %3277 = vmatmul.msk.f32.gmra.mxu1 %vm118_vm0, %v98_v29  ;;  %3285 = vmatmul.msk.f32.gmra.mxu2 %vm118_vm0, %v98_v29  ;;  %6283 = vst [vmem:[#allocation28_spill] sm:$0xff] %v4156_v62 }
  0x31   :  { %3293 = vmatmul.msk.f32.gmra.mxu3 %vm118_vm0, %v98_v29  ;;  %457 = vmatpush.msra.mxu2 %v4103_v46  ;;  %6284 = vst [vmem:[#allocation29_spill] sm:$0xff] %v4158_v63  ;;  %v4184_v29 = vld [vmem:[#allocation4 + $0x8] sm:$0xff] }
  0x32   :  { %478 = vmatpush.msra.mxu3 %v4101_v45  ;;  %419 = vmatpush.msrb.mxu0 %v4107_v47  ;;  %6285 = vst [vmem:[#allocation30_spill] sm:$0xff] %v4160_v0 }
  0x33   :  { %440 = vmatpush.msra.mxu1 %v4109_v48  ;;  %458 = vmatpush.msra.mxu2 %v4115_v50  ;;  %6286 = vst [vmem:[#allocation31_spill] sm:$0xff] %v4164_v1 }
  0x34   :  { %479 = vmatpush.msra.mxu3 %v4113_v49  ;;  %420 = vmatpush.msrb.mxu0 %v4117_v51  ;;  %6287 = vst [vmem:[#allocation32_spill] sm:$0xff] %v4168_v5 }
  0x35   :  { %441 = vmatpush.msra.mxu1 %v4121_v52  ;;  %459 = vmatpush.msra.mxu2 %v4127_v54  ;;  %6288 = vst [vmem:[#allocation33_spill] sm:$0xff] %v4170_v6 }
  0x36   :  { %480 = vmatpush.msra.mxu3 %v4125_v53  ;;  %421 = vmatpush.msrb.mxu0 %v4129_v55  ;;  %6289 = vst [vmem:[#allocation34_spill] sm:$0xff] %v4172_v7 }
  0x37   :  { %3271 = vmatmul.msk.f32.gmra.mxu0 %vm118_vm0, %v100_v56  ;;  %442 = vmatpush.msra.mxu1 %v4144_v58  ;;  %6290 = vst [vmem:[#allocation35_spill] sm:$0xff] %v4179_v15 }
  0x38   :  { %3278 = vmatmul.msk.f32.gmra.mxu1 %vm118_vm0, %v99_v42  ;;  %3286 = vmatmul.msk.f32.gmra.mxu2 %vm118_vm0, %v99_v42  ;;  %6291 = vst [vmem:[#allocation36_spill] sm:$0xff] %v4184_v29 }
  0x39   :  { %3294 = vmatmul.msk.f32.gmra.mxu3 %vm118_vm0, %v99_v42  ;;  %422 = vmatpush.msrb.mxu0 %v4138_v57  ;;  %v4186_v42 = vld [vmem:[#allocation4 + $0x38] sm:$0xff] }
  0x3a   :  { %481 = vmatpush.msra.mxu3 %v4146_v59  ;;  %460 = vmatpush.msra.mxu2 %v4152_v61  ;;  %6292 = vst [vmem:[#allocation37_spill] sm:$0xff] %v4186_v42 }
  0x3b   :  { %423 = vmatpush.msrb.mxu0 %v4150_v60  ;;  %443 = vmatpush.msra.mxu1 %v4156_v62  ;;  %v6015_v62 = vmov 0.0  }
  0x3c   :  { %482 = vmatpush.msra.mxu3 %v4158_v63  ;;  %461 = vmatpush.msra.mxu2 %v4164_v1 }
  0x3d   :  { %424 = vmatpush.msrb.mxu0 %v4160_v0  ;;  %444 = vmatpush.msra.mxu1 %v4168_v5  ;;  %v4190_v0 = vld [vmem:[#allocation4 + $0x50] sm:$0xff]  ;;  %v4194_v5 = vld [vmem:[#allocation4 + $0x18] sm:$0xff] }
  0x3e   :  { %483 = vmatpush.msra.mxu3 %v4170_v6  ;;  %6293 = vst [vmem:[#allocation38_spill] sm:$0xff] %v4190_v0  ;;  %462 = vmatpush.msra.mxu2 %v4179_v15  ;;  %v4202_v6 = vld [vmem:[#allocation4 + $0x10] sm:$0xff] }
  0x3f   :  { %425 = vmatpush.msrb.mxu0 %v4172_v7  ;;  %6294 = vst [vmem:[#allocation39_spill] sm:$0xff] %v4194_v5  ;;  %445 = vmatpush.msra.mxu1 %v4184_v29  ;;  %v4197_v7 = vld [vmem:[#allocation4 + $0x30] sm:$0xff] }
  0x40   :  { %3279 = vmatmul.msk.f32.gmra.mxu1 %vm118_vm0, %v100_v56  ;;  %3287 = vmatmul.msk.f32.gmra.mxu2 %vm118_vm0, %v100_v56  ;;  %6295 = vst [vmem:[#allocation40_spill] sm:$0xff] %v4197_v7 }
  0x41   :  { %426 = vmatmul.f32.vlgmr.msrb.gmra.mxu0 %v6015_v62  ;;  %3295 = vmatmul.msk.f32.gmra.mxu3 %vm118_vm0, %v100_v56  ;;  %6296 = vst [vmem:[#allocation41_spill] sm:$0xff] %v4202_v6  ;;  %v6300_v56 = vld [vmem:[#allocation32_spill] sm:$0xff] }
  0x42   :  { %484 = vmatpush.msra.mxu3 %v4186_v42  ;;  %463 = vmatpush.msra.mxu2 %v4190_v0 }
  0x43   :  { %565 = vmatpush.msra.mxu0 %v3984_v9  ;;  %585 = vmatpush.msrb.mxu1 %v3978_v8 }
  0x44   :  { %485 = vmatpush.msra.mxu3 %v4194_v5  ;;  %464 = vmatpush.msra.mxu2 %v4197_v7 }
  0x45   :  { %566 = vmatpush.msra.mxu0 %v3991_v12  ;;  %586 = vmatpush.msrb.mxu1 %v3988_v11 }
  0x46   :  { %625 = vmatpush.msrb.mxu3 %v3986_v10  ;;  %465 = vmatpush.msra.mxu2 %v4202_v6 }
  0x47   :  { %567 = vmatpush.msra.mxu0 %v4007_v17  ;;  %587 = vmatpush.msrb.mxu1 %v3997_v14 }
  0x48   :  { %3280 = vmatmul.msk.f32.gmra.mxu1 %vm118_vm0, %v3954_v2  ;;  %3288 = vmatmul.msk.f32.gmra.mxu2 %vm118_vm0, %v3954_v2 }
  0x49   :  { %626 = vmatpush.msrb.mxu3 %v3993_v13  ;;  %605 = vmatpush.msrb.mxu2 %v4003_v16 }
  0x4a   :  { %3296 = vmatmul.msk.f32.gmra.mxu3 %vm118_vm0, %v3954_v2  ;;  %568 = vmatpush.msra.mxu0 %v4021_v21  ;;  %v6297_v2 = vld [vmem:[#allocation28_spill] sm:$0xff] }
  0x4b   :  { %606 = vmatpush.msrb.mxu2 %v4017_v20  ;;  %627 = vmatpush.msrb.mxu3 %v4015_v19 }
  0x4c   :  { %588 = vmatpush.msrb.mxu1 %v4010_v18  ;;  %569 = vmatpush.msra.mxu0 %v4031_v25 }
  0x4d   :  { %607 = vmatpush.msrb.mxu2 %v4029_v24  ;;  %628 = vmatpush.msrb.mxu3 %v4027_v23 }
  0x4e   :  { %589 = vmatpush.msrb.mxu1 %v4023_v22  ;;  %570 = vmatpush.msra.mxu0 %v4050_v30 }
  0x4f   :  { %608 = vmatpush.msrb.mxu2 %v4041_v28  ;;  %629 = vmatpush.msrb.mxu3 %v4039_v27 }
  0x50   :  { %3281 = vmatmul.msk.f32.gmra.mxu1 %vm118_vm0, %v3959_v3  ;;  %3289 = vmatmul.msk.f32.gmra.mxu2 %vm118_vm0, %v3959_v3 }
  0x51   :  { %609 = vmatpush.msrb.mxu2 %v4060_v33  ;;  %590 = vmatpush.msrb.mxu1 %v4035_v26 }
  0x52   :  { %3297 = vmatmul.msk.f32.gmra.mxu3 %vm118_vm0, %v3959_v3  ;;  %571 = vmatpush.msra.mxu0 %v4064_v34  ;;  %v6298_v3 = vld [vmem:[#allocation33_spill] sm:$0xff] }
  0x53   :  { %610 = vmatpush.msrb.mxu2 %v4072_v37  ;;  %630 = vmatpush.msrb.mxu3 %v4058_v32 }
  0x54   :  { %591 = vmatpush.msrb.mxu1 %v4053_v31  ;;  %572 = vmatpush.msra.mxu0 %v4074_v38 }
  0x55   :  { %611 = vmatpush.msrb.mxu2 %v4084_v41  ;;  %631 = vmatpush.msrb.mxu3 %v4070_v36 }
  0x56   :  { %592 = vmatpush.msrb.mxu1 %v4066_v35  ;;  %573 = vmatpush.msra.mxu0 %v4093_v43 }
  0x57   :  { %612 = vmatpush.msrb.mxu2 %v4103_v46  ;;  %632 = vmatpush.msrb.mxu3 %v4082_v40 }
  0x58   :  { %3282 = vmatmul.msk.f32.gmra.mxu1 %vm118_vm0, %v3964_v4  ;;  %3290 = vmatmul.msk.f32.gmra.mxu2 %vm118_vm0, %v3964_v4 }
  0x59   :  { %593 = vmatpush.msrb.mxu1 %v4078_v39  ;;  %613 = vmatpush.msrb.mxu2 %v4115_v50 }
  0x5a   :  { %3298 = vmatmul.msk.f32.gmra.mxu3 %vm118_vm0, %v3964_v4  ;;  %574 = vmatpush.msra.mxu0 %v4107_v47  ;;  %v6299_v4 = vld [vmem:[#allocation30_spill] sm:$0xff] }
  0x5b   :  { %633 = vmatpush.msrb.mxu3 %v4101_v45  ;;  %594 = vmatpush.msrb.mxu1 %v4096_v44 }
  0x5c   :  { %614 = vmatpush.msrb.mxu2 %v4127_v54  ;;  %575 = vmatpush.msra.mxu0 %v4117_v51 }
  0x5d   :  { %634 = vmatpush.msrb.mxu3 %v4113_v49  ;;  %595 = vmatpush.msrb.mxu1 %v4109_v48 }
  0x5e   :  { %615 = vmatpush.msrb.mxu2 %v4152_v61  ;;  %576 = vmatpush.msra.mxu0 %v4129_v55 }
  0x5f   :  { %635 = vmatpush.msrb.mxu3 %v4125_v53  ;;  %596 = vmatpush.msrb.mxu1 %v4121_v52 }
  0x60   :  { %446 = vmatmul.f32.vlgmr.msra.gmra.mxu1 %v6015_v62  ;;  %466 = vmatmul.f32.vlgmr.msra.gmra.mxu2 %v6015_v62 }
  0x61   :  { %616 = vmatpush.msrb.mxu2 %v4164_v1  ;;  %636 = vmatpush.msrb.mxu3 %v4146_v59 }
  0x62   :  { %486 = vmatmul.f32.vlgmr.msra.gmra.mxu3 %v6015_v62  ;;  %577 = vmatpush.msra.mxu0 %v4138_v57  ;;  %v6301_v62 = vld [vmem:[#allocation34_spill] sm:$0xff] }
  0x63   :  { %597 = vmatpush.msrb.mxu1 %v4144_v58  ;;  %617 = vmatpush.msrb.mxu2 %v4179_v15 }
  0x64   :  { %637 = vmatpush.msrb.mxu3 %v4158_v63  ;;  %578 = vmatpush.msra.mxu0 %v4150_v60 }
  0x65   :  { %598 = vmatpush.msrb.mxu1 %v6297_v2  ;;  %618 = vmatpush.msrb.mxu2 %v4190_v0 }
  0x66   :  { %638 = vmatpush.msrb.mxu3 %v6298_v3  ;;  %579 = vmatpush.msra.mxu0 %v6299_v4 }
  0x67   :  { %599 = vmatpush.msrb.mxu1 %v6300_v56  ;;  %619 = vmatpush.msrb.mxu2 %v4197_v7 }
  0x68   :  { %639 = vmatpush.msrb.mxu3 %v4186_v42  ;;  %580 = vmatpush.msra.mxu0 %v6301_v62 }
  0x69   :  { %600 = vmatpush.msrb.mxu1 %v4184_v29  ;;  %620 = vmatpush.msrb.mxu2 %v4202_v6 }
  0x6a   :  { %640 = vmatpush.msrb.mxu3 %v4194_v5  ;;  %721 = vmatpush.msrb.mxu0 %v3984_v9 }
  0x6b   :  { %741 = vmatpush.msra.mxu1 %v3978_v8  ;;  %761 = vmatpush.msra.mxu2 %v4003_v16 }
  0x6c   :  { %781 = vmatpush.msra.mxu3 %v3986_v10  ;;  %722 = vmatpush.msrb.mxu0 %v3991_v12 }
  0x6d   :  { %742 = vmatpush.msra.mxu1 %v3988_v11  ;;  %762 = vmatpush.msra.mxu2 %v4017_v20 }
  0x6e   :  { %782 = vmatpush.msra.mxu3 %v3993_v13  ;;  %723 = vmatpush.msrb.mxu0 %v4007_v17 }
  0x6f   :  { %743 = vmatpush.msra.mxu1 %v3997_v14  ;;  %763 = vmatpush.msra.mxu2 %v4029_v24 }
  0x70   :  { %783 = vmatpush.msra.mxu3 %v4015_v19  ;;  %724 = vmatpush.msrb.mxu0 %v4021_v21 }
  0x71   :  { %744 = vmatpush.msra.mxu1 %v4010_v18  ;;  %764 = vmatpush.msra.mxu2 %v4041_v28 }
  0x72   :  { %784 = vmatpush.msra.mxu3 %v4027_v23  ;;  %725 = vmatpush.msrb.mxu0 %v4031_v25 }
  0x73   :  { %745 = vmatpush.msra.mxu1 %v4023_v22  ;;  %765 = vmatpush.msra.mxu2 %v4060_v33 }
  0x74   :  { %785 = vmatpush.msra.mxu3 %v4039_v27  ;;  %726 = vmatpush.msrb.mxu0 %v4050_v30 }
  0x75   :  { %746 = vmatpush.msra.mxu1 %v4035_v26  ;;  %766 = vmatpush.msra.mxu2 %v4072_v37 }
  0x76   :  { %786 = vmatpush.msra.mxu3 %v4058_v32  ;;  %727 = vmatpush.msrb.mxu0 %v4064_v34 }
  0x77   :  { %747 = vmatpush.msra.mxu1 %v4053_v31  ;;  %767 = vmatpush.msra.mxu2 %v4084_v41 }
  0x78   :  { %787 = vmatpush.msra.mxu3 %v4070_v36  ;;  %728 = vmatpush.msrb.mxu0 %v4074_v38 }
  0x79   :  { %748 = vmatpush.msra.mxu1 %v4066_v35  ;;  %768 = vmatpush.msra.mxu2 %v4103_v46 }
  0x7a   :  { %788 = vmatpush.msra.mxu3 %v4082_v40  ;;  %729 = vmatpush.msrb.mxu0 %v4093_v43 }
  0x7b   :  { %749 = vmatpush.msra.mxu1 %v4078_v39  ;;  %769 = vmatpush.msra.mxu2 %v4115_v50 }
  0x7c   :  { %789 = vmatpush.msra.mxu3 %v4101_v45  ;;  %730 = vmatpush.msrb.mxu0 %v4107_v47 }
  0x7d   :  { %750 = vmatpush.msra.mxu1 %v4096_v44  ;;  %770 = vmatpush.msra.mxu2 %v4127_v54 }
  0x7e   :  { %790 = vmatpush.msra.mxu3 %v4113_v49  ;;  %731 = vmatpush.msrb.mxu0 %v4117_v51 }
  0x7f   :  { %751 = vmatpush.msra.mxu1 %v4109_v48  ;;  %771 = vmatpush.msra.mxu2 %v4152_v61 }
  0x80   :  { %791 = vmatpush.msra.mxu3 %v4125_v53  ;;  %732 = vmatpush.msrb.mxu0 %v4129_v55 }
  0x81   :  { %752 = vmatpush.msra.mxu1 %v4121_v52  ;;  %772 = vmatpush.msra.mxu2 %v4164_v1 }
  0x82   :  { %792 = vmatpush.msra.mxu3 %v4146_v59  ;;  %733 = vmatpush.msrb.mxu0 %v4138_v57 }
  0x83   :  { %753 = vmatpush.msra.mxu1 %v4144_v58  ;;  %773 = vmatpush.msra.mxu2 %v4179_v15 }
  0x84   :  { %793 = vmatpush.msra.mxu3 %v4158_v63  ;;  %734 = vmatpush.msrb.mxu0 %v4150_v60 }
  0x85   :  { %754 = vmatpush.msra.mxu1 %v6297_v2  ;;  %774 = vmatpush.msra.mxu2 %v4190_v0 }
  0x86   :  { %794 = vmatpush.msra.mxu3 %v6298_v3  ;;  %735 = vmatpush.msrb.mxu0 %v6299_v4 }
  0x87   :  { %755 = vmatpush.msra.mxu1 %v6300_v56  ;;  %775 = vmatpush.msra.mxu2 %v4197_v7 }
  0x88   :  { %795 = vmatpush.msra.mxu3 %v4186_v42  ;;  %736 = vmatpush.msrb.mxu0 %v6301_v62 }
  0x89   :  { %756 = vmatpush.msra.mxu1 %v4184_v29  ;;  %776 = vmatpush.msra.mxu2 %v4202_v6 }
  0x8a   :  { %796 = vmatpush.msra.mxu3 %v4194_v5 }
  0x94   :  { %v160_v2 = vpop.f32.mrf.mxu0  ;;  %v4355_v0 = vpop.f32.mrf.mxu1 }
  0x95   :  { %6302 = vst [vmem:[#allocation42_spill] sm:$0xff] %v4355_v0 }
  0x9b   :  { %v4357_v3 = vpop.f32.mrf.mxu2  ;;  %v4359_v4 = vpop.f32.mrf.mxu3 }
  0x9c   :  { %6303 = vst [vmem:[#allocation43_spill] sm:$0xff] %v4357_v3  ;;  %v4361_v60 = vpop.f32.mrf.mxu0 }
  0x9d   :  { %6304 = vst [vmem:[#allocation44_spill] sm:$0xff] %v4359_v4  ;;  %v201_v56 = vpop.f32.mrf.mxu1 }
  0x9e   :  { %6305 = vst [vmem:[#allocation45_spill] sm:$0xff] %v4361_v60 }
  0xa3   :  { %v242_v7 = vpop.f32.mrf.mxu2 }
  0xa4   :  { %v283_v42 = vpop.f32.mrf.mxu3  ;;  %v4365_v62 = vpop.f32.mrf.mxu0 }
  0xa5   :  { %v4363_v63 = vpop.f32.mrf.mxu1  ;;  %6307 = vst [vmem:[#allocation47_spill] sm:$0xff] %v4365_v62 }
  0xa6   :  { %6306 = vst [vmem:[#allocation46_spill] sm:$0xff] %v4363_v63 }
  0xab   :  { %v4367_v29 = vpop.f32.mrf.mxu2 }
  0xac   :  { %6308 = vst [vmem:[#allocation48_spill] sm:$0xff] %v4367_v29  ;;  %v4369_v6 = vpop.f32.mrf.mxu3  ;;  %v4373_v0 = vpop.f32.mrf.mxu0 }
  0xad   :  { %6309 = vst [vmem:[#allocation49_spill] sm:$0xff] %v4369_v6  ;;  %v4371_v5 = vpop.f32.mrf.mxu1 }
  0xae   :  { %6310 = vst [vmem:[#allocation50_spill] sm:$0xff] %v4371_v5  ;;  %v108_v5 = vld [vmem:[%s5998_s3] sm:$0xf] }
  0xaf   :  { %6311 = vst [vmem:[#allocation51_spill] sm:$0xff] %v4373_v0  ;;  %v4413_v1 = vperm.slane %v108_v5, 1 }
  0xb1   :  { %6329 = vst [vmem:[#allocation69_spill] sm:$0xff] %v4413_v1 }
  0xb3   :  { %v4375_v3 = vpop.f32.mrf.mxu2 }
  0xb4   :  { %6312 = vst [vmem:[#allocation52_spill] sm:$0xff] %v4375_v3  ;;  %v4377_v4 = vpop.f32.mrf.mxu3  ;;  %v4381_v60 = vpop.f32.mrf.mxu0 }
  0xb5   :  { %6313 = vst [vmem:[#allocation53_spill] sm:$0xff] %v4377_v4  ;;  %v4379_v15 = vpop.f32.mrf.mxu1  ;;  %v4398_v4 = vperm.slane %v108_v5, 0 }
  0xb6   :  { %6314 = vst [vmem:[#allocation54_spill] sm:$0xff] %v4379_v15 }
  0xb7   :  { %6315 = vst [vmem:[#allocation55_spill] sm:$0xff] %v4381_v60  ;;  %v161_v60 = vadd.f32 %v160_v2, %v4398_v4 }
  0xb8   :  { %6322 = vst [vmem:[#allocation62_spill] sm:$0xff] %v4398_v4 }
  0xbb   :  { %v4383_v58 = vpop.f32.mrf.mxu2 }
  0xbc   :  { %6316 = vst [vmem:[#allocation56_spill] sm:$0xff] %v4383_v58  ;;  %v4385_v63 = vpop.f32.mrf.mxu3 }
  0xbd   :  { %6317 = vst [vmem:[#allocation57_spill] sm:$0xff] %v4385_v63  ;;  %v4387_v62 = vpop.f32.mrf.mxu1 }
  0xbe   :  { %6318 = vst [vmem:[#allocation58_spill] sm:$0xff] %v4387_v62  ;;  %v427_v15 = vpop.f32.mrf.mxu0 }
  0xbf   :  { %v490_v58 = vadd.f32 %v427_v15, %v161_v60  ;;  %v202_v60 = vadd.f32 %v201_v56, %v4413_v1 }
  0xc1   :  { %v3299_v57 = vmul.f32 -1.442695, %v490_v58 }
  0xc3   :  { %v4392_v29 = vpop.f32.mrf.mxu2  ;;  %3361 = vpow2.f32 %v3299_v57 }
  0xc4   :  { %6319 = vst [vmem:[#allocation59_spill] sm:$0xff] %v4392_v29  ;;  %v4394_v0 = vpop.f32.mrf.mxu3 }
  0xc5   :  { %6320 = vst [vmem:[#allocation60_spill] sm:$0xff] %v4394_v0  ;;  %v4396_v3 = vpop.f32.mrf.mxu1 }
  0xc6   :  { %6321 = vst [vmem:[#allocation61_spill] sm:$0xff] %v4396_v3 }
  0xc9   :  { %v3362_v3 = vpop.eup %3361 }
  0xca   :  { %v497_v52 = vadd.f32 1.0, %v3362_v3  ;;  %v4423_v3 = vperm.slane %v108_v5, 2 }
  0xcb   :  { %v4401_v6 = vpop.f32.mrf.mxu2 }
  0xcc   :  { %6323 = vst [vmem:[#allocation63_spill] sm:$0xff] %v4401_v6  ;;  %3363 = vrcp.f32 %v497_v52  ;;  %vm503_vm2 = vweird.f32 %v497_v52 }
  0xcd   :  { %v4403_v63 = vpop.f32.mrf.mxu3  ;;  %v4405_v62 = vpop.f32.mrf.mxu1  ;;  %6333 = vst [vmem:[#allocation73_spill] sm:$0xff] %v4423_v3 }
  0xce   :  { %6324 = vst [vmem:[#allocation64_spill] sm:$0xff] %v4403_v63 }
  0xcf   :  { %6325 = vst [vmem:[#allocation65_spill] sm:$0xff] %v4405_v62  ;;  %v4418_v62 = vperm.slane %v108_v5, 3 }
  0xd1   :  { %6331 = vst [vmem:[#allocation71_spill] sm:$0xff] %v4418_v62 }
  0xd3   :  { %v4411_v0 = vpop.f32.mrf.mxu2 }
  0xd4   :  { %6328 = vst [vmem:[#allocation68_spill] sm:$0xff] %v4411_v0  ;;  %v3364_v0 = vpop.eup %3363 }
  0xd5   :  { %v4407_v59 = vpop.f32.mrf.mxu3  ;;  %v4409_v29 = vpop.f32.mrf.mxu1  ;;  %v499_v56 = vmul.f32 %v3364_v0, %v497_v52  ;;  %vm504_vm1 = vweird.f32 %v3364_v0 }
  0xd6   :  { %6326 = vst [vmem:[#allocation66_spill] sm:$0xff] %v4407_v59  ;;  %vm505_vm4 = vmor %vm503_vm2, %vm504_vm1 }
  0xd7   :  { %6327 = vst [vmem:[#allocation67_spill] sm:$0xff] %v4409_v29  ;;  %v284_v29 = vadd.f32 %v283_v42, %v4418_v62 }
  0xdb   :  { %v4420_v58 = vpop.f32.mrf.mxu2 }
  0xdc   :  { %6332 = vst [vmem:[#allocation72_spill] sm:$0xff] %v4420_v58 }
  0xdd   :  { %v4416_v15 = vpop.f32.mrf.mxu3  ;;  %v447_v2 = vpop.f32.mrf.mxu1 }
  0xde   :  { %6330 = vst [vmem:[#allocation70_spill] sm:$0xff] %v4416_v15  ;;  %v491_v6 = vadd.f32 %v447_v2, %v202_v60  ;;  %v243_v2 = vadd.f32 %v242_v7, %v4423_v3 }
  0xe0   :  { %v3300_v57 = vmul.f32 -1.442695, %v491_v6  ;;  %v500_v6 = vsub.f32 1.0, %v499_v56 }
  0xe2   :  { %3365 = vpow2.f32 %v3300_v57  ;;  %v501_v57 = vmul.f32 %v3364_v0, %v500_v6 }
  0xe3   :  { %v467_v60 = vpop.f32.mrf.mxu2 }
  0xe4   :  { %v492_v55 = vadd.f32 %v467_v60, %v243_v2  ;;  %v502_v5 = vadd.f32 %v3364_v0, %v501_v57 }
  0xe5   :  { %v487_v59 = vpop.f32.mrf.mxu3 }
  0xe6   :  { %v493_v63 = vadd.f32 %v487_v59, %v284_v29  ;;  %v506_v56 = vsel %vm505_vm4, %v3364_v0, %v502_v5 }
  0xe8   :  { %v3366_v4 = vpop.eup %3365  ;;  %v3301_v1 = vmul.f32 -1.442695, %v493_v63  ;;  %v509_v63 = vand.u32 2147483648, %v497_v52 }
  0xe9   :  { %v516_v15 = vadd.f32 1.0, %v3366_v4  ;;  %v507_v4 = vand.u32 2147483647, %v497_v52 }
  0xea   :  { %3367 = vpow2.f32 %v3301_v1  ;;  %v510_v6 = vor.u32 1.1754944e-38, %v509_v63 }
  0xeb   :  { %3369 = vrcp.f32 %v516_v15  ;;  %v528_v29 = vand.u32 2147483648, %v516_v15  ;;  %v526_v61 = vand.u32 2147483647, %v516_v15  ;;  %vm522_vm5 = vweird.f32 %v516_v15 }
  0xec   :  { %3371 = vtanh.f32 %v492_v55  ;;  %vm508_vm7 = vcmp.eq.f32.partialorder %v507_v4, 8.507059e+37 }
  0xed   :  { %vm527_vm8 = vcmp.eq.f32.partialorder %v526_v61, 8.507059e+37  ;;  %v511_v57 = vsel %vm508_vm7, %v510_v6, %v506_v56 }
  0xf0   :  { %v3368_v58 = vpop.eup %3367 }
  0xf1   :  { %v3370_v53 = vpop.eup %3369  ;;  %v536_v42 = vadd.f32 1.0, %v3368_v58  ;;  %v529_v58 = vor.u32 1.1754944e-38, %v528_v29 }
  0xf2   :  { %v518_v62 = vmul.f32 %v3370_v53, %v516_v15  ;;  %vm523_vm3 = vweird.f32 %v3370_v53  ;;  %v3372_v7 = vpop.eup %3371 }
  0xf3   :  { %3373 = vrcp.f32 %v536_v42  ;;  %vm524_vm6 = vmor %vm522_vm5, %vm523_vm3  ;;  %v548_v15 = vand.u32 2147483648, %v536_v42  ;;  %vm542_vm10 = vweird.f32 %v536_v42  ;;  %v546_v5 = vand.u32 2147483647, %v536_v42 }
  0xf4   :  { %v519_v59 = vsub.f32 1.0, %v518_v62 }
  0xf5   :  { %vm547_vm12 = vcmp.eq.f32.partialorder %v546_v5, 8.507059e+37 }
  0xf6   :  { %v520_v1 = vmul.f32 %v3370_v53, %v519_v59  ;;  %v553_v59 = vmul.f32 %v3372_v7, %v511_v57 }
  0xf8   :  { %v521_v60 = vadd.f32 %v3370_v53, %v520_v1 }
  0xf9   :  { %v3374_v2 = vpop.eup %3373 }
  0xfa   :  { %v525_v55 = vsel %vm524_vm6, %v3370_v53, %v521_v60  ;;  %v538_v62 = vmul.f32 %v3374_v2, %v536_v42  ;;  %vm543_vm9 = vweird.f32 %v3374_v2  ;;  %v549_v53 = vor.u32 1.1754944e-38, %v548_v15  ;;  %v6365_v42 = vld [vmem:[#allocation49_spill] sm:$0xff] }
  0xfb   :  { %v530_v3 = vsel %vm527_vm8, %v529_v58, %v525_v55  ;;  %vm544_vm11 = vmor %vm542_vm10, %vm543_vm9 }
  0xfc   :  { %v552_v48 = vmul.f32 0.0, %v530_v3  ;;  %v539_v52 = vsub.f32 1.0, %v538_v62  ;;  %v6364_v3 = vld [vmem:[#allocation71_spill] sm:$0xff] }
  0xfd   :  { %v287_v4 = vadd.f32 %v6365_v42, %v6364_v3 }
  0xfe   :  { %v4426_v51 = vadd.f32 %v553_v59, %v552_v48  ;;  %v540_v49 = vmul.f32 %v3374_v2, %v539_v52  ;;  %v6366_v59 = vld [vmem:[#allocation73_spill] sm:$0xff]  ;;  %v6367_v52 = vld [vmem:[#allocation48_spill] sm:$0xff] }
 0x100   :  { %3375 = vtanh.f32 %v4426_v51  ;;  %v541_v0 = vadd.f32 %v3374_v2, %v540_v49 }
 0x102   :  { %v545_v29 = vsel %vm544_vm11, %v3374_v2, %v541_v0  ;;  %v246_v0 = vadd.f32 %v6367_v52, %v6366_v59 }
 0x103   :  { %v550_v63 = vsel %vm547_vm12, %v549_v53, %v545_v29 }
 0x106   :  { %v3376_v61 = vpop.eup %3375 }
 0x107   :  { %v4429_v1 = vmul.f32 %v3376_v61, %v550_v63 }
 0x109   :  { %6334 = vst [vmem:[#allocation74_spill] sm:$0xff] %v4429_v1  ;;  %581 = vmatmul.f32.vlgmr.msra.gmra.mxu0 %v4429_v1  ;;  %601 = vmatmul.f32.vlgmr.msrb.gmra.mxu1 %v4429_v1 }
 0x10a   :  { %621 = vmatmul.f32.vlgmr.msrb.gmra.mxu2 %v4429_v1  ;;  %641 = vmatmul.f32.vlgmr.msrb.gmra.mxu3 %v4429_v1  ;;  %v4608_v1 = vld [vmem:[#allocation4 + $0x118] sm:$0xff] }
 0x10b   :  { %877 = vmatpush.msra.mxu0 %v3984_v9  ;;  %897 = vmatpush.msrb.mxu1 %v3978_v8  ;;  %v6335_v8 = vld [vmem:[#allocation18_spill] sm:$0xff]  ;;  %v6336_v9 = vld [vmem:[#allocation19_spill] sm:$0xff] }
 0x10c   :  { %917 = vmatpush.msrb.mxu2 %v4003_v16  ;;  %937 = vmatpush.msrb.mxu3 %v3986_v10  ;;  %v6337_v10 = vld [vmem:[#allocation17_spill] sm:$0xff]  ;;  %v6342_v16 = vld [vmem:[#allocation31_spill] sm:$0xff] }
 0x10d   :  { %878 = vmatpush.msra.mxu0 %v3991_v12  ;;  %898 = vmatpush.msrb.mxu1 %v3988_v11  ;;  %v6338_v11 = vld [vmem:[#allocation27_spill] sm:$0xff]  ;;  %v6339_v12 = vld [vmem:[#allocation21_spill] sm:$0xff] }
 0x10e   :  { %918 = vmatpush.msrb.mxu2 %v4017_v20  ;;  %938 = vmatpush.msrb.mxu3 %v3993_v13  ;;  %v6340_v13 = vld [vmem:[#allocation22_spill] sm:$0xff]  ;;  %v6346_v20 = vld [vmem:[#allocation35_spill] sm:$0xff] }
 0x10f   :  { %879 = vmatpush.msra.mxu0 %v4007_v17  ;;  %899 = vmatpush.msrb.mxu1 %v3997_v14  ;;  %v6341_v14 = vld [vmem:[#allocation20_spill] sm:$0xff]  ;;  %v6343_v17 = vld [vmem:[#allocation25_spill] sm:$0xff] }
 0x110   :  { %919 = vmatpush.msrb.mxu2 %v4029_v24  ;;  %939 = vmatpush.msrb.mxu3 %v4015_v19  ;;  %v6345_v19 = vld [vmem:[#allocation24_spill] sm:$0xff]  ;;  %v6350_v24 = vld [vmem:[#allocation38_spill] sm:$0xff] }
 0x111   :  { %880 = vmatpush.msra.mxu0 %v4021_v21  ;;  %900 = vmatpush.msrb.mxu1 %v4010_v18  ;;  %v6344_v18 = vld [vmem:[#allocation23_spill] sm:$0xff]  ;;  %v6347_v21 = vld [vmem:[#allocation29_spill] sm:$0xff] }
 0x112   :  { %920 = vmatpush.msrb.mxu2 %v4041_v28  ;;  %940 = vmatpush.msrb.mxu3 %v4027_v23  ;;  %v6349_v23 = vld [vmem:[#allocation28_spill] sm:$0xff] }
 0x113   :  { %881 = vmatpush.msra.mxu0 %v4031_v25  ;;  %901 = vmatpush.msrb.mxu1 %v4023_v22  ;;  %v6348_v22 = vld [vmem:[#allocation26_spill] sm:$0xff]  ;;  %v6351_v25 = vld [vmem:[#allocation33_spill] sm:$0xff]  ;;  %v6354_v28 = vld [vmem:[#allocation40_spill] sm:$0xff] }
 0x114   :  { %921 = vmatpush.msrb.mxu2 %v4060_v33  ;;  %941 = vmatpush.msrb.mxu3 %v4039_v27  ;;  %v6353_v27 = vld [vmem:[#allocation32_spill] sm:$0xff]  ;;  %v6358_v33 = vld [vmem:[#allocation41_spill] sm:$0xff] }
 0x115   :  { %882 = vmatpush.msra.mxu0 %v4050_v30  ;;  %902 = vmatpush.msrb.mxu1 %v4035_v26  ;;  %v6352_v26 = vld [vmem:[#allocation30_spill] sm:$0xff]  ;;  %v6355_v30 = vld [vmem:[#allocation37_spill] sm:$0xff] }
 0x116   :  { %922 = vmatpush.msrb.mxu2 %v4072_v37  ;;  %942 = vmatpush.msrb.mxu3 %v4058_v32  ;;  %v6357_v32 = vld [vmem:[#allocation36_spill] sm:$0xff] }
 0x117   :  { %883 = vmatpush.msra.mxu0 %v4064_v34  ;;  %903 = vmatpush.msrb.mxu1 %v4053_v31  ;;  %v6356_v31 = vld [vmem:[#allocation34_spill] sm:$0xff]  ;;  %v6359_v34 = vld [vmem:[#allocation39_spill] sm:$0xff] }
 0x118   :  { %923 = vmatpush.msrb.mxu2 %v4084_v41  ;;  %943 = vmatpush.msrb.mxu3 %v4070_v36  ;;  %v6361_v36 = vld [vmem:[#allocation45_spill] sm:$0xff] }
 0x119   :  { %884 = vmatpush.msra.mxu0 %v4074_v38  ;;  %904 = vmatpush.msrb.mxu1 %v4066_v35  ;;  %v6360_v35 = vld [vmem:[#allocation62_spill] sm:$0xff]  ;;  %v6362_v38 = vld [vmem:[#allocation69_spill] sm:$0xff] }
 0x11a   :  { %924 = vmatpush.msrb.mxu2 %v4103_v46  ;;  %944 = vmatpush.msrb.mxu3 %v4082_v40  ;;  %v164_v37 = vadd.f32 %v6361_v36, %v6360_v35 }
 0x11b   :  { %885 = vmatpush.msra.mxu0 %v4093_v43  ;;  %905 = vmatpush.msrb.mxu1 %v4078_v39  ;;  %v6363_v39 = vld [vmem:[#allocation46_spill] sm:$0xff] }
 0x11c   :  { %925 = vmatpush.msrb.mxu2 %v4115_v50  ;;  %945 = vmatpush.msrb.mxu3 %v4101_v45  ;;  %v205_v40 = vadd.f32 %v6363_v39, %v6362_v38 }
 0x11d   :  { %886 = vmatpush.msra.mxu0 %v4107_v47  ;;  %906 = vmatpush.msrb.mxu1 %v4096_v44 }
 0x11e   :  { %926 = vmatpush.msrb.mxu2 %v4127_v54  ;;  %946 = vmatpush.msrb.mxu3 %v6335_v8 }
 0x11f   :  { %887 = vmatpush.msra.mxu0 %v6336_v9  ;;  %907 = vmatpush.msrb.mxu1 %v6337_v10 }
 0x120   :  { %927 = vmatpush.msrb.mxu2 %v6338_v11  ;;  %947 = vmatpush.msrb.mxu3 %v6339_v12 }
 0x121   :  { %888 = vmatpush.msra.mxu0 %v6340_v13  ;;  %908 = vmatpush.msrb.mxu1 %v6341_v14 }
 0x122   :  { %928 = vmatpush.msrb.mxu2 %v6342_v16  ;;  %948 = vmatpush.msrb.mxu3 %v6343_v17 }
 0x123   :  { %889 = vmatpush.msra.mxu0 %v6344_v18  ;;  %909 = vmatpush.msrb.mxu1 %v6345_v19 }
 0x124   :  { %929 = vmatpush.msrb.mxu2 %v6346_v20  ;;  %949 = vmatpush.msrb.mxu3 %v6347_v21 }
 0x125   :  { %890 = vmatpush.msra.mxu0 %v6348_v22  ;;  %910 = vmatpush.msrb.mxu1 %v6349_v23 }
 0x126   :  { %930 = vmatpush.msrb.mxu2 %v6350_v24  ;;  %950 = vmatpush.msrb.mxu3 %v6351_v25 }
 0x127   :  { %891 = vmatpush.msra.mxu0 %v6352_v26  ;;  %911 = vmatpush.msrb.mxu1 %v6353_v27 }
 0x128   :  { %931 = vmatpush.msrb.mxu2 %v6354_v28  ;;  %951 = vmatpush.msrb.mxu3 %v6355_v30 }
 0x129   :  { %892 = vmatpush.msra.mxu0 %v6356_v31  ;;  %912 = vmatpush.msrb.mxu1 %v6357_v32 }
 0x12a   :  { %932 = vmatpush.msrb.mxu2 %v6358_v33  ;;  %952 = vmatpush.msrb.mxu3 %v6359_v34 }
 0x186   :  { %v582_v41 = vpop.f32.mrf.mxu0  ;;  %v602_v43 = vpop.f32.mrf.mxu1 }
 0x187   :  { %v645_v44 = vadd.f32 %v582_v41, %v164_v37  ;;  %v646_v45 = vadd.f32 %v602_v43, %v205_v40 }
 0x189   :  { %v3302_v48 = vmul.f32 -1.442695, %v645_v44  ;;  %v3303_v49 = vmul.f32 -1.442695, %v646_v45 }
 0x18b   :  { %3377 = vpow2.f32 %v3302_v48 }
 0x18c   :  { %3379 = vpow2.f32 %v3303_v49 }
 0x18d   :  { %v642_v7 = vpop.f32.mrf.mxu3  ;;  %v622_v62 = vpop.f32.mrf.mxu2 }
 0x18e   :  { %v648_v56 = vadd.f32 %v642_v7, %v287_v4  ;;  %v647_v29 = vadd.f32 %v622_v62, %v246_v0 }
 0x190   :  { %v3304_v60 = vmul.f32 -1.442695, %v648_v56 }
 0x191   :  { %v3378_v2 = vpop.eup %3377 }
 0x192   :  { %v3380_v58 = vpop.eup %3379  ;;  %v652_v6 = vadd.f32 1.0, %v3378_v2  ;;  %3381 = vpow2.f32 %v3304_v60 }
 0x193   :  { %v671_v55 = vadd.f32 1.0, %v3380_v58 }
 0x194   :  { %3383 = vrcp.f32 %v652_v6  ;;  %v664_v37 = vand.u32 2147483648, %v652_v6  ;;  %v662_v41 = vand.u32 2147483647, %v652_v6  ;;  %vm658_vm15 = vweird.f32 %v652_v6 }
 0x195   :  { %3385 = vrcp.f32 %v671_v55  ;;  %v683_v39 = vand.u32 2147483648, %v671_v55  ;;  %v681_v44 = vand.u32 2147483647, %v671_v55  ;;  %vm677_vm0 = vweird.f32 %v671_v55 }
 0x196   :  { %v665_v49 = vor.u32 1.1754944e-38, %v664_v37  ;;  %vm663_vm3 = vcmp.eq.f32.partialorder %v662_v41, 8.507059e+37  ;;  %v4529_v41 = vld [vmem:[#allocation4 + $0x1c0] sm:$0xff] }
 0x197   :  { %v684_v7 = vor.u32 1.1754944e-38, %v683_v39  ;;  %vm682_vm4 = vcmp.eq.f32.partialorder %v681_v44, 8.507059e+37  ;;  %v4523_v39 = vld [vmem:[#allocation4 + $0x1f0] sm:$0xff] }
 0x198   :  { %v3382_v57 = vpop.eup %3381  ;;  %v4535_v44 = vld [vmem:[#allocation4 + $0x1d0] sm:$0xff] }
 0x199   :  { %v691_v15 = vadd.f32 1.0, %v3382_v57 }
 0x19a   :  { %v3384_v5 = vpop.eup %3383 }
 0x19b   :  { %v3386_v53 = vpop.eup %3385  ;;  %v654_v61 = vmul.f32 %v3384_v5, %v652_v6  ;;  %3387 = vrcp.f32 %v691_v15  ;;  %vm659_vm13 = vweird.f32 %v3384_v5  ;;  %vm697_vm6 = vweird.f32 %v691_v15 }
 0x19c   :  { %v673_v63 = vmul.f32 %v3386_v53, %v671_v55  ;;  %3389 = vtanh.f32 %v647_v29  ;;  %vm678_vm14 = vweird.f32 %v3386_v53  ;;  %vm660_vm1 = vmor %vm658_vm15, %vm659_vm13 }
 0x19d   :  { %v655_v10 = vsub.f32 1.0, %v654_v61  ;;  %vm679_vm2 = vmor %vm677_vm0, %vm678_vm14  ;;  %v703_v61 = vand.u32 2147483648, %v691_v15 }
 0x19e   :  { %v674_v36 = vsub.f32 1.0, %v673_v63 }
 0x19f   :  { %v656_v40 = vmul.f32 %v3384_v5, %v655_v10  ;;  %v704_v10 = vor.u32 1.1754944e-38, %v703_v61  ;;  %v4586_v61 = vld [vmem:[#allocation4 + $0x158] sm:$0xff] }
 0x1a0   :  { %v675_v43 = vmul.f32 %v3386_v53, %v674_v36 }
 0x1a1   :  { %v3388_v45 = vpop.eup %3387  ;;  %v657_v48 = vadd.f32 %v3384_v5, %v656_v40  ;;  %v4526_v40 = vld [vmem:[#allocation4 + $0x1f8] sm:$0xff] }
 0x1a2   :  { %v676_v42 = vadd.f32 %v3386_v53, %v675_v43  ;;  %v693_v4 = vmul.f32 %v3388_v45, %v691_v15  ;;  %v3390_v60 = vpop.eup %3389  ;;  %vm698_vm5 = vweird.f32 %v3388_v45  ;;  %v4532_v43 = vld [vmem:[#allocation4 + $0x1c8] sm:$0xff] }
 0x1a3   :  { %v661_v56 = vsel %vm660_vm1, %v3384_v5, %v657_v48  ;;  %v701_v5 = vand.u32 2147483647, %v691_v15  ;;  %vm699_vm7 = vmor %vm697_vm6, %vm698_vm5  ;;  %v4520_v15 = vld [vmem:[#allocation4 + $0x1e8] sm:$0xff]  ;;  %v4541_v48 = vld [vmem:[#allocation4 + $0x1a0] sm:$0xff] }
 0x1a4   :  { %v666_v2 = vsel %vm663_vm3, %v665_v49, %v661_v56  ;;  %v680_v58 = vsel %vm679_vm2, %v3386_v53, %v676_v42  ;;  %v694_v62 = vsub.f32 1.0, %v693_v4  ;;  %v4544_v49 = vld [vmem:[#allocation4 + $0x1a8] sm:$0xff]  ;;  %v4547_v42 = vld [vmem:[#allocation4 + $0x1b0] sm:$0xff]  ;;  %v4550_v4 = vld [vmem:[#allocation4 + $0x1b8] sm:$0xff] }
 0x1a5   :  { %v685_v57 = vsel %vm682_vm4, %v684_v7, %v680_v58  ;;  %v708_v52 = vmul.f32 %v3390_v60, %v666_v2  ;;  %vm702_vm8 = vcmp.eq.f32.partialorder %v701_v5, 8.507059e+37  ;;  %v4553_v7 = vld [vmem:[#allocation4 + $0x180] sm:$0xff]  ;;  %v4556_v56 = vld [vmem:[#allocation4 + $0x188] sm:$0xff]  ;;  %v4559_v60 = vld [vmem:[#allocation4 + $0x190] sm:$0xff] }
 0x1a6   :  { %v707_v0 = vmul.f32 %v685_v57, %v4426_v51  ;;  %v695_v29 = vmul.f32 %v3388_v45, %v694_v62  ;;  %v4517_v51 = vld [vmem:[#allocation4 + $0x1e0] sm:$0xff]  ;;  %v4562_v2 = vld [vmem:[#allocation4 + $0x198] sm:$0xff]  ;;  %v4568_v62 = vld [vmem:[#allocation4 + $0x168] sm:$0xff] }
 0x1a7   :  { %v4565_v58 = vld [vmem:[#allocation4 + $0x160] sm:$0xff]  ;;  %v4571_v57 = vld [vmem:[#allocation4 + $0x170] sm:$0xff] }
 0x1a8   :  { %v4508_v6 = vadd.f32 %v708_v52, %v707_v0  ;;  %v696_v55 = vadd.f32 %v3388_v45, %v695_v29  ;;  %v4574_v52 = vld [vmem:[#allocation4 + $0x178] sm:$0xff]  ;;  %v4577_v0 = vld [vmem:[#allocation4 + $0x140] sm:$0xff]  ;;  %v4580_v29 = vld [vmem:[#allocation4 + $0x148] sm:$0xff] }
 0x1a9   :  { %v4589_v5 = vld [vmem:[#allocation4 + $0x120] sm:$0xff] }
 0x1aa   :  { %3391 = vtanh.f32 %v4508_v6  ;;  %v700_v63 = vsel %vm699_vm7, %v3388_v45, %v696_v55  ;;  %v4538_v45 = vld [vmem:[#allocation4 + $0x1d8] sm:$0xff]  ;;  %v4583_v55 = vld [vmem:[#allocation4 + $0x150] sm:$0xff] }
 0x1ab   :  { %v705_v36 = vsel %vm702_vm8, %v704_v10, %v700_v63  ;;  %v4592_v63 = vld [vmem:[#allocation4 + $0x128] sm:$0xff]  ;;  %v4595_v10 = vld [vmem:[#allocation4 + $0x130] sm:$0xff] }
 0x1ac   :  { %6369 = vst [vmem:[#allocation19_spill] sm:$0xff] %v4592_v63 }
 0x1ad   :  { %6370 = vst [vmem:[#allocation17_spill] sm:$0xff] %v4595_v10 }
 0x1b0   :  { %v3392_v53 = vpop.eup %3391 }
 0x1b1   :  { %v4511_v37 = vmul.f32 %v3392_v53, %v705_v36  ;;  %v4598_v53 = vld [vmem:[#allocation4 + $0x138] sm:$0xff]  ;;  %v4601_v36 = vld [vmem:[#allocation4 + $0x100] sm:$0xff] }
 0x1b2   :  { %6371 = vst [vmem:[#allocation27_spill] sm:$0xff] %v4601_v36 }
 0x1b3   :  { %6368 = vst [vmem:[#allocation18_spill] sm:$0xff] %v4511_v37  ;;  %737 = vmatmul.f32.vlgmr.msrb.gmra.mxu0 %v4511_v37  ;;  %757 = vmatmul.f32.vlgmr.msra.gmra.mxu1 %v4511_v37 }
 0x1b4   :  { %777 = vmatmul.f32.vlgmr.msra.gmra.mxu2 %v4511_v37  ;;  %797 = vmatmul.f32.vlgmr.msra.gmra.mxu3 %v4511_v37  ;;  %v4604_v37 = vld [vmem:[#allocation4 + $0x108] sm:$0xff] }
 0x1b5   :  { %1033 = vmatpush.msrb.mxu0 %v4517_v51  ;;  %1053 = vmatpush.msra.mxu1 %v4520_v15 }
 0x1b6   :  { %1073 = vmatpush.msra.mxu2 %v4523_v39  ;;  %1093 = vmatpush.msra.mxu3 %v4526_v40 }
 0x1b7   :  { %1034 = vmatpush.msrb.mxu0 %v4529_v41  ;;  %1054 = vmatpush.msra.mxu1 %v4532_v43 }
 0x1b8   :  { %1074 = vmatpush.msra.mxu2 %v4535_v44  ;;  %1094 = vmatpush.msra.mxu3 %v4538_v45 }
 0x1b9   :  { %1035 = vmatpush.msrb.mxu0 %v4541_v48  ;;  %1055 = vmatpush.msra.mxu1 %v4544_v49 }
 0x1ba   :  { %1075 = vmatpush.msra.mxu2 %v4547_v42  ;;  %1095 = vmatpush.msra.mxu3 %v4550_v4 }
 0x1bb   :  { %1036 = vmatpush.msrb.mxu0 %v4553_v7  ;;  %1056 = vmatpush.msra.mxu1 %v4556_v56 }
 0x1bc   :  { %1076 = vmatpush.msra.mxu2 %v4559_v60  ;;  %1096 = vmatpush.msra.mxu3 %v4562_v2 }
 0x1bd   :  { %1037 = vmatpush.msrb.mxu0 %v4565_v58  ;;  %1057 = vmatpush.msra.mxu1 %v4568_v62 }
 0x1be   :  { %1077 = vmatpush.msra.mxu2 %v4571_v57  ;;  %1097 = vmatpush.msra.mxu3 %v4574_v52 }
 0x1bf   :  { %1038 = vmatpush.msrb.mxu0 %v4577_v0  ;;  %1058 = vmatpush.msra.mxu1 %v4580_v29 }
 0x1c0   :  { %1078 = vmatpush.msra.mxu2 %v4583_v55  ;;  %1098 = vmatpush.msra.mxu3 %v4586_v61 }
 0x1c1   :  { %1039 = vmatpush.msrb.mxu0 %v4589_v5  ;;  %1059 = vmatpush.msra.mxu1 %v4592_v63  ;;  %v4611_v63 = vld [vmem:[#allocation4 + $0xe0] sm:$0xff] }
 0x1c2   :  { %1079 = vmatpush.msra.mxu2 %v4595_v10  ;;  %1099 = vmatpush.msra.mxu3 %v4598_v53  ;;  %6372 = vst [vmem:[#allocation21_spill] sm:$0xff] %v4611_v63  ;;  %v4614_v10 = vld [vmem:[#allocation4 + $0xe8] sm:$0xff] }
 0x1c3   :  { %1040 = vmatpush.msrb.mxu0 %v4601_v36  ;;  %1060 = vmatpush.msra.mxu1 %v4604_v37  ;;  %v4618_v36 = vld [vmem:[#allocation4 + $0xf8] sm:$0xff] }
 0x1c4   :  { %1080 = vmatpush.msra.mxu2 %v4103_v46  ;;  %1100 = vmatpush.msra.mxu3 %v4608_v1  ;;  %v4622_v46 = vld [vmem:[#allocation4 + $0xc8] sm:$0xff] }
 0x1c5   :  { %1041 = vmatpush.msrb.mxu0 %v4611_v63  ;;  %1061 = vmatpush.msra.mxu1 %v4614_v10  ;;  %v4628_v63 = vld [vmem:[#allocation4 + $0xa8] sm:$0xff] }
 0x1c6   :  { %1081 = vmatpush.msra.mxu2 %v4115_v50  ;;  %1101 = vmatpush.msra.mxu3 %v4618_v36  ;;  %6373 = vst [vmem:[#allocation22_spill] sm:$0xff] %v4628_v63 }
 0x1c7   :  { %1042 = vmatpush.msrb.mxu0 %v4107_v47  ;;  %1062 = vmatpush.msra.mxu1 %v4622_v46  ;;  %v6374_v47 = vld [vmem:[#allocation47_spill] sm:$0xff] }
 0x1c8   :  { %1082 = vmatpush.msra.mxu2 %v4127_v54  ;;  %1102 = vmatpush.msra.mxu3 %v6335_v8  ;;  %v167_v50 = vadd.f32 %v6374_v47, %v6360_v35  ;;  %v6375_v54 = vld [vmem:[#allocation50_spill] sm:$0xff] }
 0x1c9   :  { %1043 = vmatpush.msrb.mxu0 %v6336_v9  ;;  %1063 = vmatpush.msra.mxu1 %v4628_v63  ;;  %v208_v8 = vadd.f32 %v6375_v54, %v6362_v38 }
 0x1ca   :  { %1083 = vmatpush.msra.mxu2 %v6338_v11  ;;  %1103 = vmatpush.msra.mxu3 %v6339_v12 }
 0x1cb   :  { %1044 = vmatpush.msrb.mxu0 %v6340_v13  ;;  %1064 = vmatpush.msra.mxu1 %v6341_v14 }
 0x1cc   :  { %1084 = vmatpush.msra.mxu2 %v6342_v16  ;;  %1104 = vmatpush.msra.mxu3 %v6343_v17  ;;  %v6376_v17 = vld [vmem:[#allocation53_spill] sm:$0xff] }
 0x1cd   :  { %1045 = vmatpush.msrb.mxu0 %v6344_v18  ;;  %1065 = vmatpush.msra.mxu1 %v6345_v19  ;;  %v290_v18 = vadd.f32 %v6376_v17, %v6364_v3 }
 0x1ce   :  { %1085 = vmatpush.msra.mxu2 %v6346_v20  ;;  %1105 = vmatpush.msra.mxu3 %v6347_v21 }
 0x1cf   :  { %1046 = vmatpush.msrb.mxu0 %v6348_v22  ;;  %1066 = vmatpush.msra.mxu1 %v6349_v23 }
 0x1d0   :  { %1086 = vmatpush.msra.mxu2 %v6350_v24  ;;  %1106 = vmatpush.msra.mxu3 %v6351_v25 }
 0x1d1   :  { %1047 = vmatpush.msrb.mxu0 %v6352_v26  ;;  %1067 = vmatpush.msra.mxu1 %v6353_v27 }
 0x1d2   :  { %1087 = vmatpush.msra.mxu2 %v6354_v28  ;;  %1107 = vmatpush.msra.mxu3 %v6355_v30  ;;  %v6377_v28 = vld [vmem:[#allocation52_spill] sm:$0xff] }
 0x1d3   :  { %1048 = vmatpush.msrb.mxu0 %v6356_v31  ;;  %1068 = vmatpush.msra.mxu1 %v6357_v32  ;;  %v249_v30 = vadd.f32 %v6377_v28, %v6366_v59 }
 0x1d4   :  { %1088 = vmatpush.msra.mxu2 %v6358_v33  ;;  %1108 = vmatpush.msra.mxu3 %v6359_v34 }
 0x230   :  { %v738_v9 = vpop.f32.mrf.mxu0  ;;  %v758_v11 = vpop.f32.mrf.mxu1 }
 0x231   :  { %v801_v12 = vadd.f32 %v738_v9, %v167_v50  ;;  %v802_v13 = vadd.f32 %v758_v11, %v208_v8 }
 0x233   :  { %v3305_v14 = vmul.f32 -1.442695, %v801_v12  ;;  %v3306_v16 = vmul.f32 -1.442695, %v802_v13 }
 0x235   :  { %3393 = vpow2.f32 %v3305_v14 }
 0x236   :  { %3395 = vpow2.f32 %v3306_v16 }
 0x237   :  { %v798_v19 = vpop.f32.mrf.mxu3  ;;  %v778_v26 = vpop.f32.mrf.mxu2 }
 0x238   :  { %v804_v20 = vadd.f32 %v798_v19, %v290_v18  ;;  %v803_v33 = vadd.f32 %v778_v26, %v249_v30 }
 0x23a   :  { %v3307_v21 = vmul.f32 -1.442695, %v804_v20 }
 0x23b   :  { %v3394_v22 = vpop.eup %3393 }
 0x23c   :  { %v3396_v23 = vpop.eup %3395  ;;  %v808_v24 = vadd.f32 1.0, %v3394_v22  ;;  %3397 = vpow2.f32 %v3307_v21 }
 0x23d   :  { %v827_v25 = vadd.f32 1.0, %v3396_v23 }
 0x23e   :  { %3399 = vrcp.f32 %v808_v24  ;;  %v820_v9 = vand.u32 2147483648, %v808_v24  ;;  %v818_v13 = vand.u32 2147483647, %v808_v24  ;;  %vm814_vm11 = vweird.f32 %v808_v24 }
 0x23f   :  { %3401 = vrcp.f32 %v827_v25  ;;  %v839_v11 = vand.u32 2147483648, %v827_v25  ;;  %v837_v16 = vand.u32 2147483647, %v827_v25  ;;  %vm833_vm12 = vweird.f32 %v827_v25 }
 0x240   :  { %v821_v19 = vor.u32 1.1754944e-38, %v820_v9  ;;  %vm819_vm15 = vcmp.eq.f32.partialorder %v818_v13, 8.507059e+37 }
 0x241   :  { %v840_v22 = vor.u32 1.1754944e-38, %v839_v11  ;;  %vm838_vm0 = vcmp.eq.f32.partialorder %v837_v16, 8.507059e+37  ;;  %v4701_v16 = vld [vmem:[#allocation4 + $0x110] sm:$0xff] }
 0x242   :  { %v3398_v27 = vpop.eup %3397 }
 0x243   :  { %v847_v31 = vadd.f32 1.0, %v3398_v27 }
 0x244   :  { %v3400_v32 = vpop.eup %3399 }
 0x245   :  { %v3402_v34 = vpop.eup %3401  ;;  %v810_v47 = vmul.f32 %v3400_v32, %v808_v24  ;;  %3403 = vrcp.f32 %v847_v31  ;;  %vm815_vm9 = vweird.f32 %v3400_v32  ;;  %vm853_vm2 = vweird.f32 %v847_v31 }
 0x246   :  { %v829_v50 = vmul.f32 %v3402_v34, %v827_v25  ;;  %3405 = vtanh.f32 %v803_v33  ;;  %vm834_vm10 = vweird.f32 %v3402_v34  ;;  %vm816_vm13 = vmor %vm814_vm11, %vm815_vm9 }
 0x247   :  { %v811_v54 = vsub.f32 1.0, %v810_v47  ;;  %vm835_vm14 = vmor %vm833_vm12, %vm834_vm10 }
 0x248   :  { %v830_v8 = vsub.f32 1.0, %v829_v50 }
 0x249   :  { %v812_v12 = vmul.f32 %v3400_v32, %v811_v54 }
 0x24a   :  { %v831_v14 = vmul.f32 %v3402_v34, %v830_v8  ;;  %v859_v8 = vand.u32 2147483648, %v847_v31 }
 0x24b   :  { %v3404_v17 = vpop.eup %3403  ;;  %v813_v18 = vadd.f32 %v3400_v32, %v812_v12 }
 0x24c   :  { %v832_v20 = vadd.f32 %v3402_v34, %v831_v14  ;;  %v849_v21 = vmul.f32 %v3404_v17, %v847_v31  ;;  %v3406_v26 = vpop.eup %3405  ;;  %vm854_vm1 = vweird.f32 %v3404_v17  ;;  %v860_v11 = vor.u32 1.1754944e-38, %v859_v8  ;;  %v6381_v14 = vld [vmem:[#allocation27_spill] sm:$0xff]  ;;  %v4755_v8 = vld [vmem:[#allocation4 + $0x40] sm:$0xff] }
 0x24d   :  { %v817_v23 = vsel %vm816_vm13, %v3400_v32, %v813_v18  ;;  %v857_v32 = vand.u32 2147483647, %v847_v31  ;;  %vm855_vm3 = vmor %vm853_vm2, %vm854_vm1  ;;  %v6380_v31 = vld [vmem:[#allocation17_spill] sm:$0xff]  ;;  %v4707_v18 = vld [vmem:[#allocation4 + $0xf0] sm:$0xff]  ;;  %6396 = vst [vmem:[#allocation37_spill] sm:$0xff] %v4755_v8 }
 0x24e   :  { %v822_v27 = vsel %vm819_vm15, %v821_v19, %v817_v23  ;;  %v836_v28 = vsel %vm835_vm14, %v3402_v34, %v832_v20  ;;  %v850_v30 = vsub.f32 1.0, %v849_v21  ;;  %v4711_v19 = vld [vmem:[#allocation4 + $0xc0] sm:$0xff]  ;;  %v4715_v20 = vld [vmem:[#allocation4 + $0xd0] sm:$0xff]  ;;  %v4718_v21 = vld [vmem:[#allocation4 + $0xd8] sm:$0xff] }
 0x24f   :  { %v841_v33 = vsel %vm838_vm0, %v840_v22, %v836_v28  ;;  %v864_v47 = vmul.f32 %v3406_v26, %v822_v27  ;;  %vm858_vm4 = vcmp.eq.f32.partialorder %v857_v32, 8.507059e+37  ;;  %6383 = vst [vmem:[#allocation31_spill] sm:$0xff] %v4715_v20  ;;  %v4721_v22 = vld [vmem:[#allocation4 + $0xa0] sm:$0xff]  ;;  %v4725_v23 = vld [vmem:[#allocation4 + $0xb0] sm:$0xff]  ;;  %v4728_v26 = vld [vmem:[#allocation4 + $0xb8] sm:$0xff] }
 0x250   :  { %v863_v50 = vmul.f32 %v841_v33, %v4508_v6  ;;  %v851_v54 = vmul.f32 %v3404_v17, %v850_v30  ;;  %v6379_v6 = vld [vmem:[#allocation19_spill] sm:$0xff]  ;;  %6384 = vst [vmem:[#allocation25_spill] sm:$0xff] %v4718_v21  ;;  %v4731_v27 = vld [vmem:[#allocation4 + $0x80] sm:$0xff]  ;;  %v4734_v28 = vld [vmem:[#allocation4 + $0x88] sm:$0xff] }
 0x251   :  { %6385 = vst [vmem:[#allocation23_spill] sm:$0xff] %v4721_v22  ;;  %v4737_v30 = vld [vmem:[#allocation4 + $0x90] sm:$0xff]  ;;  %v4740_v33 = vld [vmem:[#allocation4 + $0x98] sm:$0xff]  ;;  %v4758_v32 = vld [vmem:[#allocation4 + $0x48] sm:$0xff] }
 0x252   :  { %v4662_v24 = vadd.f32 %v864_v47, %v863_v50  ;;  %v852_v25 = vadd.f32 %v3404_v17, %v851_v54  ;;  %6386 = vst [vmem:[#allocation24_spill] sm:$0xff] %v4725_v23  ;;  %v4743_v47 = vld [vmem:[#allocation4 + $0x60] sm:$0xff]  ;;  %v4746_v50 = vld [vmem:[#allocation4 + $0x68] sm:$0xff]  ;;  %v4749_v54 = vld [vmem:[#allocation4 + $0x70] sm:$0xff] }
 0x253   :  { %6387 = vst [vmem:[#allocation35_spill] sm:$0xff] %v4728_v26 }
 0x254   :  { %3407 = vtanh.f32 %v4662_v24  ;;  %v856_v9 = vsel %vm855_vm3, %v3404_v17, %v852_v25  ;;  %v6382_v17 = vld [vmem:[#allocation21_spill] sm:$0xff]  ;;  %6388 = vst [vmem:[#allocation29_spill] sm:$0xff] %v4731_v27  ;;  %v4752_v25 = vld [vmem:[#allocation4 + $0x78] sm:$0xff] }
 0x255   :  { %v861_v12 = vsel %vm858_vm4, %v860_v11, %v856_v9  ;;  %6389 = vst [vmem:[#allocation26_spill] sm:$0xff] %v4734_v28  ;;  %v4761_v9 = vld [vmem:[#allocation4 + $0x50] sm:$0xff]  ;;  %v4764_v11 = vld [vmem:[#allocation4 + $0x58] sm:$0xff] }
 0x256   :  { %6390 = vst [vmem:[#allocation28_spill] sm:$0xff] %v4737_v30 }
 0x257   :  { %6391 = vst [vmem:[#allocation38_spill] sm:$0xff] %v4740_v33 }
 0x258   :  { %6392 = vst [vmem:[#allocation33_spill] sm:$0xff] %v4743_v47 }
 0x259   :  { %6393 = vst [vmem:[#allocation30_spill] sm:$0xff] %v4746_v50 }
 0x25a   :  { %v3408_v34 = vpop.eup %3407  ;;  %6394 = vst [vmem:[#allocation32_spill] sm:$0xff] %v4749_v54 }
 0x25b   :  { %v4665_v13 = vmul.f32 %v3408_v34, %v861_v12  ;;  %6395 = vst [vmem:[#allocation40_spill] sm:$0xff] %v4752_v25  ;;  %v4767_v34 = vld [vmem:[#allocation4 + $0x20] sm:$0xff]  ;;  %v4770_v12 = vld [vmem:[#allocation4 + $0x28] sm:$0xff] }
 0x25c   :  { %6397 = vst [vmem:[#allocation34_spill] sm:$0xff] %v4758_v32 }
 0x25d   :  { %6378 = vst [vmem:[#allocation20_spill] sm:$0xff] %v4665_v13  ;;  %893 = vmatmul.f32.vlgmr.msra.gmra.mxu0 %v4665_v13  ;;  %913 = vmatmul.f32.vlgmr.msrb.gmra.mxu1 %v4665_v13 }
 0x25e   :  { %933 = vmatmul.f32.vlgmr.msrb.gmra.mxu2 %v4665_v13  ;;  %953 = vmatmul.f32.vlgmr.msrb.gmra.mxu3 %v4665_v13  ;;  %6398 = vst [vmem:[#allocation36_spill] sm:$0xff] %v4761_v9  ;;  %v4773_v13 = vld [vmem:[#allocation4 + $0x30] sm:$0xff] }
 0x25f   :  { %1189 = vmatpush.msra.mxu0 %v4517_v51  ;;  %1209 = vmatpush.msrb.mxu1 %v4520_v15  ;;  %6399 = vst [vmem:[#allocation41_spill] sm:$0xff] %v4764_v11 }
 0x260   :  { %1229 = vmatpush.msrb.mxu2 %v4523_v39  ;;  %1249 = vmatpush.msrb.mxu3 %v4526_v40  ;;  %6400 = vst [vmem:[#allocation39_spill] sm:$0xff] %v4767_v34 }
 0x261   :  { %1190 = vmatpush.msra.mxu0 %v4529_v41  ;;  %1210 = vmatpush.msrb.mxu1 %v4532_v43  ;;  %6401 = vst [vmem:[#allocation45_spill] sm:$0xff] %v4770_v12 }
 0x262   :  { %1230 = vmatpush.msrb.mxu2 %v4535_v44  ;;  %1250 = vmatpush.msrb.mxu3 %v4538_v45  ;;  %6402 = vst [vmem:[#allocation46_spill] sm:$0xff] %v4773_v13 }
 0x263   :  { %1191 = vmatpush.msra.mxu0 %v4541_v48  ;;  %1211 = vmatpush.msrb.mxu1 %v4544_v49 }
 0x264   :  { %1231 = vmatpush.msrb.mxu2 %v4547_v42  ;;  %1251 = vmatpush.msrb.mxu3 %v4550_v4 }
 0x265   :  { %1192 = vmatpush.msra.mxu0 %v4553_v7  ;;  %1212 = vmatpush.msrb.mxu1 %v4556_v56 }
 0x266   :  { %1232 = vmatpush.msrb.mxu2 %v4559_v60  ;;  %1252 = vmatpush.msrb.mxu3 %v4562_v2 }
 0x267   :  { %1193 = vmatpush.msra.mxu0 %v4565_v58  ;;  %1213 = vmatpush.msrb.mxu1 %v4568_v62 }
 0x268   :  { %1233 = vmatpush.msrb.mxu2 %v4571_v57  ;;  %1253 = vmatpush.msrb.mxu3 %v4574_v52 }
 0x269   :  { %1194 = vmatpush.msra.mxu0 %v4577_v0  ;;  %1214 = vmatpush.msrb.mxu1 %v4580_v29 }
 0x26a   :  { %1234 = vmatpush.msrb.mxu2 %v4583_v55  ;;  %1254 = vmatpush.msrb.mxu3 %v4586_v61 }
 0x26b   :  { %1195 = vmatpush.msra.mxu0 %v4589_v5  ;;  %1215 = vmatpush.msrb.mxu1 %v6379_v6 }
 0x26c   :  { %1235 = vmatpush.msrb.mxu2 %v6380_v31  ;;  %1255 = vmatpush.msrb.mxu3 %v4598_v53 }
 0x26d   :  { %1196 = vmatpush.msra.mxu0 %v6381_v14  ;;  %1216 = vmatpush.msrb.mxu1 %v4604_v37 }
 0x26e   :  { %1236 = vmatpush.msrb.mxu2 %v4701_v16  ;;  %1256 = vmatpush.msrb.mxu3 %v4608_v1 }
 0x26f   :  { %1197 = vmatpush.msra.mxu0 %v6382_v17  ;;  %1217 = vmatpush.msrb.mxu1 %v4614_v10 }
 0x270   :  { %1237 = vmatpush.msrb.mxu2 %v4707_v18  ;;  %1257 = vmatpush.msrb.mxu3 %v4618_v36 }
 0x271   :  { %1198 = vmatpush.msra.mxu0 %v4711_v19  ;;  %1218 = vmatpush.msrb.mxu1 %v4622_v46 }
 0x272   :  { %1238 = vmatpush.msrb.mxu2 %v4715_v20  ;;  %1258 = vmatpush.msrb.mxu3 %v4718_v21 }
 0x273   :  { %1199 = vmatpush.msra.mxu0 %v4721_v22  ;;  %1219 = vmatpush.msrb.mxu1 %v4628_v63 }
 0x274   :  { %1239 = vmatpush.msrb.mxu2 %v4725_v23  ;;  %1259 = vmatpush.msrb.mxu3 %v4728_v26 }
 0x275   :  { %1200 = vmatpush.msra.mxu0 %v4731_v27  ;;  %1220 = vmatpush.msrb.mxu1 %v4734_v28 }
 0x276   :  { %1240 = vmatpush.msrb.mxu2 %v4737_v30  ;;  %1260 = vmatpush.msrb.mxu3 %v4740_v33  ;;  %v6410_v30 = vld [vmem:[#allocation57_spill] sm:$0xff] }
 0x277   :  { %1201 = vmatpush.msra.mxu0 %v4743_v47  ;;  %1221 = vmatpush.msrb.mxu1 %v4746_v50 }
 0x278   :  { %1241 = vmatpush.msrb.mxu2 %v4749_v54  ;;  %1261 = vmatpush.msrb.mxu3 %v4752_v25 }
 0x279   :  { %1202 = vmatpush.msra.mxu0 %v4755_v8  ;;  %1222 = vmatpush.msrb.mxu1 %v4758_v32  ;;  %v4776_v32 = vld [vmem:[#allocation4 + $0x38] sm:$0xff] }
 0x27a   :  { %1242 = vmatpush.msrb.mxu2 %v4761_v9  ;;  %1262 = vmatpush.msrb.mxu3 %v4764_v11  ;;  %6403 = vst [vmem:[#allocation49_spill] sm:$0xff] %v4776_v32  ;;  %v4779_v9 = vld [vmem:[#allocation4] sm:$0xff]  ;;  %v4782_v11 = vld [vmem:[#allocation4 + $0x8] sm:$0xff] }
 0x27b   :  { %1203 = vmatpush.msra.mxu0 %v4767_v34  ;;  %1223 = vmatpush.msrb.mxu1 %v4770_v12  ;;  %6404 = vst [vmem:[#allocation48_spill] sm:$0xff] %v4779_v9  ;;  %v4785_v34 = vld [vmem:[#allocation4 + $0x10] sm:$0xff]  ;;  %v4788_v12 = vld [vmem:[#allocation4 + $0x18] sm:$0xff] }
 0x27c   :  { %1243 = vmatpush.msrb.mxu2 %v4773_v13  ;;  %1263 = vmatpush.msrb.mxu3 %v4776_v32  ;;  %6405 = vst [vmem:[#allocation47_spill] sm:$0xff] %v4782_v11  ;;  %v6408_v13 = vld [vmem:[#allocation51_spill] sm:$0xff]  ;;  %v6409_v32 = vld [vmem:[#allocation54_spill] sm:$0xff] }
 0x27d   :  { %1204 = vmatpush.msra.mxu0 %v4779_v9  ;;  %1224 = vmatpush.msrb.mxu1 %v4782_v11  ;;  %6406 = vst [vmem:[#allocation50_spill] sm:$0xff] %v4785_v34  ;;  %v170_v8 = vadd.f32 %v6408_v13, %v6360_v35  ;;  %v211_v25 = vadd.f32 %v6409_v32, %v6362_v38 }
 0x27e   :  { %1244 = vmatpush.msrb.mxu2 %v4785_v34  ;;  %6407 = vst [vmem:[#allocation53_spill] sm:$0xff] %v4788_v12  ;;  %1264 = vmatpush.msrb.mxu3 %v4788_v12  ;;  %v293_v34 = vadd.f32 %v6410_v30, %v6364_v3 }
 0x2da   :  { %v894_v54 = vpop.f32.mrf.mxu0  ;;  %v914_v9 = vpop.f32.mrf.mxu1 }
 0x2db   :  { %v957_v50 = vadd.f32 %v894_v54, %v170_v8  ;;  %v958_v47 = vadd.f32 %v914_v9, %v211_v25 }
 0x2dd   :  { %v3308_v33 = vmul.f32 -1.442695, %v957_v50  ;;  %v3309_v11 = vmul.f32 -1.442695, %v958_v47  ;;  %v6411_v50 = vld [vmem:[#allocation56_spill] sm:$0xff] }
 0x2de   :  { %v252_v47 = vadd.f32 %v6411_v50, %v6366_v59 }
 0x2df   :  { %3409 = vpow2.f32 %v3308_v33 }
 0x2e0   :  { %3411 = vpow2.f32 %v3309_v11 }
 0x2e1   :  { %v954_v28 = vpop.f32.mrf.mxu3  ;;  %v934_v32 = vpop.f32.mrf.mxu2 }
 0x2e2   :  { %v960_v27 = vadd.f32 %v954_v28, %v293_v34  ;;  %v959_v8 = vadd.f32 %v934_v32, %v252_v47 }
 0x2e4   :  { %v3310_v12 = vmul.f32 -1.442695, %v960_v27 }
 0x2e5   :  { %v3410_v26 = vpop.eup %3409 }
 0x2e6   :  { %v3412_v23 = vpop.eup %3411  ;;  %v964_v13 = vadd.f32 1.0, %v3410_v26  ;;  %3413 = vpow2.f32 %v3310_v12 }
 0x2e7   :  { %v983_v35 = vadd.f32 1.0, %v3412_v23 }
 0x2e8   :  { %3415 = vrcp.f32 %v964_v13  ;;  %v976_v34 = vand.u32 2147483648, %v964_v13  ;;  %v974_v12 = vand.u32 2147483647, %v964_v13  ;;  %vm970_vm7 = vweird.f32 %v964_v13 }
 0x2e9   :  { %3417 = vrcp.f32 %v983_v35  ;;  %v995_v26 = vand.u32 2147483648, %v983_v35  ;;  %v993_v38 = vand.u32 2147483647, %v983_v35  ;;  %vm989_vm8 = vweird.f32 %v983_v35 }
 0x2ea   :  { %v977_v32 = vor.u32 1.1754944e-38, %v976_v34  ;;  %vm975_vm11 = vcmp.eq.f32.partialorder %v974_v12, 8.507059e+37 }
 0x2eb   :  { %vm994_vm12 = vcmp.eq.f32.partialorder %v993_v38, 8.507059e+37 }
 0x2ec   :  { %v3414_v54 = vpop.eup %3413 }
 0x2ed   :  { %v1003_v33 = vadd.f32 1.0, %v3414_v54 }
 0x2ee   :  { %v3416_v25 = vpop.eup %3415 }
 0x2ef   :  { %v3418_v30 = vpop.eup %3417  ;;  %v966_v9 = vmul.f32 %v3416_v25, %v964_v13  ;;  %3419 = vrcp.f32 %v1003_v33  ;;  %vm971_vm5 = vweird.f32 %v3416_v25  ;;  %vm1009_vm14 = vweird.f32 %v1003_v33 }
 0x2f0   :  { %v985_v28 = vmul.f32 %v3418_v30, %v983_v35  ;;  %3421 = vtanh.f32 %v959_v8  ;;  %vm990_vm6 = vweird.f32 %v3418_v30  ;;  %vm972_vm9 = vmor %vm970_vm7, %vm971_vm5 }
 0x2f1   :  { %v967_v27 = vsub.f32 1.0, %v966_v9  ;;  %vm991_vm10 = vmor %vm989_vm8, %vm990_vm6  ;;  %v996_v9 = vor.u32 1.1754944e-38, %v995_v26 }
 0x2f2   :  { %v986_v11 = vsub.f32 1.0, %v985_v28 }
 0x2f3   :  { %v968_v23 = vmul.f32 %v3416_v25, %v967_v27 }
 0x2f4   :  { %v987_v3 = vmul.f32 %v3418_v30, %v986_v11 }
 0x2f5   :  { %v3420_v63 = vpop.eup %3419  ;;  %v969_v50 = vadd.f32 %v3416_v25, %v968_v23 }
 0x2f6   :  { %v988_v54 = vadd.f32 %v3418_v30, %v987_v3  ;;  %v1005_v47 = vmul.f32 %v3420_v63, %v1003_v33  ;;  %v3422_v8 = vpop.eup %3421  ;;  %vm1010_vm13 = vweird.f32 %v3420_v63  ;;  %v1015_v3 = vand.u32 2147483648, %v1003_v33 }
 0x2f7   :  { %v973_v28 = vsel %vm972_vm9, %v3416_v25, %v969_v50  ;;  %v1013_v25 = vand.u32 2147483647, %v1003_v33  ;;  %vm1011_vm15 = vmor %vm1009_vm14, %vm1010_vm13  ;;  %v6419_v33 = vld [vmem:[#allocation29_spill] sm:$0xff]  ;;  %v6420_v50 = vld [vmem:[#allocation26_spill] sm:$0xff] }
 0x2f8   :  { %v978_v59 = vsel %vm975_vm11, %v977_v32, %v973_v28  ;;  %v992_v27 = vsel %vm991_vm10, %v3418_v30, %v988_v54  ;;  %v1006_v22 = vsub.f32 1.0, %v1005_v47  ;;  %v1016_v26 = vor.u32 1.1754944e-38, %v1015_v3  ;;  %v6421_v32 = vld [vmem:[#allocation28_spill] sm:$0xff]  ;;  %v6422_v54 = vld [vmem:[#allocation38_spill] sm:$0xff]  ;;  %v6423_v47 = vld [vmem:[#allocation33_spill] sm:$0xff] }
 0x2f9   :  { %v997_v11 = vsel %vm994_vm12, %v996_v9, %v992_v27  ;;  %v1020_v21 = vmul.f32 %v3422_v8, %v978_v59  ;;  %vm1014_vm0 = vcmp.eq.f32.partialorder %v1013_v25, 8.507059e+37  ;;  %v6413_v59 = vld [vmem:[#allocation31_spill] sm:$0xff]  ;;  %v6424_v9 = vld [vmem:[#allocation30_spill] sm:$0xff]  ;;  %v6425_v28 = vld [vmem:[#allocation32_spill] sm:$0xff] }
 0x2fa   :  { %v1019_v20 = vmul.f32 %v997_v11, %v4662_v24  ;;  %v1007_v23 = vmul.f32 %v3420_v63, %v1006_v22  ;;  %v6415_v24 = vld [vmem:[#allocation23_spill] sm:$0xff]  ;;  %v6426_v8 = vld [vmem:[#allocation40_spill] sm:$0xff]  ;;  %v6427_v27 = vld [vmem:[#allocation37_spill] sm:$0xff] }
 0x2fb   :  { %v6418_v22 = vld [vmem:[#allocation35_spill] sm:$0xff]  ;;  %v6428_v11 = vld [vmem:[#allocation34_spill] sm:$0xff]  ;;  %v6432_v25 = vld [vmem:[#allocation45_spill] sm:$0xff] }
 0x2fc   :  { %v4800_v13 = vadd.f32 %v1020_v21, %v1019_v20  ;;  %v1008_v35 = vadd.f32 %v3420_v63, %v1007_v23  ;;  %v6416_v20 = vld [vmem:[#allocation22_spill] sm:$0xff]  ;;  %v6417_v21 = vld [vmem:[#allocation24_spill] sm:$0xff]  ;;  %v6431_v3 = vld [vmem:[#allocation39_spill] sm:$0xff] }
 0x2fd   :  { %v6429_v23 = vld [vmem:[#allocation36_spill] sm:$0xff] }
 0x2fe   :  { %3423 = vtanh.f32 %v4800_v13  ;;  %v1012_v34 = vsel %vm1011_vm15, %v3420_v63, %v1008_v35  ;;  %v6414_v63 = vld [vmem:[#allocation25_spill] sm:$0xff] }
 0x2ff   :  { %v1017_v30 = vsel %vm1014_vm0, %v1016_v26, %v1012_v34  ;;  %v6430_v35 = vld [vmem:[#allocation41_spill] sm:$0xff]  ;;  %v6433_v34 = vld [vmem:[#allocation46_spill] sm:$0xff] }
 0x300   :  { %v6434_v26 = vld [vmem:[#allocation49_spill] sm:$0xff] }
 0x304   :  { %v3424_v38 = vpop.eup %3423 }
 0x305   :  { %v4803_v12 = vmul.f32 %v3424_v38, %v1017_v30  ;;  %v6435_v38 = vld [vmem:[#allocation48_spill] sm:$0xff]  ;;  %v6436_v30 = vld [vmem:[#allocation47_spill] sm:$0xff] }
 0x307   :  { %6412 = vst [vmem:[#allocation52_spill] sm:$0xff] %v4803_v12  ;;  %1049 = vmatmul.f32.vlgmr.msrb.gmra.mxu0 %v4803_v12  ;;  %1069 = vmatmul.f32.vlgmr.msra.gmra.mxu1 %v4803_v12 }
 0x308   :  { %1089 = vmatmul.f32.vlgmr.msra.gmra.mxu2 %v4803_v12  ;;  %1109 = vmatmul.f32.vlgmr.msra.gmra.mxu3 %v4803_v12  ;;  %v6437_v12 = vld [vmem:[#allocation50_spill] sm:$0xff] }
 0x309   :  { %1345 = vmatpush.msrb.mxu0 %v4517_v51  ;;  %1365 = vmatpush.msra.mxu1 %v4520_v15 }
 0x30a   :  { %1385 = vmatpush.msra.mxu2 %v4523_v39  ;;  %1405 = vmatpush.msra.mxu3 %v4526_v40 }
 0x30b   :  { %1346 = vmatpush.msrb.mxu0 %v4529_v41  ;;  %1366 = vmatpush.msra.mxu1 %v4532_v43 }
 0x30c   :  { %1386 = vmatpush.msra.mxu2 %v4535_v44  ;;  %1406 = vmatpush.msra.mxu3 %v4538_v45 }
 0x30d   :  { %1347 = vmatpush.msrb.mxu0 %v4541_v48  ;;  %1367 = vmatpush.msra.mxu1 %v4544_v49 }
 0x30e   :  { %1387 = vmatpush.msra.mxu2 %v4547_v42  ;;  %1407 = vmatpush.msra.mxu3 %v4550_v4 }
 0x30f   :  { %1348 = vmatpush.msrb.mxu0 %v4553_v7  ;;  %1368 = vmatpush.msra.mxu1 %v4556_v56 }
 0x310   :  { %1388 = vmatpush.msra.mxu2 %v4559_v60  ;;  %1408 = vmatpush.msra.mxu3 %v4562_v2 }
 0x311   :  { %1349 = vmatpush.msrb.mxu0 %v4565_v58  ;;  %1369 = vmatpush.msra.mxu1 %v4568_v62 }
 0x312   :  { %1389 = vmatpush.msra.mxu2 %v4571_v57  ;;  %1409 = vmatpush.msra.mxu3 %v4574_v52 }
 0x313   :  { %1350 = vmatpush.msrb.mxu0 %v4577_v0  ;;  %1370 = vmatpush.msra.mxu1 %v4580_v29 }
 0x314   :  { %1390 = vmatpush.msra.mxu2 %v4583_v55  ;;  %1410 = vmatpush.msra.mxu3 %v4586_v61 }
 0x315   :  { %1351 = vmatpush.msrb.mxu0 %v4589_v5  ;;  %1371 = vmatpush.msra.mxu1 %v6379_v6 }
 0x316   :  { %1391 = vmatpush.msra.mxu2 %v6380_v31  ;;  %1411 = vmatpush.msra.mxu3 %v4598_v53 }
 0x317   :  { %1352 = vmatpush.msrb.mxu0 %v6381_v14  ;;  %1372 = vmatpush.msra.mxu1 %v4604_v37 }
 0x318   :  { %1392 = vmatpush.msra.mxu2 %v4701_v16  ;;  %1412 = vmatpush.msra.mxu3 %v4608_v1 }
 0x319   :  { %1353 = vmatpush.msrb.mxu0 %v6382_v17  ;;  %1373 = vmatpush.msra.mxu1 %v4614_v10 }
 0x31a   :  { %1393 = vmatpush.msra.mxu2 %v4707_v18  ;;  %1413 = vmatpush.msra.mxu3 %v4618_v36 }
 0x31b   :  { %1354 = vmatpush.msrb.mxu0 %v4711_v19  ;;  %1374 = vmatpush.msra.mxu1 %v4622_v46 }
 0x31c   :  { %1394 = vmatpush.msra.mxu2 %v6413_v59  ;;  %1414 = vmatpush.msra.mxu3 %v6414_v63 }
 0x31d   :  { %1355 = vmatpush.msrb.mxu0 %v6415_v24  ;;  %1375 = vmatpush.msra.mxu1 %v6416_v20 }
 0x31e   :  { %1395 = vmatpush.msra.mxu2 %v6417_v21  ;;  %1415 = vmatpush.msra.mxu3 %v6418_v22 }
 0x31f   :  { %1356 = vmatpush.msrb.mxu0 %v6419_v33  ;;  %1376 = vmatpush.msra.mxu1 %v6420_v50 }
 0x320   :  { %1396 = vmatpush.msra.mxu2 %v6421_v32  ;;  %1416 = vmatpush.msra.mxu3 %v6422_v54  ;;  %v6444_v32 = vld [vmem:[#allocation60_spill] sm:$0xff] }
 0x321   :  { %1357 = vmatpush.msrb.mxu0 %v6423_v47  ;;  %1377 = vmatpush.msra.mxu1 %v6424_v9 }
 0x322   :  { %1397 = vmatpush.msra.mxu2 %v6425_v28  ;;  %1417 = vmatpush.msra.mxu3 %v6426_v8  ;;  %v6442_v28 = vld [vmem:[#allocation58_spill] sm:$0xff] }
 0x323   :  { %1358 = vmatpush.msrb.mxu0 %v6427_v27  ;;  %1378 = vmatpush.msra.mxu1 %v6428_v11  ;;  %v6438_v27 = vld [vmem:[#allocation53_spill] sm:$0xff]  ;;  %v6439_v11 = vld [vmem:[#allocation62_spill] sm:$0xff] }
 0x324   :  { %1398 = vmatpush.msra.mxu2 %v6429_v23  ;;  %1418 = vmatpush.msra.mxu3 %v6430_v35  ;;  %v6440_v23 = vld [vmem:[#allocation55_spill] sm:$0xff]  ;;  %v6441_v35 = vld [vmem:[#allocation69_spill] sm:$0xff] }
 0x325   :  { %1359 = vmatpush.msrb.mxu0 %v6431_v3  ;;  %1379 = vmatpush.msra.mxu1 %v6432_v25  ;;  %v173_v8 = vadd.f32 %v6440_v23, %v6439_v11  ;;  %v214_v3 = vadd.f32 %v6442_v28, %v6441_v35 }
 0x326   :  { %1399 = vmatpush.msra.mxu2 %v6433_v34  ;;  %1419 = vmatpush.msra.mxu3 %v6434_v26 }
 0x327   :  { %1360 = vmatpush.msrb.mxu0 %v6435_v38  ;;  %1380 = vmatpush.msra.mxu1 %v6436_v30  ;;  %v6443_v38 = vld [vmem:[#allocation71_spill] sm:$0xff] }
 0x328   :  { %1400 = vmatpush.msra.mxu2 %v6437_v12  ;;  %1420 = vmatpush.msra.mxu3 %v6438_v27  ;;  %v296_v30 = vadd.f32 %v6444_v32, %v6443_v38 }
 0x384   :  { %v1050_v9 = vpop.f32.mrf.mxu0  ;;  %v1070_v25 = vpop.f32.mrf.mxu1 }
 0x385   :  { %v1113_v47 = vadd.f32 %v1050_v9, %v173_v8  ;;  %v1114_v34 = vadd.f32 %v1070_v25, %v214_v3  ;;  %v6445_v8 = vld [vmem:[#allocation73_spill] sm:$0xff] }
 0x387   :  { %v3311_v54 = vmul.f32 -1.442695, %v1113_v47  ;;  %v3312_v26 = vmul.f32 -1.442695, %v1114_v34  ;;  %v6446_v47 = vld [vmem:[#allocation59_spill] sm:$0xff] }
 0x388   :  { %v255_v3 = vadd.f32 %v6446_v47, %v6445_v8 }
 0x389   :  { %3425 = vpow2.f32 %v3311_v54 }
 0x38a   :  { %3427 = vpow2.f32 %v3312_v26 }
 0x38b   :  { %v1110_v12 = vpop.f32.mrf.mxu3  ;;  %v1090_v28 = vpop.f32.mrf.mxu2 }
 0x38c   :  { %v1116_v50 = vadd.f32 %v1110_v12, %v296_v30  ;;  %v1115_v34 = vadd.f32 %v1090_v28, %v255_v3 }
 0x38e   :  { %v3313_v27 = vmul.f32 -1.442695, %v1116_v50 }
 0x38f   :  { %v3426_v33 = vpop.eup %3425 }
 0x390   :  { %v3428_v22 = vpop.eup %3427  ;;  %v1120_v23 = vadd.f32 1.0, %v3426_v33  ;;  %3429 = vpow2.f32 %v3313_v27 }
 0x391   :  { %v1139_v11 = vadd.f32 1.0, %v3428_v22 }
 0x392   :  { %3431 = vrcp.f32 %v1120_v23  ;;  %v1132_v38 = vand.u32 2147483648, %v1120_v23  ;;  %v1130_v27 = vand.u32 2147483647, %v1120_v23  ;;  %vm1126_vm3 = vweird.f32 %v1120_v23 }
 0x393   :  { %3433 = vrcp.f32 %v1139_v11  ;;  %v1151_v33 = vand.u32 2147483648, %v1139_v11  ;;  %v1149_v21 = vand.u32 2147483647, %v1139_v11  ;;  %vm1145_vm4 = vweird.f32 %v1139_v11 }
 0x394   :  { %v1133_v28 = vor.u32 1.1754944e-38, %v1132_v38  ;;  %vm1131_vm7 = vcmp.eq.f32.partialorder %v1130_v27, 8.507059e+37 }
 0x395   :  { %vm1150_vm8 = vcmp.eq.f32.partialorder %v1149_v21, 8.507059e+37 }
 0x396   :  { %v3430_v9 = vpop.eup %3429 }
 0x397   :  { %v1159_v54 = vadd.f32 1.0, %v3430_v9 }
 0x398   :  { %v3432_v25 = vpop.eup %3431 }
 0x399   :  { %v3434_v32 = vpop.eup %3433  ;;  %v1122_v26 = vmul.f32 %v3432_v25, %v1120_v23  ;;  %3435 = vrcp.f32 %v1159_v54  ;;  %vm1127_vm1 = vweird.f32 %v3432_v25  ;;  %vm1165_vm10 = vweird.f32 %v1159_v54 }
 0x39a   :  { %v1141_v12 = vmul.f32 %v3434_v32, %v1139_v11  ;;  %3437 = vtanh.f32 %v1115_v34  ;;  %vm1146_vm2 = vweird.f32 %v3434_v32  ;;  %vm1128_vm5 = vmor %vm1126_vm3, %vm1127_vm1  ;;  %v1169_v38 = vand.u32 2147483647, %v1159_v54 }
 0x39b   :  { %v1123_v50 = vsub.f32 1.0, %v1122_v26  ;;  %vm1147_vm6 = vmor %vm1145_vm4, %vm1146_vm2  ;;  %v1152_v26 = vor.u32 1.1754944e-38, %v1151_v33 }
 0x39c   :  { %v1142_v30 = vsub.f32 1.0, %v1141_v12  ;;  %vm1170_vm12 = vcmp.eq.f32.partialorder %v1169_v38, 8.507059e+37 }
 0x39d   :  { %v1124_v22 = vmul.f32 %v3432_v25, %v1123_v50 }
 0x39e   :  { %v1143_v35 = vmul.f32 %v3434_v32, %v1142_v30 }
 0x39f   :  { %v3436_v20 = vpop.eup %3435  ;;  %v1125_v47 = vadd.f32 %v3432_v25, %v1124_v22 }
 0x3a0   :  { %v1144_v9 = vadd.f32 %v3434_v32, %v1143_v35  ;;  %v1161_v3 = vmul.f32 %v3436_v20, %v1159_v54  ;;  %v3438_v34 = vpop.eup %3437  ;;  %vm1166_vm9 = vweird.f32 %v3436_v20  ;;  %v1171_v35 = vand.u32 2147483648, %v1159_v54 }
 0x3a1   :  { %v1129_v12 = vsel %vm1128_vm5, %v3432_v25, %v1125_v47  ;;  %vm1167_vm11 = vmor %vm1165_vm10, %vm1166_vm9 }
 0x3a2   :  { %v1134_v8 = vsel %vm1131_vm7, %v1133_v28, %v1129_v12  ;;  %v1148_v50 = vsel %vm1147_vm6, %v3434_v32, %v1144_v9  ;;  %v1162_v24 = vsub.f32 1.0, %v1161_v3  ;;  %v1172_v33 = vor.u32 1.1754944e-38, %v1171_v35  ;;  %v6479_v12 = vld [vmem:[#allocation73_spill] sm:$0xff] }
 0x3a3   :  { %v1153_v30 = vsel %vm1150_vm8, %v1152_v26, %v1148_v50  ;;  %v1176_v63 = vmul.f32 %v3438_v34, %v1134_v8  ;;  %v6480_v34 = vld [vmem:[#allocation63_spill] sm:$0xff] }
 0x3a4   :  { %v1175_v59 = vmul.f32 %v1153_v30, %v4800_v13  ;;  %v1163_v22 = vmul.f32 %v3436_v20, %v1162_v24  ;;  %v6477_v13 = vld [vmem:[#allocation71_spill] sm:$0xff]  ;;  %v258_v50 = vadd.f32 %v6480_v34, %v6479_v12 }
 0x3a5   :  { %v6481_v34 = vld [vmem:[#allocation43_spill] sm:$0xff] }
 0x3a6   :  { %v4882_v23 = vadd.f32 %v1176_v63, %v1175_v59  ;;  %v1164_v11 = vadd.f32 %v3436_v20, %v1163_v22  ;;  %v6478_v59 = vld [vmem:[#allocation64_spill] sm:$0xff] }
 0x3a7   :  { %v299_v63 = vadd.f32 %v6478_v59, %v6477_v13  ;;  %v1710_v59 = vld [vmem:[#allocation7 + $0x1a0] sm:$0xff] }
 0x3a8   :  { %3439 = vtanh.f32 %v4882_v23  ;;  %v1168_v25 = vsel %vm1167_vm11, %v3436_v20, %v1164_v11 }
 0x3a9   :  { %v1173_v32 = vsel %vm1170_vm12, %v1172_v33, %v1168_v25 }
 0x3ae   :  { %v3440_v21 = vpop.eup %3439 }
 0x3af   :  { %v4885_v27 = vmul.f32 %v3440_v21, %v1173_v32 }
 0x3b1   :  { %1205 = vmatmul.f32.vlgmr.msra.gmra.mxu0 %v4885_v27  ;;  %1225 = vmatmul.f32.vlgmr.msrb.gmra.mxu1 %v4885_v27 }
 0x3b2   :  { %1245 = vmatmul.f32.vlgmr.msrb.gmra.mxu2 %v4885_v27  ;;  %1265 = vmatmul.f32.vlgmr.msrb.gmra.mxu3 %v4885_v27 }
 0x3b3   :  { %1501 = vmatpush.msra.mxu0 %v4517_v51  ;;  %1521 = vmatpush.msrb.mxu1 %v4520_v15  ;;  %v6447_v51 = vld [vmem:[#allocation31_spill] sm:$0xff]  ;;  %v6448_v15 = vld [vmem:[#allocation25_spill] sm:$0xff] }
 0x3b4   :  { %1541 = vmatpush.msrb.mxu2 %v4523_v39  ;;  %1561 = vmatpush.msrb.mxu3 %v4526_v40  ;;  %v6450_v39 = vld [vmem:[#allocation22_spill] sm:$0xff]  ;;  %v6452_v40 = vld [vmem:[#allocation35_spill] sm:$0xff] }
 0x3b5   :  { %1502 = vmatpush.msra.mxu0 %v4529_v41  ;;  %1522 = vmatpush.msrb.mxu1 %v4532_v43  ;;  %v6453_v41 = vld [vmem:[#allocation29_spill] sm:$0xff]  ;;  %v6454_v43 = vld [vmem:[#allocation26_spill] sm:$0xff] }
 0x3b6   :  { %1542 = vmatpush.msrb.mxu2 %v4535_v44  ;;  %1562 = vmatpush.msrb.mxu3 %v4538_v45  ;;  %v6455_v44 = vld [vmem:[#allocation28_spill] sm:$0xff]  ;;  %v6456_v45 = vld [vmem:[#allocation38_spill] sm:$0xff] }
 0x3b7   :  { %1503 = vmatpush.msra.mxu0 %v4541_v48  ;;  %1523 = vmatpush.msrb.mxu1 %v4544_v49  ;;  %v6457_v48 = vld [vmem:[#allocation33_spill] sm:$0xff]  ;;  %v6458_v49 = vld [vmem:[#allocation30_spill] sm:$0xff] }
 0x3b8   :  { %1543 = vmatpush.msrb.mxu2 %v4547_v42  ;;  %1563 = vmatpush.msrb.mxu3 %v4550_v4  ;;  %v6459_v42 = vld [vmem:[#allocation32_spill] sm:$0xff] }
 0x3b9   :  { %1504 = vmatpush.msra.mxu0 %v4553_v7  ;;  %1524 = vmatpush.msrb.mxu1 %v4556_v56  ;;  %v6460_v4 = vld [vmem:[#allocation40_spill] sm:$0xff]  ;;  %v6461_v7 = vld [vmem:[#allocation37_spill] sm:$0xff]  ;;  %v6462_v56 = vld [vmem:[#allocation34_spill] sm:$0xff] }
 0x3ba   :  { %1544 = vmatpush.msrb.mxu2 %v4559_v60  ;;  %1564 = vmatpush.msrb.mxu3 %v4562_v2  ;;  %v6463_v60 = vld [vmem:[#allocation36_spill] sm:$0xff]  ;;  %v6464_v2 = vld [vmem:[#allocation41_spill] sm:$0xff] }
 0x3bb   :  { %1505 = vmatpush.msra.mxu0 %v4565_v58  ;;  %1525 = vmatpush.msrb.mxu1 %v4568_v62  ;;  %v6465_v58 = vld [vmem:[#allocation39_spill] sm:$0xff]  ;;  %v6466_v62 = vld [vmem:[#allocation45_spill] sm:$0xff] }
 0x3bc   :  { %1545 = vmatpush.msrb.mxu2 %v4571_v57  ;;  %1565 = vmatpush.msrb.mxu3 %v4574_v52  ;;  %v6467_v57 = vld [vmem:[#allocation46_spill] sm:$0xff]  ;;  %v6468_v52 = vld [vmem:[#allocation49_spill] sm:$0xff] }
 0x3bd   :  { %1506 = vmatpush.msra.mxu0 %v4577_v0  ;;  %1526 = vmatpush.msrb.mxu1 %v4580_v29  ;;  %v6469_v0 = vld [vmem:[#allocation48_spill] sm:$0xff]  ;;  %v6470_v29 = vld [vmem:[#allocation47_spill] sm:$0xff] }
 0x3be   :  { %1546 = vmatpush.msrb.mxu2 %v4583_v55  ;;  %1566 = vmatpush.msrb.mxu3 %v4586_v61  ;;  %v6471_v55 = vld [vmem:[#allocation50_spill] sm:$0xff]  ;;  %v6472_v61 = vld [vmem:[#allocation53_spill] sm:$0xff] }
 0x3bf   :  { %1507 = vmatpush.msra.mxu0 %v4589_v5  ;;  %1527 = vmatpush.msrb.mxu1 %v6379_v6  ;;  %v6473_v5 = vld [vmem:[#allocation62_spill] sm:$0xff] }
 0x3c0   :  { %1547 = vmatpush.msrb.mxu2 %v6380_v31  ;;  %1567 = vmatpush.msrb.mxu3 %v4598_v53 }
 0x3c1   :  { %1508 = vmatpush.msra.mxu0 %v6381_v14  ;;  %1528 = vmatpush.msrb.mxu1 %v4604_v37  ;;  %v6449_v37 = vld [vmem:[#allocation23_spill] sm:$0xff] }
 0x3c2   :  { %1548 = vmatpush.msrb.mxu2 %v4701_v16  ;;  %1568 = vmatpush.msrb.mxu3 %v4608_v1  ;;  %v6451_v1 = vld [vmem:[#allocation24_spill] sm:$0xff] }
 0x3c3   :  { %1509 = vmatpush.msra.mxu0 %v6382_v17  ;;  %1529 = vmatpush.msrb.mxu1 %v4614_v10  ;;  %v6474_v10 = vld [vmem:[#allocation42_spill] sm:$0xff] }
 0x3c4   :  { %1549 = vmatpush.msrb.mxu2 %v4707_v18  ;;  %1569 = vmatpush.msrb.mxu3 %v4618_v36  ;;  %v176_v53 = vadd.f32 %v6474_v10, %v6473_v5  ;;  %v6475_v36 = vld [vmem:[#allocation69_spill] sm:$0xff] }
 0x3c5   :  { %1510 = vmatpush.msra.mxu0 %v4711_v19  ;;  %1530 = vmatpush.msrb.mxu1 %v4622_v46  ;;  %v6476_v46 = vld [vmem:[#allocation61_spill] sm:$0xff] }
 0x3c6   :  { %1550 = vmatpush.msrb.mxu2 %v6447_v51  ;;  %1570 = vmatpush.msrb.mxu3 %v6448_v15  ;;  %v217_v6 = vadd.f32 %v6476_v46, %v6475_v36 }
 0x3c7   :  { %1511 = vmatpush.msra.mxu0 %v6449_v37  ;;  %1531 = vmatpush.msrb.mxu1 %v6450_v39 }
 0x3c8   :  { %1551 = vmatpush.msrb.mxu2 %v6451_v1  ;;  %1571 = vmatpush.msrb.mxu3 %v6452_v40 }
 0x3c9   :  { %1512 = vmatpush.msra.mxu0 %v6453_v41  ;;  %1532 = vmatpush.msrb.mxu1 %v6454_v43 }
 0x3ca   :  { %1552 = vmatpush.msrb.mxu2 %v6455_v44  ;;  %1572 = vmatpush.msrb.mxu3 %v6456_v45 }
 0x3cb   :  { %1513 = vmatpush.msra.mxu0 %v6457_v48  ;;  %1533 = vmatpush.msrb.mxu1 %v6458_v49 }
 0x3cc   :  { %1553 = vmatpush.msrb.mxu2 %v6459_v42  ;;  %1573 = vmatpush.msrb.mxu3 %v6460_v4 }
 0x3cd   :  { %1514 = vmatpush.msra.mxu0 %v6461_v7  ;;  %1534 = vmatpush.msrb.mxu1 %v6462_v56 }
 0x3ce   :  { %1554 = vmatpush.msrb.mxu2 %v6463_v60  ;;  %1574 = vmatpush.msrb.mxu3 %v6464_v2 }
 0x3cf   :  { %1515 = vmatpush.msra.mxu0 %v6465_v58  ;;  %1535 = vmatpush.msrb.mxu1 %v6466_v62 }
 0x3d0   :  { %1555 = vmatpush.msrb.mxu2 %v6467_v57  ;;  %1575 = vmatpush.msrb.mxu3 %v6468_v52 }
 0x3d1   :  { %1516 = vmatpush.msra.mxu0 %v6469_v0  ;;  %1536 = vmatpush.msrb.mxu1 %v6470_v29 }
 0x3d2   :  { %1556 = vmatpush.msrb.mxu2 %v6471_v55  ;;  %1576 = vmatpush.msrb.mxu3 %v6472_v61 }
 0x42e   :  { %v1206_v31 = vpop.f32.mrf.mxu0  ;;  %v1226_v14 = vpop.f32.mrf.mxu1 }
 0x42f   :  { %v1269_v16 = vadd.f32 %v1206_v31, %v176_v53  ;;  %v1270_v17 = vadd.f32 %v1226_v14, %v217_v6  ;;  %v1719_v6 = vld [vmem:[#allocation7 + $0x1e8] sm:$0xff]  ;;  %v1720_v31 = vld [vmem:[#allocation7 + $0x1f0] sm:$0xff]  ;;  %v1721_v14 = vld [vmem:[#allocation7 + $0x1f8] sm:$0xff] }
 0x431   :  { %v3314_v18 = vmul.f32 -1.442695, %v1269_v16  ;;  %v3315_v19 = vmul.f32 -1.442695, %v1270_v17  ;;  %v1714_v16 = vld [vmem:[#allocation7 + $0x1c0] sm:$0xff]  ;;  %v1715_v17 = vld [vmem:[#allocation7 + $0x1c8] sm:$0xff] }
 0x433   :  { %3441 = vpow2.f32 %v3314_v18  ;;  %v1716_v18 = vld [vmem:[#allocation7 + $0x1d0] sm:$0xff] }
 0x434   :  { %3443 = vpow2.f32 %v3315_v19  ;;  %v1717_v19 = vld [vmem:[#allocation7 + $0x1d8] sm:$0xff] }
 0x435   :  { %v1266_v24 = vpop.f32.mrf.mxu3  ;;  %v1246_v3 = vpop.f32.mrf.mxu2 }
 0x436   :  { %v1272_v20 = vadd.f32 %v1266_v24, %v299_v63  ;;  %v1271_v11 = vadd.f32 %v1246_v3, %v258_v50  ;;  %v1711_v63 = vld [vmem:[#allocation7 + $0x1a8] sm:$0xff]  ;;  %v1712_v24 = vld [vmem:[#allocation7 + $0x1b0] sm:$0xff]  ;;  %v179_v50 = vadd.f32 %v6481_v34, %v6473_v5 }
 0x437   :  { %v1703_v3 = vld [vmem:[#allocation7 + $0x168] sm:$0xff] }
 0x438   :  { %v3316_v8 = vmul.f32 -1.442695, %v1272_v20  ;;  %v1713_v20 = vld [vmem:[#allocation7 + $0x1b8] sm:$0xff] }
 0x439   :  { %v3442_v54 = vpop.eup %3441 }
 0x43a   :  { %v3444_v47 = vpop.eup %3443  ;;  %v1276_v28 = vadd.f32 1.0, %v3442_v54  ;;  %3445 = vpow2.f32 %v3316_v8  ;;  %v1706_v8 = vld [vmem:[#allocation7 + $0x180] sm:$0xff]  ;;  %v1707_v54 = vld [vmem:[#allocation7 + $0x188] sm:$0xff] }
 0x43b   :  { %v1295_v9 = vadd.f32 1.0, %v3444_v47  ;;  %v1708_v47 = vld [vmem:[#allocation7 + $0x190] sm:$0xff] }
 0x43c   :  { %3447 = vrcp.f32 %v1276_v28  ;;  %v1288_v32 = vand.u32 2147483648, %v1276_v28  ;;  %v1286_v37 = vand.u32 2147483647, %v1276_v28  ;;  %vm1282_vm15 = vweird.f32 %v1276_v28 }
 0x43d   :  { %3449 = vrcp.f32 %v1295_v9  ;;  %v1307_v51 = vand.u32 2147483648, %v1295_v9  ;;  %v1305_v1 = vand.u32 2147483647, %v1295_v9  ;;  %vm1301_vm0 = vweird.f32 %v1295_v9 }
 0x43e   :  { %v1289_v43 = vor.u32 1.1754944e-38, %v1288_v32  ;;  %vm1287_vm3 = vcmp.eq.f32.partialorder %v1286_v37, 8.507059e+37  ;;  %v1694_v37 = vld [vmem:[#allocation7 + $0x120] sm:$0xff] }
 0x43f   :  { %v1308_v48 = vor.u32 1.1754944e-38, %v1307_v51  ;;  %vm1306_vm4 = vcmp.eq.f32.partialorder %v1305_v1, 8.507059e+37  ;;  %v1696_v1 = vld [vmem:[#allocation7 + $0x130] sm:$0xff] }
 0x440   :  { %v3446_v26 = vpop.eup %3445 }
 0x441   :  { %v1315_v30 = vadd.f32 1.0, %v3446_v26  ;;  %v1704_v26 = vld [vmem:[#allocation7 + $0x170] sm:$0xff] }
 0x442   :  { %v3448_v22 = vpop.eup %3447 }
 0x443   :  { %v3450_v35 = vpop.eup %3449  ;;  %v1278_v38 = vmul.f32 %v3448_v22, %v1276_v28  ;;  %3451 = vrcp.f32 %v1315_v30  ;;  %vm1283_vm13 = vweird.f32 %v3448_v22  ;;  %v1327_v0 = vand.u32 2147483648, %v1315_v30  ;;  %v1709_v28 = vld [vmem:[#allocation7 + $0x198] sm:$0xff] }
 0x444   :  { %v1297_v25 = vmul.f32 %v3450_v35, %v1295_v9  ;;  %3453 = vtanh.f32 %v1271_v11  ;;  %vm1302_vm14 = vweird.f32 %v3450_v35  ;;  %vm1284_vm1 = vmor %vm1282_vm15, %vm1283_vm13  ;;  %vm1321_vm6 = vweird.f32 %v1315_v30  ;;  %v1702_v9 = vld [vmem:[#allocation7 + $0x160] sm:$0xff]  ;;  %v1705_v11 = vld [vmem:[#allocation7 + $0x178] sm:$0xff] }
 0x445   :  { %v1279_v33 = vsub.f32 1.0, %v1278_v38  ;;  %vm1303_vm2 = vmor %vm1301_vm0, %vm1302_vm14  ;;  %v1325_v29 = vand.u32 2147483647, %v1315_v30  ;;  %v1328_v61 = vor.u32 1.1754944e-38, %v1327_v0  ;;  %v1683_v0 = vld [vmem:[#allocation7 + $0xc8] sm:$0xff] }
 0x446   :  { %v1298_v21 = vsub.f32 1.0, %v1297_v25  ;;  %v1698_v25 = vld [vmem:[#allocation7 + $0x140] sm:$0xff] }
 0x447   :  { %v1280_v15 = vmul.f32 %v3448_v22, %v1279_v33  ;;  %vm1326_vm8 = vcmp.eq.f32.partialorder %v1325_v29, 8.507059e+37  ;;  %v1699_v33 = vld [vmem:[#allocation7 + $0x148] sm:$0xff]  ;;  %v1684_v29 = vld [vmem:[#allocation7 + $0xd0] sm:$0xff] }
 0x448   :  { %v1299_v39 = vmul.f32 %v3450_v35, %v1298_v21  ;;  %v1700_v21 = vld [vmem:[#allocation7 + $0x150] sm:$0xff] }
 0x449   :  { %v3452_v40 = vpop.eup %3451  ;;  %v1281_v41 = vadd.f32 %v3448_v22, %v1280_v15  ;;  %v1701_v15 = vld [vmem:[#allocation7 + $0x158] sm:$0xff] }
 0x44a   :  { %v1300_v44 = vadd.f32 %v3450_v35, %v1299_v39  ;;  %v1317_v45 = vmul.f32 %v3452_v40, %v1315_v30  ;;  %v3454_v42 = vpop.eup %3453  ;;  %vm1322_vm5 = vweird.f32 %v3452_v40  ;;  %v6482_v30 = vld [vmem:[#allocation65_spill] sm:$0xff] }
 0x44b   :  { %v1285_v49 = vsel %vm1284_vm1, %v3448_v22, %v1281_v41  ;;  %vm1323_vm7 = vmor %vm1321_vm6, %vm1322_vm5  ;;  %v220_v22 = vadd.f32 %v6482_v30, %v6475_v36  ;;  %v1695_v39 = vld [vmem:[#allocation7 + $0x128] sm:$0xff]  ;;  %v1664_v30 = vld [vmem:[#allocation7 + $0x30] sm:$0xff] }
 0x44c   :  { %v1290_v4 = vsel %vm1287_vm3, %v1289_v43, %v1285_v49  ;;  %v1304_v7 = vsel %vm1303_vm2, %v3450_v35, %v1300_v44  ;;  %v1318_v56 = vsub.f32 1.0, %v1317_v45  ;;  %v1697_v43 = vld [vmem:[#allocation7 + $0x138] sm:$0xff]  ;;  %v1690_v44 = vld [vmem:[#allocation7 + $0x100] sm:$0xff]  ;;  %v1691_v45 = vld [vmem:[#allocation7 + $0x108] sm:$0xff] }
 0x44d   :  { %v1309_v60 = vsel %vm1306_vm4, %v1308_v48, %v1304_v7  ;;  %v1332_v2 = vmul.f32 %v3454_v42, %v1290_v4  ;;  %v1692_v48 = vld [vmem:[#allocation7 + $0x110] sm:$0xff]  ;;  %v1693_v49 = vld [vmem:[#allocation7 + $0x118] sm:$0xff]  ;;  %v1686_v7 = vld [vmem:[#allocation7 + $0xe0] sm:$0xff] }
 0x44e   :  { %v1331_v58 = vmul.f32 %v1309_v60, %v4882_v23  ;;  %v1319_v62 = vmul.f32 %v3452_v40, %v1318_v56  ;;  %v1718_v23 = vld [vmem:[#allocation7 + $0x1e0] sm:$0xff]  ;;  %v6483_v42 = vld [vmem:[#allocation66_spill] sm:$0xff]  ;;  %v1687_v56 = vld [vmem:[#allocation7 + $0xe8] sm:$0xff] }
 0x44f   :  { %v302_v4 = vadd.f32 %v6483_v42, %v6477_v13  ;;  %v1688_v60 = vld [vmem:[#allocation7 + $0xf0] sm:$0xff] }
 0x450   :  { %v4964_v57 = vadd.f32 %v1332_v2, %v1331_v58  ;;  %v1320_v52 = vadd.f32 %v3452_v40, %v1319_v62  ;;  %v1689_v58 = vld [vmem:[#allocation7 + $0xf8] sm:$0xff] }
 0x452   :  { %3455 = vtanh.f32 %v4964_v57  ;;  %v1324_v55 = vsel %vm1323_vm7, %v3452_v40, %v1320_v52  ;;  %v1682_v52 = vld [vmem:[#allocation7 + $0xc0] sm:$0xff] }
 0x453   :  { %v1329_v53 = vsel %vm1326_vm8, %v1328_v61, %v1324_v55  ;;  %v1685_v55 = vld [vmem:[#allocation7 + $0xd8] sm:$0xff] }
 0x458   :  { %v3456_v10 = vpop.eup %3455 }
 0x459   :  { %v4967_v46 = vmul.f32 %v3456_v10, %v1329_v53  ;;  %v1678_v10 = vld [vmem:[#allocation7 + $0xa0] sm:$0xff]  ;;  %v1679_v53 = vld [vmem:[#allocation7 + $0xa8] sm:$0xff] }
 0x45b   :  { %1361 = vmatmul.f32.vlgmr.msrb.gmra.mxu0 %v4967_v46  ;;  %1381 = vmatmul.f32.vlgmr.msra.gmra.mxu1 %v4967_v46 }
 0x45c   :  { %1401 = vmatmul.f32.vlgmr.msra.gmra.mxu2 %v4967_v46  ;;  %1421 = vmatmul.f32.vlgmr.msra.gmra.mxu3 %v4967_v46 }
 0x45d   :  { %1732 = vmatpush.msrb.mxu0 %v1718_v23  ;;  %1773 = vmatpush.msra.mxu1 %v1719_v6  ;;  %v1680_v23 = vld [vmem:[#allocation7 + $0xb0] sm:$0xff] }
 0x45e   :  { %1814 = vmatpush.msra.mxu2 %v1720_v31  ;;  %1855 = vmatpush.msra.mxu3 %v1721_v14  ;;  %v1681_v31 = vld [vmem:[#allocation7 + $0xb8] sm:$0xff]  ;;  %v1674_v14 = vld [vmem:[#allocation7 + $0x80] sm:$0xff] }
 0x45f   :  { %1733 = vmatpush.msrb.mxu0 %v1714_v16  ;;  %1774 = vmatpush.msra.mxu1 %v1715_v17  ;;  %v1675_v16 = vld [vmem:[#allocation7 + $0x88] sm:$0xff] }
 0x460   :  { %1815 = vmatpush.msra.mxu2 %v1716_v18  ;;  %1856 = vmatpush.msra.mxu3 %v1717_v19  ;;  %v1676_v19 = vld [vmem:[#allocation7 + $0x90] sm:$0xff] }
 0x461   :  { %1734 = vmatpush.msrb.mxu0 %v1710_v59  ;;  %1775 = vmatpush.msra.mxu1 %v1711_v63  ;;  %v1677_v59 = vld [vmem:[#allocation7 + $0x98] sm:$0xff] }
 0x462   :  { %1816 = vmatpush.msra.mxu2 %v1712_v24  ;;  %1857 = vmatpush.msra.mxu3 %v1713_v20  ;;  %v1670_v24 = vld [vmem:[#allocation7 + $0x60] sm:$0xff]  ;;  %v1671_v20 = vld [vmem:[#allocation7 + $0x68] sm:$0xff] }
 0x463   :  { %1735 = vmatpush.msrb.mxu0 %v1706_v8  ;;  %1776 = vmatpush.msra.mxu1 %v1707_v54  ;;  %v1672_v8 = vld [vmem:[#allocation7 + $0x70] sm:$0xff]  ;;  %v1673_v54 = vld [vmem:[#allocation7 + $0x78] sm:$0xff] }
 0x464   :  { %1817 = vmatpush.msra.mxu2 %v1708_v47  ;;  %1858 = vmatpush.msra.mxu3 %v1709_v28  ;;  %v1666_v47 = vld [vmem:[#allocation7 + $0x40] sm:$0xff]  ;;  %v1667_v28 = vld [vmem:[#allocation7 + $0x48] sm:$0xff] }
 0x465   :  { %1736 = vmatpush.msrb.mxu0 %v1702_v9  ;;  %1777 = vmatpush.msra.mxu1 %v1703_v3  ;;  %v1668_v9 = vld [vmem:[#allocation7 + $0x50] sm:$0xff]  ;;  %v1669_v3 = vld [vmem:[#allocation7 + $0x58] sm:$0xff] }
 0x466   :  { %1818 = vmatpush.msra.mxu2 %v1704_v26  ;;  %1859 = vmatpush.msra.mxu3 %v1705_v11  ;;  %v1662_v26 = vld [vmem:[#allocation7 + $0x20] sm:$0xff] }
 0x467   :  { %1737 = vmatpush.msrb.mxu0 %v1698_v25  ;;  %1778 = vmatpush.msra.mxu1 %v1699_v33  ;;  %v1658_v25 = vld [vmem:[#allocation7] sm:$0xff]  ;;  %v1659_v33 = vld [vmem:[#allocation7 + $0x8] sm:$0xff] }
 0x468   :  { %1819 = vmatpush.msra.mxu2 %v1700_v21  ;;  %1860 = vmatpush.msra.mxu3 %v1701_v15 }
 0x469   :  { %1738 = vmatpush.msrb.mxu0 %v1694_v37  ;;  %1779 = vmatpush.msra.mxu1 %v1695_v39 }
 0x46a   :  { %1820 = vmatpush.msra.mxu2 %v1696_v1  ;;  %1861 = vmatpush.msra.mxu3 %v1697_v43 }
 0x46b   :  { %1739 = vmatpush.msrb.mxu0 %v1690_v44  ;;  %1780 = vmatpush.msra.mxu1 %v1691_v45 }
 0x46c   :  { %1821 = vmatpush.msra.mxu2 %v1692_v48  ;;  %1862 = vmatpush.msra.mxu3 %v1693_v49 }
 0x46d   :  { %1740 = vmatpush.msrb.mxu0 %v1686_v7  ;;  %1781 = vmatpush.msra.mxu1 %v1687_v56 }
 0x46e   :  { %1822 = vmatpush.msra.mxu2 %v1688_v60  ;;  %1863 = vmatpush.msra.mxu3 %v1689_v58 }
 0x46f   :  { %1741 = vmatpush.msrb.mxu0 %v1682_v52  ;;  %1782 = vmatpush.msra.mxu1 %v1683_v0 }
 0x470   :  { %1823 = vmatpush.msra.mxu2 %v1684_v29  ;;  %1864 = vmatpush.msra.mxu3 %v1685_v55 }
 0x471   :  { %1742 = vmatpush.msrb.mxu0 %v1678_v10  ;;  %1783 = vmatpush.msra.mxu1 %v1679_v53 }
 0x472   :  { %1824 = vmatpush.msra.mxu2 %v1680_v23  ;;  %1865 = vmatpush.msra.mxu3 %v1681_v31 }
 0x473   :  { %1743 = vmatpush.msrb.mxu0 %v1674_v14  ;;  %1784 = vmatpush.msra.mxu1 %v1675_v16 }
 0x474   :  { %1825 = vmatpush.msra.mxu2 %v1676_v19  ;;  %1866 = vmatpush.msra.mxu3 %v1677_v59 }
 0x475   :  { %1744 = vmatpush.msrb.mxu0 %v1670_v24  ;;  %1785 = vmatpush.msra.mxu1 %v1671_v20  ;;  %v6486_v20 = vld [vmem:[#allocation18_spill] sm:$0xff] }
 0x476   :  { %1826 = vmatpush.msra.mxu2 %v1672_v8  ;;  %1867 = vmatpush.msra.mxu3 %v1673_v54  ;;  %v6487_v8 = vld [vmem:[#allocation20_spill] sm:$0xff] }
 0x477   :  { %1745 = vmatpush.msrb.mxu0 %v1666_v47  ;;  %1786 = vmatpush.msra.mxu1 %v1667_v28  ;;  %v5011_v54 = vld [vmem:[#allocation9 + $0x1e0] sm:$0xff]  ;;  %v5013_v47 = vld [vmem:[#allocation9 + $0x1e8] sm:$0xff] }
 0x478   :  { %1827 = vmatpush.msra.mxu2 %v1668_v9  ;;  %1868 = vmatpush.msra.mxu3 %v1669_v3  ;;  %6488 = vst [vmem:[#allocation19_spill] sm:$0xff] %v5011_v54  ;;  %v5015_v28 = vld [vmem:[#allocation9 + $0x1c0] sm:$0xff]  ;;  %v5019_v9 = vld [vmem:[#allocation9 + $0x1c8] sm:$0xff]  ;;  %v5021_v3 = vld [vmem:[#allocation9 + $0x1f8] sm:$0xff] }
 0x479   :  { %1746 = vmatpush.msrb.mxu0 %v1662_v26  ;;  %6489 = vst [vmem:[#allocation17_spill] sm:$0xff] %v5019_v9  ;;  %v5024_v26 = vld [vmem:[#allocation9 + $0x1a0] sm:$0xff] }
 0x47a   :  { %1828 = vmatpush.msra.mxu2 %v1664_v30  ;;  %v6492_v30 = vld [vmem:[#allocation52_spill] sm:$0xff] }
 0x47b   :  { %1747 = vmatpush.msrb.mxu0 %v1658_v25  ;;  %v5059_v25 = vld [vmem:[#allocation9 + $0x188] sm:$0xff] }
 0x4d8   :  { %v1362_v35 = vpop.f32.mrf.mxu0  ;;  %v1382_v38 = vpop.f32.mrf.mxu1 }
 0x4d9   :  { %v1425_v32 = vadd.f32 %v1362_v35, %v179_v50  ;;  %v1426_v51 = vadd.f32 %v1382_v38, %v220_v22  ;;  %v1663_v50 = vld [vmem:[#allocation7 + $0x28] sm:$0xff]  ;;  %v1665_v22 = vld [vmem:[#allocation7 + $0x38] sm:$0xff]  ;;  %v6484_v35 = vld [vmem:[#allocation68_spill] sm:$0xff] }
 0x4da   :  { %v261_v38 = vadd.f32 %v6484_v35, %v6479_v12  ;;  %1787 = vmatpush.msra.mxu1 %v1663_v50  ;;  %1869 = vmatpush.msra.mxu3 %v1665_v22  ;;  %v5028_v50 = vld [vmem:[#allocation9 + $0x1d8] sm:$0xff]  ;;  %v5047_v22 = vld [vmem:[#allocation9 + $0x1f0] sm:$0xff] }
 0x4db   :  { %v3317_v40 = vmul.f32 -1.442695, %v1425_v32  ;;  %v3318_v41 = vmul.f32 -1.442695, %v1426_v51  ;;  %v1660_v32 = vld [vmem:[#allocation7 + $0x10] sm:$0xff]  ;;  %v1661_v51 = vld [vmem:[#allocation7 + $0x18] sm:$0xff] }
 0x4dc   :  { %1788 = vmatpush.msra.mxu1 %v1659_v33  ;;  %1829 = vmatpush.msra.mxu2 %v1660_v32  ;;  %6491 = vst [vmem:[#allocation21_spill] sm:$0xff] %v5028_v50  ;;  %v5055_v35 = vld [vmem:[#allocation9 + $0x1b0] sm:$0xff]  ;;  %v5067_v33 = vld [vmem:[#allocation9 + $0x168] sm:$0xff] }
 0x4dd   :  { %3457 = vpow2.f32 %v3317_v40  ;;  %1870 = vmatpush.msra.mxu3 %v1661_v51  ;;  %v5071_v32 = vld [vmem:[#allocation9 + $0x190] sm:$0xff]  ;;  %v5077_v51 = vld [vmem:[#allocation9 + $0x178] sm:$0xff] }
 0x4de   :  { %3459 = vpow2.f32 %v3318_v41 }
 0x4df   :  { %v1422_v2 = vpop.f32.mrf.mxu3  ;;  %v1402_v34 = vpop.f32.mrf.mxu2 }
 0x4e0   :  { %v1428_v62 = vadd.f32 %v1422_v2, %v302_v4  ;;  %v1427_v37 = vadd.f32 %v1402_v34, %v261_v38  ;;  %v5026_v34 = vld [vmem:[#allocation9 + $0x1a8] sm:$0xff]  ;;  %v5057_v38 = vld [vmem:[#allocation9 + $0x180] sm:$0xff] }
 0x4e1   :  { %6490 = vst [vmem:[#allocation27_spill] sm:$0xff] %v5026_v34 }
 0x4e2   :  { %v3319_v61 = vmul.f32 -1.442695, %v1428_v62  ;;  %6494 = vst [vmem:[#allocation54_spill] sm:$0xff] %v5057_v38 }
 0x4e3   :  { %v3458_v6 = vpop.eup %3457 }
 0x4e4   :  { %v3460_v17 = vpop.eup %3459  ;;  %v4979_v18 = vadd.f32 1.0, %v3458_v6  ;;  %3461 = vpow2.f32 %v3319_v61 }
 0x4e5   :  { %v4981_v63 = vadd.f32 1.0, %v3460_v17 }
 0x4e6   :  { %3463 = vrcp.f32 %v4979_v18  ;;  %v1444_v44 = vand.u32 2147483648, %v4979_v18  ;;  %v1442_v49 = vand.u32 2147483647, %v4979_v18  ;;  %vm1438_vm11 = vweird.f32 %v4979_v18 }
 0x4e7   :  { %3465 = vrcp.f32 %v4981_v63  ;;  %v1463_v45 = vand.u32 2147483648, %v4981_v63  ;;  %v1461_v4 = vand.u32 2147483647, %v4981_v63  ;;  %vm1457_vm12 = vweird.f32 %v4981_v63 }
 0x4e8   :  { %v1445_v60 = vor.u32 1.1754944e-38, %v1444_v44  ;;  %vm1443_vm15 = vcmp.eq.f32.partialorder %v1442_v49, 8.507059e+37  ;;  %v5091_v44 = vld [vmem:[#allocation9 + $0x158] sm:$0xff]  ;;  %v5095_v49 = vld [vmem:[#allocation9 + $0x150] sm:$0xff] }
 0x4e9   :  { %v1464_v62 = vor.u32 1.1754944e-38, %v1463_v45  ;;  %vm1462_vm0 = vcmp.eq.f32.partialorder %v1461_v4, 8.507059e+37 }
 0x4ea   :  { %v3462_v11 = vpop.eup %3461 }
 0x4eb   :  { %v1471_v21 = vadd.f32 1.0, %v3462_v11  ;;  %v5050_v11 = vld [vmem:[#allocation9 + $0x1d0] sm:$0xff] }
 0x4ec   :  { %v3464_v15 = vpop.eup %3463 }
 0x4ed   :  { %v3466_v39 = vpop.eup %3465  ;;  %v1434_v1 = vmul.f32 %v3464_v15, %v4979_v18  ;;  %3467 = vrcp.f32 %v1471_v21  ;;  %vm1439_vm9 = vweird.f32 %v3464_v15  ;;  %v1483_v16 = vand.u32 2147483648, %v1471_v21 }
 0x4ee   :  { %v1453_v40 = vmul.f32 %v3466_v39, %v4981_v63  ;;  %3469 = vtanh.f32 %v1427_v37  ;;  %vm1458_vm10 = vweird.f32 %v3466_v39  ;;  %vm1440_vm13 = vmor %vm1438_vm11, %vm1439_vm9  ;;  %vm1477_vm2 = vweird.f32 %v1471_v21  ;;  %v6495_v37 = vld [vmem:[#allocation44_spill] sm:$0xff] }
 0x4ef   :  { %v1435_v41 = vsub.f32 1.0, %v1434_v1  ;;  %vm1459_vm14 = vmor %vm1457_vm12, %vm1458_vm10  ;;  %v1481_v17 = vand.u32 2147483647, %v1471_v21  ;;  %v1484_v19 = vor.u32 1.1754944e-38, %v1483_v16  ;;  %v6496_v1 = vld [vmem:[#allocation67_spill] sm:$0xff]  ;;  %v5137_v16 = vld [vmem:[#allocation9 + $0xa0] sm:$0xff] }
 0x4f0   :  { %v1454_v43 = vsub.f32 1.0, %v1453_v40  ;;  %v223_v40 = vadd.f32 %v6496_v1, %v6475_v36  ;;  %v5102_v36 = vld [vmem:[#allocation9 + $0x138] sm:$0xff]  ;;  %6499 = vst [vmem:[#allocation56_spill] sm:$0xff] %v5137_v16 }
 0x4f1   :  { %v1436_v48 = vmul.f32 %v3464_v15, %v1435_v41  ;;  %vm1482_vm4 = vcmp.eq.f32.partialorder %v1481_v17, 8.507059e+37  ;;  %v5087_v41 = vld [vmem:[#allocation9 + $0x140] sm:$0xff]  ;;  %v5139_v17 = vld [vmem:[#allocation9 + $0xa8] sm:$0xff] }
 0x4f2   :  { %v1455_v42 = vmul.f32 %v3466_v39, %v1454_v43  ;;  %v5089_v43 = vld [vmem:[#allocation9 + $0x148] sm:$0xff]  ;;  %6500 = vst [vmem:[#allocation55_spill] sm:$0xff] %v5139_v17 }
 0x4f3   :  { %v3468_v7 = vpop.eup %3467  ;;  %v1437_v56 = vadd.f32 %v3464_v15, %v1436_v48 }
 0x4f4   :  { %v1456_v2 = vadd.f32 %v3466_v39, %v1455_v42  ;;  %v1473_v58 = vmul.f32 %v3468_v7, %v1471_v21  ;;  %v3470_v0 = vpop.eup %3469  ;;  %vm1478_vm1 = vweird.f32 %v3468_v7  ;;  %v5069_v21 = vld [vmem:[#allocation9 + $0x198] sm:$0xff] }
 0x4f5   :  { %v1441_v52 = vsel %vm1440_vm13, %v3464_v15, %v1437_v56  ;;  %vm1479_vm3 = vmor %vm1477_vm2, %vm1478_vm1  ;;  %v5079_v15 = vld [vmem:[#allocation9 + $0x170] sm:$0xff] }
 0x4f6   :  { %v1446_v29 = vsel %vm1443_vm15, %v1445_v60, %v1441_v52  ;;  %v1460_v55 = vsel %vm1459_vm14, %v3466_v39, %v1456_v2  ;;  %v1474_v61 = vsub.f32 1.0, %v1473_v58  ;;  %v182_v39 = vadd.f32 %v6495_v37, %v6473_v5  ;;  %v5097_v5 = vld [vmem:[#allocation9 + $0x120] sm:$0xff]  ;;  %v5107_v56 = vld [vmem:[#allocation9 + $0x130] sm:$0xff] }
 0x4f7   :  { %v1465_v10 = vsel %vm1462_vm0, %v1464_v62, %v1460_v55  ;;  %v1488_v53 = vmul.f32 %v3470_v0, %v1446_v29  ;;  %v5109_v58 = vld [vmem:[#allocation9 + $0x100] sm:$0xff]  ;;  %v5111_v62 = vld [vmem:[#allocation9 + $0x108] sm:$0xff]  ;;  %v5121_v29 = vld [vmem:[#allocation9 + $0x118] sm:$0xff] }
 0x4f8   :  { %v1487_v23 = vmul.f32 %v1465_v10, %v4964_v57  ;;  %v1475_v6 = vmul.f32 %v3468_v7, %v1474_v61  ;;  %v6485_v57 = vld [vmem:[#allocation74_spill] sm:$0xff]  ;;  %v5117_v52 = vld [vmem:[#allocation9 + $0xe0] sm:$0xff]  ;;  %v5119_v0 = vld [vmem:[#allocation9 + $0xe8] sm:$0xff] }
 0x4f9   :  { %v5124_v55 = vld [vmem:[#allocation9 + $0xc0] sm:$0xff]  ;;  %v5126_v61 = vld [vmem:[#allocation9 + $0xc8] sm:$0xff]  ;;  %v5128_v10 = vld [vmem:[#allocation9 + $0xf8] sm:$0xff] }
 0x4fa   :  { %v4996_v31 = vadd.f32 %v1488_v53, %v1487_v23  ;;  %v1476_v14 = vadd.f32 %v3468_v7, %v1475_v6  ;;  %v6497_v53 = vld [vmem:[#allocation70_spill] sm:$0xff]  ;;  %v5134_v6 = vld [vmem:[#allocation9 + $0xd8] sm:$0xff]  ;;  %v5163_v37 = vld [vmem:[#allocation9 + $0x60] sm:$0xff] }
 0x4fb   :  { %v305_v23 = vadd.f32 %v6497_v53, %v6477_v13  ;;  %6498 = vst [vmem:[#allocation57_spill] sm:$0xff] %v5134_v6  ;;  %v5145_v13 = vld [vmem:[#allocation9 + $0xb8] sm:$0xff]  ;;  %v5191_v53 = vld [vmem:[#allocation9 + $0x20] sm:$0xff] }
 0x4fc   :  { %3471 = vtanh.f32 %v4996_v31  ;;  %v1480_v18 = vsel %vm1479_vm3, %v3468_v7, %v1476_v14  ;;  %v5099_v7 = vld [vmem:[#allocation9 + $0x128] sm:$0xff]  ;;  %6501 = vst [vmem:[#allocation58_spill] sm:$0xff] %v5145_v13 }
 0x4fd   :  { %v1485_v63 = vsel %vm1482_vm4, %v1484_v19, %v1480_v18  ;;  %v5141_v18 = vld [vmem:[#allocation9 + $0x110] sm:$0xff]  ;;  %6506 = vst [vmem:[#allocation23_spill] sm:$0xff] %v5163_v37 }
 0x4fe   :  { %6513 = vst [vmem:[#allocation38_spill] sm:$0xff] %v5191_v53 }
 0x502   :  { %v3472_v59 = vpop.eup %3471 }
 0x503   :  { %v1491_v24 = vmul.f32 %v3472_v59, %v1485_v63  ;;  %v5147_v59 = vld [vmem:[#allocation9 + $0xf0] sm:$0xff]  ;;  %v5151_v63 = vld [vmem:[#allocation9 + $0x80] sm:$0xff] }
 0x504   :  { %6502 = vst [vmem:[#allocation60_spill] sm:$0xff] %v5151_v63 }
 0x505   :  { %1517 = vmatmul.f32.vlgmr.msra.gmra.mxu0 %v1491_v24  ;;  %1537 = vmatmul.f32.vlgmr.msrb.gmra.mxu1 %v1491_v24 }
 0x506   :  { %1557 = vmatmul.f32.vlgmr.msrb.gmra.mxu2 %v1491_v24  ;;  %1577 = vmatmul.f32.vlgmr.msrb.gmra.mxu3 %v1491_v24 }
 0x507   :  { %1996 = vmatpush.msra.mxu0 %v5011_v54  ;;  %2016 = vmatpush.msrb.mxu1 %v5013_v47 }
 0x508   :  { %2056 = vmatpush.msrb.mxu3 %v5021_v3  ;;  %2036 = vmatpush.msrb.mxu2 %v5047_v22 }
 0x509   :  { %1997 = vmatpush.msra.mxu0 %v5015_v28  ;;  %2017 = vmatpush.msrb.mxu1 %v5019_v9 }
 0x50a   :  { %2057 = vmatpush.msrb.mxu3 %v5028_v50  ;;  %2037 = vmatpush.msrb.mxu2 %v5050_v11 }
 0x50b   :  { %1998 = vmatpush.msra.mxu0 %v5024_v26  ;;  %2018 = vmatpush.msrb.mxu1 %v5026_v34 }
 0x50c   :  { %2038 = vmatpush.msrb.mxu2 %v5055_v35 }
 0x50d   :  { %1748 = vmatmul.f32.vlgmr.msrb.gmra.mxu0 %v6485_v57  ;;  %1789 = vmatmul.f32.vlgmr.msra.gmra.mxu1 %v6485_v57 }
 0x50e   :  { %1830 = vmatmul.f32.vlgmr.msra.gmra.mxu2 %v6485_v57  ;;  %1871 = vmatmul.f32.vlgmr.msra.gmra.mxu3 %v6485_v57 }
 0x50f   :  { %1999 = vmatpush.msra.mxu0 %v5057_v38  ;;  %2019 = vmatpush.msrb.mxu1 %v5059_v25 }
 0x510   :  { %2039 = vmatpush.msrb.mxu2 %v5071_v32 }
 0x511   :  { %2020 = vmatpush.msrb.mxu1 %v5067_v33 }
 0x512   :  { %2040 = vmatpush.msrb.mxu2 %v5079_v15 }
 0x513   :  { %2021 = vmatpush.msrb.mxu1 %v5089_v43 }
 0x514   :  { %2041 = vmatpush.msrb.mxu2 %v5095_v49 }
 0x515   :  { %1751 = vmatmul.f32.gmra.mxu0 %v6486_v20  ;;  %1792 = vmatmul.f32.gmra.mxu1 %v6486_v20 }
 0x516   :  { %1833 = vmatmul.f32.gmra.mxu2 %v6486_v20  ;;  %1874 = vmatmul.f32.gmra.mxu3 %v6486_v20  ;;  %v5157_v20 = vld [vmem:[#allocation9 + $0x98] sm:$0xff] }
 0x517   :  { %2022 = vmatpush.msrb.mxu1 %v5099_v7  ;;  %2042 = vmatpush.msrb.mxu2 %v5107_v56  ;;  %6504 = vst [vmem:[#allocation31_spill] sm:$0xff] %v5157_v20 }
 0x519   :  { %2023 = vmatpush.msrb.mxu1 %v5111_v62  ;;  %2043 = vmatpush.msrb.mxu2 %v5141_v18 }
 0x51b   :  { %2024 = vmatpush.msrb.mxu1 %v5119_v0  ;;  %2044 = vmatpush.msrb.mxu2 %v5147_v59 }
 0x51d   :  { %1754 = vmatmul.f32.gmra.mxu0 %v6487_v8  ;;  %1795 = vmatmul.f32.gmra.mxu1 %v6487_v8 }
 0x51e   :  { %1836 = vmatmul.f32.gmra.mxu2 %v6487_v8  ;;  %1877 = vmatmul.f32.gmra.mxu3 %v6487_v8  ;;  %v5159_v8 = vld [vmem:[#allocation9 + $0xd0] sm:$0xff] }
 0x51f   :  { %2025 = vmatpush.msrb.mxu1 %v5126_v61  ;;  %6505 = vst [vmem:[#allocation25_spill] sm:$0xff] %v5159_v8  ;;  %2045 = vmatpush.msrb.mxu2 %v5159_v8 }
 0x521   :  { %2026 = vmatpush.msrb.mxu1 %v5139_v17 }
 0x525   :  { %1757 = vmatmul.f32.gmra.mxu0 %v6492_v30  ;;  %1798 = vmatmul.f32.gmra.mxu1 %v6492_v30 }
 0x526   :  { %1839 = vmatmul.f32.gmra.mxu2 %v6492_v30  ;;  %1880 = vmatmul.f32.gmra.mxu3 %v6492_v30 }
 0x52d   :  { %1760 = vmatmul.f32.gmra.mxu0 %v4885_v27  ;;  %1801 = vmatmul.f32.gmra.mxu1 %v4885_v27 }
 0x52e   :  { %1842 = vmatmul.f32.gmra.mxu2 %v4885_v27  ;;  %1883 = vmatmul.f32.gmra.mxu3 %v4885_v27  ;;  %v5053_v27 = vld [vmem:[#allocation9 + $0x1b8] sm:$0xff] }
 0x52f   :  { %6493 = vst [vmem:[#allocation51_spill] sm:$0xff] %v5053_v27  ;;  %2058 = vmatpush.msrb.mxu3 %v5053_v27 }
 0x531   :  { %2059 = vmatpush.msrb.mxu3 %v5069_v21 }
 0x533   :  { %2060 = vmatpush.msrb.mxu3 %v5077_v51 }
 0x535   :  { %1763 = vmatmul.f32.gmra.mxu0 %v4967_v46  ;;  %1804 = vmatmul.f32.gmra.mxu1 %v4967_v46 }
 0x536   :  { %1845 = vmatmul.f32.gmra.mxu2 %v4967_v46  ;;  %1886 = vmatmul.f32.gmra.mxu3 %v4967_v46  ;;  %v5062_v46 = vld [vmem:[#allocation9 + $0x160] sm:$0xff] }
 0x537   :  { %2000 = vmatpush.msra.mxu0 %v5062_v46  ;;  %2061 = vmatpush.msrb.mxu3 %v5091_v44 }
 0x539   :  { %2001 = vmatpush.msra.mxu0 %v5087_v41  ;;  %2062 = vmatpush.msrb.mxu3 %v5102_v36 }
 0x53b   :  { %2002 = vmatpush.msra.mxu0 %v5097_v5  ;;  %2063 = vmatpush.msrb.mxu3 %v5121_v29 }
 0x53d   :  { %1766 = vmatmul.f32.gmra.mxu0 %v1491_v24  ;;  %1807 = vmatmul.f32.gmra.mxu1 %v1491_v24 }
 0x53e   :  { %1848 = vmatmul.f32.gmra.mxu2 %v1491_v24  ;;  %1889 = vmatmul.f32.gmra.mxu3 %v1491_v24  ;;  %v5153_v24 = vld [vmem:[#allocation9 + $0x88] sm:$0xff] }
 0x53f   :  { %2003 = vmatpush.msra.mxu0 %v5109_v58  ;;  %2064 = vmatpush.msrb.mxu3 %v5128_v10  ;;  %6503 = vst [vmem:[#allocation59_spill] sm:$0xff] %v5153_v24 }
 0x540   :  { %2027 = vmatpush.msrb.mxu1 %v5153_v24 }
 0x541   :  { %2004 = vmatpush.msra.mxu0 %v5117_v52  ;;  %2065 = vmatpush.msrb.mxu3 %v5134_v6 }
 0x543   :  { %2005 = vmatpush.msra.mxu0 %v5124_v55  ;;  %2066 = vmatpush.msrb.mxu3 %v5145_v13 }
 0x545   :  { %2006 = vmatpush.msra.mxu0 %v5137_v16  ;;  %2067 = vmatpush.msrb.mxu3 %v5157_v20  ;;  %v5215_v20 = vld [vmem:[#allocation9 + $0x18] sm:$0xff] }
 0x546   :  { %6522 = vst [vmem:[#allocation41_spill] sm:$0xff] %v5215_v20 }
 0x547   :  { %2007 = vmatpush.msra.mxu0 %v5151_v63 }
 0x549   :  { %2008 = vmatpush.msra.mxu0 %v5163_v37 }
 0x582   :  { %v1518_v45 = vpop.f32.mrf.mxu0  ;;  %v1538_v48 = vpop.f32.mrf.mxu1 }
 0x583   :  { %v1581_v42 = vadd.f32 %v1518_v45, %v182_v39  ;;  %v1582_v4 = vadd.f32 %v1538_v48, %v223_v40  ;;  %v5165_v39 = vld [vmem:[#allocation9 + $0x68] sm:$0xff]  ;;  %v5171_v45 = vld [vmem:[#allocation9 + $0xb0] sm:$0xff]  ;;  %v5173_v48 = vld [vmem:[#allocation9 + $0x78] sm:$0xff] }
 0x584   :  { %6507 = vst [vmem:[#allocation22_spill] sm:$0xff] %v5165_v39  ;;  %2028 = vmatpush.msrb.mxu1 %v5165_v39  ;;  %2046 = vmatpush.msrb.mxu2 %v5171_v45  ;;  %v6519_v39 = vld [vmem:[#allocation72_spill] sm:$0xff] }
 0x585   :  { %v3320_v60 = vmul.f32 -1.442695, %v1581_v42  ;;  %v3321_v2 = vmul.f32 -1.442695, %v1582_v4  ;;  %6508 = vst [vmem:[#allocation24_spill] sm:$0xff] %v5171_v45  ;;  %v5179_v4 = vld [vmem:[#allocation9 + $0x40] sm:$0xff]  ;;  %2068 = vmatpush.msrb.mxu3 %v5173_v48  ;;  %v264_v37 = vadd.f32 %v6519_v39, %v6479_v12 }
 0x586   :  { %6509 = vst [vmem:[#allocation35_spill] sm:$0xff] %v5173_v48  ;;  %2009 = vmatpush.msra.mxu0 %v5179_v4  ;;  %v5223_v12 = vld [vmem:[#allocation9 + $0x30] sm:$0xff] }
 0x587   :  { %3473 = vpow2.f32 %v3320_v60  ;;  %6510 = vst [vmem:[#allocation29_spill] sm:$0xff] %v5179_v4  ;;  %v5181_v60 = vld [vmem:[#allocation9 + $0x48] sm:$0xff]  ;;  %v5213_v4 = vld [vmem:[#allocation9 + $0x38] sm:$0xff] }
 0x588   :  { %3475 = vpow2.f32 %v3321_v2  ;;  %6511 = vst [vmem:[#allocation26_spill] sm:$0xff] %v5181_v60  ;;  %v5186_v2 = vld [vmem:[#allocation9 + $0x90] sm:$0xff]  ;;  %2029 = vmatpush.msrb.mxu1 %v5181_v60  ;;  %2010 = vmatpush.msra.mxu0 %v5191_v53 }
 0x589   :  { %v1578_v14 = vpop.f32.mrf.mxu3  ;;  %6512 = vst [vmem:[#allocation28_spill] sm:$0xff] %v5186_v2  ;;  %2047 = vmatpush.msrb.mxu2 %v5186_v2  ;;  %v5211_v60 = vld [vmem:[#allocation9 + $0x50] sm:$0xff] }
 0x58a   :  { %v1584_v19 = vadd.f32 %v1578_v14, %v305_v23  ;;  %v5193_v23 = vld [vmem:[#allocation9 + $0x28] sm:$0xff]  ;;  %v5195_v14 = vld [vmem:[#allocation9 + $0x58] sm:$0xff]  ;;  %6520 = vst [vmem:[#allocation34_spill] sm:$0xff] %v5211_v60 }
 0x58b   :  { %6514 = vst [vmem:[#allocation33_spill] sm:$0xff] %v5193_v23  ;;  %2069 = vmatpush.msrb.mxu3 %v5195_v14  ;;  %2030 = vmatpush.msrb.mxu1 %v5193_v23 }
 0x58c   :  { %v3322_v57 = vmul.f32 -1.442695, %v1584_v19  ;;  %6515 = vst [vmem:[#allocation30_spill] sm:$0xff] %v5195_v14  ;;  %v5199_v19 = vld [vmem:[#allocation9 + $0x70] sm:$0xff] }
 0x58d   :  { %v3474_v30 = vpop.eup %3473  ;;  %6516 = vst [vmem:[#allocation32_spill] sm:$0xff] %v5199_v19  ;;  %2048 = vmatpush.msrb.mxu2 %v5199_v19  ;;  %2070 = vmatpush.msrb.mxu3 %v5213_v4 }
 0x58e   :  { %v3476_v1 = vpop.eup %3475  ;;  %v5167_v40 = vadd.f32 1.0, %v3474_v30  ;;  %3477 = vpow2.f32 %v3322_v57  ;;  %v1558_v57 = vpop.f32.mrf.mxu2  ;;  %v5203_v30 = vld [vmem:[#allocation9] sm:$0xff]  ;;  %6521 = vst [vmem:[#allocation36_spill] sm:$0xff] %v5213_v4  ;;  %v5230_v4 = vld [vmem:[#allocation9 + $0x10] sm:$0xff] }
 0x58f   :  { %v5175_v42 = vadd.f32 1.0, %v3476_v1  ;;  %6517 = vst [vmem:[#allocation40_spill] sm:$0xff] %v5203_v30  ;;  %v5205_v1 = vld [vmem:[#allocation9 + $0x8] sm:$0xff]  ;;  %v1583_v24 = vadd.f32 %v1558_v57, %v264_v37  ;;  %2011 = vmatpush.msra.mxu0 %v5203_v30  ;;  %2049 = vmatpush.msrb.mxu2 %v5211_v60 }
 0x590   :  { %3479 = vrcp.f32 %v5167_v40  ;;  %6518 = vst [vmem:[#allocation37_spill] sm:$0xff] %v5205_v1  ;;  %2031 = vmatpush.msrb.mxu1 %v5205_v1  ;;  %2071 = vmatpush.msrb.mxu3 %v5215_v20  ;;  %v1600_v1 = vand.u32 2147483648, %v5167_v40  ;;  %vm1594_vm7 = vweird.f32 %v5167_v40 }
 0x591   :  { %3481 = vrcp.f32 %v5175_v42  ;;  %6523 = vst [vmem:[#allocation39_spill] sm:$0xff] %v5223_v12  ;;  %2147 = vmatpush.msrb.mxu0 %v5011_v54  ;;  %2050 = vmatpush.msrb.mxu2 %v5223_v12  ;;  %v1619_v20 = vand.u32 2147483648, %v5175_v42  ;;  %v1598_v54 = vand.u32 2147483647, %v5167_v40  ;;  %vm1613_vm8 = vweird.f32 %v5175_v42 }
 0x592   :  { %6524 = vst [vmem:[#allocation45_spill] sm:$0xff] %v5230_v4  ;;  %2167 = vmatpush.msra.mxu1 %v5013_v47  ;;  %2207 = vmatpush.msra.mxu3 %v5021_v3 }
 0x593   :  { %2148 = vmatpush.msrb.mxu0 %v5015_v28  ;;  %2051 = vmatpush.msrb.mxu2 %v5230_v4  ;;  %vm1599_vm11 = vcmp.eq.f32.partialorder %v1598_v54, 8.507059e+37 }
 0x594   :  { %v3478_v48 = vpop.eup %3477  ;;  %2168 = vmatpush.msra.mxu1 %v5019_v9  ;;  %2208 = vmatpush.msra.mxu3 %v5028_v50 }
 0x595   :  { %v5217_v2 = vadd.f32 1.0, %v3478_v48  ;;  %2187 = vmatpush.msra.mxu2 %v5047_v22  ;;  %2149 = vmatpush.msrb.mxu0 %v5024_v26 }
 0x596   :  { %v3480_v14 = vpop.eup %3479  ;;  %2169 = vmatpush.msra.mxu1 %v5026_v34  ;;  %2209 = vmatpush.msra.mxu3 %v5053_v27 }
 0x597   :  { %v3482_v39 = vpop.eup %3481  ;;  %v1590_v23 = vmul.f32 %v3480_v14, %v5167_v40  ;;  %3483 = vrcp.f32 %v5217_v2  ;;  %vm1595_vm5 = vweird.f32 %v3480_v14  ;;  %2188 = vmatpush.msra.mxu2 %v5050_v11  ;;  %2150 = vmatpush.msrb.mxu0 %v5057_v38  ;;  %v1620_v40 = vor.u32 1.1754944e-38, %v1619_v20 }
 0x598   :  { %v1609_v48 = vmul.f32 %v3482_v39, %v5175_v42  ;;  %3485 = vtanh.f32 %v1583_v24  ;;  %vm1614_vm6 = vweird.f32 %v3482_v39  ;;  %vm1596_vm9 = vmor %vm1594_vm7, %vm1595_vm5  ;;  %2170 = vmatpush.msra.mxu1 %v5059_v25  ;;  %2210 = vmatpush.msra.mxu3 %v5069_v21  ;;  %vm1633_vm14 = vweird.f32 %v5217_v2 }
 0x599   :  { %v1591_v37 = vsub.f32 1.0, %v1590_v23  ;;  %vm1615_vm10 = vmor %vm1613_vm8, %vm1614_vm6  ;;  %2189 = vmatpush.msra.mxu2 %v5055_v35  ;;  %2151 = vmatpush.msrb.mxu0 %v5062_v46 }
 0x59a   :  { %v1610_v57 = vsub.f32 1.0, %v1609_v48  ;;  %v1617_v48 = vand.u32 2147483647, %v5175_v42  ;;  %2171 = vmatpush.msra.mxu1 %v5067_v33  ;;  %2211 = vmatpush.msra.mxu3 %v5077_v51 }
 0x59b   :  { %v1592_v30 = vmul.f32 %v3480_v14, %v1591_v37  ;;  %v1601_v37 = vor.u32 1.1754944e-38, %v1600_v1  ;;  %2190 = vmatpush.msra.mxu2 %v5071_v32  ;;  %2152 = vmatpush.msrb.mxu0 %v5087_v41 }
 0x59c   :  { %v1611_v23 = vmul.f32 %v3482_v39, %v1610_v57  ;;  %vm1618_vm12 = vcmp.eq.f32.partialorder %v1617_v48, 8.507059e+37  ;;  %2172 = vmatpush.msra.mxu1 %v5089_v43  ;;  %2212 = vmatpush.msra.mxu3 %v5091_v44  ;;  %v6525_v48 = vld [vmem:[#allocation59_spill] sm:$0xff] }
 0x59d   :  { %v5246_v24 = vpop.eup %3483  ;;  %v1593_v9 = vadd.f32 %v3480_v14, %v1592_v30  ;;  %2191 = vmatpush.msra.mxu2 %v5079_v15  ;;  %2153 = vmatpush.msrb.mxu0 %v5097_v5 }
 0x59e   :  { %v1612_v57 = vadd.f32 %v3482_v39, %v1611_v23  ;;  %v1629_v50 = vmul.f32 %v5246_v24, %v5217_v2  ;;  %v3486_v42 = vpop.eup %3485  ;;  %vm1634_vm13 = vweird.f32 %v5246_v24  ;;  %2173 = vmatpush.msra.mxu1 %v5099_v7  ;;  %2213 = vmatpush.msra.mxu3 %v5102_v36 }
 0x59f   :  { %v1597_v30 = vsel %vm1596_vm9, %v3480_v14, %v1593_v9  ;;  %2192 = vmatpush.msra.mxu2 %v5095_v49  ;;  %2154 = vmatpush.msrb.mxu0 %v5109_v58  ;;  %vm1635_vm15 = vmor %vm1633_vm14, %vm1634_vm13 }
 0x5a0   :  { %v1602_v27 = vsel %vm1599_vm11, %v1601_v37, %v1597_v30  ;;  %v1616_v1 = vsel %vm1615_vm10, %v3482_v39, %v1612_v57  ;;  %v1630_v23 = vsub.f32 1.0, %v1629_v50  ;;  %2174 = vmatpush.msra.mxu1 %v5111_v62  ;;  %2214 = vmatpush.msra.mxu3 %v5121_v29  ;;  %v6527_v37 = vld [vmem:[#allocation28_spill] sm:$0xff]  ;;  %v6528_v57 = vld [vmem:[#allocation23_spill] sm:$0xff] }
 0x5a1   :  { %v1621_v34 = vsel %vm1618_vm12, %v1620_v40, %v1616_v1  ;;  %v1644_v38 = vmul.f32 %v3486_v42, %v1602_v27  ;;  %2193 = vmatpush.msra.mxu2 %v5107_v56  ;;  %2155 = vmatpush.msrb.mxu0 %v5117_v52  ;;  %v6529_v40 = vld [vmem:[#allocation22_spill] sm:$0xff]  ;;  %v6530_v30 = vld [vmem:[#allocation35_spill] sm:$0xff]  ;;  %v6531_v42 = vld [vmem:[#allocation29_spill] sm:$0xff] }
 0x5a2   :  { %v1643_v54 = vmul.f32 %v1621_v34, %v4996_v31  ;;  %v1631_v9 = vmul.f32 %v5246_v24, %v1630_v23  ;;  %v1639_v31 = vand.u32 2147483648, %v5217_v2  ;;  %v1637_v34 = vand.u32 2147483647, %v5217_v2  ;;  %2175 = vmatpush.msra.mxu1 %v5119_v0  ;;  %2215 = vmatpush.msra.mxu3 %v5128_v10  ;;  %v6532_v1 = vld [vmem:[#allocation26_spill] sm:$0xff] }
 0x5a3   :  { %2194 = vmatpush.msra.mxu2 %v5141_v18  ;;  %2156 = vmatpush.msrb.mxu0 %v5124_v55  ;;  %v6533_v23 = vld [vmem:[#allocation30_spill] sm:$0xff] }
 0x5a4   :  { %v1645_v50 = vadd.f32 %v1644_v38, %v1643_v54  ;;  %v1632_v27 = vadd.f32 %v5246_v24, %v1631_v9  ;;  %v1640_v20 = vor.u32 1.1754944e-38, %v1639_v31  ;;  %vm1638_vm0 = vcmp.eq.f32.partialorder %v1637_v34, 8.507059e+37  ;;  %2176 = vmatpush.msra.mxu1 %v5126_v61  ;;  %2216 = vmatpush.msra.mxu3 %v5134_v6  ;;  %v6535_v9 = vld [vmem:[#allocation33_spill] sm:$0xff] }
 0x5a5   :  { %2195 = vmatpush.msra.mxu2 %v5147_v59  ;;  %2157 = vmatpush.msrb.mxu0 %v5137_v16  ;;  %v6534_v54 = vmov 0.0   ;;  %v6538_v31 = vld [vmem:[#allocation37_spill] sm:$0xff] }
 0x5a6   :  { %3487 = vtanh.f32 %v1645_v50  ;;  %v1636_v38 = vsel %vm1635_vm15, %v5246_v24, %v1632_v27  ;;  %2177 = vmatpush.msra.mxu1 %v5139_v17  ;;  %2217 = vmatpush.msra.mxu3 %v5145_v13  ;;  %v6526_v24 = vld [vmem:[#allocation31_spill] sm:$0xff]  ;;  %v6536_v50 = vld [vmem:[#allocation36_spill] sm:$0xff]  ;;  %v6539_v34 = vld [vmem:[#allocation41_spill] sm:$0xff] }
 0x5a7   :  { %v1641_v14 = vsel %vm1638_vm0, %v1640_v20, %v1636_v38  ;;  %2196 = vmatpush.msra.mxu2 %v5159_v8  ;;  %2158 = vmatpush.msrb.mxu0 %v5151_v63  ;;  %v6537_v27 = vld [vmem:[#allocation40_spill] sm:$0xff]  ;;  %v6540_v38 = vld [vmem:[#allocation19_spill] sm:$0xff]  ;;  %v6541_v20 = vld [vmem:[#allocation17_spill] sm:$0xff] }
 0x5a8   :  { %2178 = vmatpush.msra.mxu1 %v6525_v48  ;;  %2218 = vmatpush.msra.mxu3 %v6526_v24 }
 0x5a9   :  { %2197 = vmatpush.msra.mxu2 %v5171_v45  ;;  %2159 = vmatpush.msrb.mxu0 %v6528_v57 }
 0x5aa   :  { %2179 = vmatpush.msra.mxu1 %v6529_v40  ;;  %2219 = vmatpush.msra.mxu3 %v6530_v30 }
 0x5ab   :  { %2198 = vmatpush.msra.mxu2 %v6527_v37  ;;  %2160 = vmatpush.msrb.mxu0 %v6531_v42 }
 0x5ac   :  { %v3488_v2 = vpop.eup %3487  ;;  %2180 = vmatpush.msra.mxu1 %v6532_v1  ;;  %2220 = vmatpush.msra.mxu3 %v6533_v23 }
 0x5ad   :  { %v1647_v39 = vmul.f32 %v3488_v2, %v1641_v14  ;;  %2199 = vmatpush.msra.mxu2 %v5199_v19  ;;  %2161 = vmatpush.msrb.mxu0 %v5191_v53  ;;  %v6542_v2 = vld [vmem:[#allocation21_spill] sm:$0xff]  ;;  %v6543_v14 = vld [vmem:[#allocation27_spill] sm:$0xff] }
 0x5ae   :  { %2181 = vmatpush.msra.mxu1 %v6535_v9  ;;  %2221 = vmatpush.msra.mxu3 %v6536_v50 }
 0x5af   :  { %1769 = vmatmul.f32.gmra.mxu0 %v1647_v39  ;;  %1810 = vmatmul.f32.gmra.mxu1 %v1647_v39 }
 0x5b0   :  { %1851 = vmatmul.f32.gmra.mxu2 %v1647_v39  ;;  %1892 = vmatmul.f32.gmra.mxu3 %v1647_v39  ;;  %v6544_v39 = vld [vmem:[#allocation51_spill] sm:$0xff] }
 0x5b1   :  { %2200 = vmatpush.msra.mxu2 %v5211_v60  ;;  %2162 = vmatpush.msrb.mxu0 %v6537_v27 }
 0x5b2   :  { %2182 = vmatpush.msra.mxu1 %v6538_v31  ;;  %2222 = vmatpush.msra.mxu3 %v6539_v34 }
 0x5b3   :  { %2201 = vmatpush.msra.mxu2 %v5223_v12 }
 0x5b5   :  { %2202 = vmatpush.msra.mxu2 %v5230_v4 }
 0x5b7   :  { %2012 = vmatmul.f32.vlgmr.msra.gmra.mxu0 %v6534_v54  ;;  %2032 = vmatmul.f32.vlgmr.msrb.gmra.mxu1 %v6534_v54 }
 0x5b8   :  { %2052 = vmatmul.f32.vlgmr.msrb.gmra.mxu2 %v6534_v54  ;;  %2072 = vmatmul.f32.vlgmr.msrb.gmra.mxu3 %v6534_v54  ;;  %v6545_v54 = vld [vmem:[#allocation54_spill] sm:$0xff] }
 0x5b9   :  { %2298 = vmatpush.msra.mxu0 %v6540_v38  ;;  %2318 = vmatpush.msrb.mxu1 %v5013_v47 }
 0x5ba   :  { %2338 = vmatpush.msrb.mxu2 %v5047_v22  ;;  %2358 = vmatpush.msrb.mxu3 %v5021_v3 }
 0x5bb   :  { %2299 = vmatpush.msra.mxu0 %v5015_v28  ;;  %2319 = vmatpush.msrb.mxu1 %v6541_v20 }
 0x5bc   :  { %2339 = vmatpush.msrb.mxu2 %v5050_v11  ;;  %2359 = vmatpush.msrb.mxu3 %v6542_v2 }
 0x5bd   :  { %2300 = vmatpush.msra.mxu0 %v5024_v26  ;;  %2320 = vmatpush.msrb.mxu1 %v6543_v14 }
 0x5be   :  { %2340 = vmatpush.msrb.mxu2 %v5055_v35  ;;  %2360 = vmatpush.msrb.mxu3 %v6544_v39 }
 0x5bf   :  { %2301 = vmatpush.msra.mxu0 %v6545_v54  ;;  %2321 = vmatpush.msrb.mxu1 %v5059_v25 }
 0x5c0   :  { %2341 = vmatpush.msrb.mxu2 %v5071_v32  ;;  %2361 = vmatpush.msrb.mxu3 %v5069_v21 }
 0x5c1   :  { %2302 = vmatpush.msra.mxu0 %v5062_v46  ;;  %2322 = vmatpush.msrb.mxu1 %v5067_v33 }
 0x5c2   :  { %2342 = vmatpush.msrb.mxu2 %v5079_v15  ;;  %2362 = vmatpush.msrb.mxu3 %v5077_v51 }
 0x5c3   :  { %2303 = vmatpush.msra.mxu0 %v5087_v41  ;;  %2323 = vmatpush.msrb.mxu1 %v5089_v43 }
 0x5c4   :  { %2343 = vmatpush.msrb.mxu2 %v5095_v49  ;;  %2363 = vmatpush.msrb.mxu3 %v5091_v44 }
 0x5c5   :  { %2304 = vmatpush.msra.mxu0 %v5097_v5  ;;  %2324 = vmatpush.msrb.mxu1 %v5099_v7 }
 0x5c6   :  { %2344 = vmatpush.msrb.mxu2 %v5107_v56  ;;  %2364 = vmatpush.msrb.mxu3 %v5102_v36 }
 0x5c7   :  { %2305 = vmatpush.msra.mxu0 %v5109_v58  ;;  %2325 = vmatpush.msrb.mxu1 %v5111_v62 }
 0x5c8   :  { %2345 = vmatpush.msrb.mxu2 %v5141_v18  ;;  %2365 = vmatpush.msrb.mxu3 %v5121_v29 }
 0x5c9   :  { %2306 = vmatpush.msra.mxu0 %v5117_v52  ;;  %2326 = vmatpush.msrb.mxu1 %v5119_v0 }
 0x5ca   :  { %2346 = vmatpush.msrb.mxu2 %v5147_v59  ;;  %2366 = vmatpush.msrb.mxu3 %v5128_v10 }
 0x5cb   :  { %2307 = vmatpush.msra.mxu0 %v5124_v55  ;;  %2327 = vmatpush.msrb.mxu1 %v5126_v61 }
 0x5cc   :  { %2347 = vmatpush.msrb.mxu2 %v5159_v8  ;;  %2367 = vmatpush.msrb.mxu3 %v5134_v6 }
 0x5cd   :  { %2308 = vmatpush.msra.mxu0 %v5137_v16  ;;  %2328 = vmatpush.msrb.mxu1 %v5139_v17 }
 0x5ce   :  { %2348 = vmatpush.msrb.mxu2 %v5171_v45  ;;  %2368 = vmatpush.msrb.mxu3 %v5145_v13 }
 0x5cf   :  { %2309 = vmatpush.msra.mxu0 %v5151_v63  ;;  %2329 = vmatpush.msrb.mxu1 %v6525_v48 }
 0x5d0   :  { %2349 = vmatpush.msrb.mxu2 %v6527_v37  ;;  %2369 = vmatpush.msrb.mxu3 %v6526_v24 }
 0x5d1   :  { %2310 = vmatpush.msra.mxu0 %v6528_v57  ;;  %2330 = vmatpush.msrb.mxu1 %v6529_v40 }
 0x5d2   :  { %2350 = vmatpush.msrb.mxu2 %v5199_v19  ;;  %2370 = vmatpush.msrb.mxu3 %v6530_v30 }
 0x5d3   :  { %2311 = vmatpush.msra.mxu0 %v6531_v42  ;;  %2331 = vmatpush.msrb.mxu1 %v6532_v1  ;;  %v1749_v1 = vpop.f32.mrf.mxu0  ;;  %v1872_v42 = vpop.f32.mrf.mxu3 }
 0x5d4   :  { %2351 = vmatpush.msrb.mxu2 %v5211_v60  ;;  %2371 = vmatpush.msrb.mxu3 %v6533_v23  ;;  %v1790_v60 = vpop.f32.mrf.mxu1 }
 0x5d5   :  { %2312 = vmatpush.msra.mxu0 %v5191_v53  ;;  %2332 = vmatpush.msrb.mxu1 %v6535_v9  ;;  %v1831_v9 = vpop.f32.mrf.mxu2 }
 0x5d6   :  { %2352 = vmatpush.msrb.mxu2 %v5223_v12  ;;  %2372 = vmatpush.msrb.mxu3 %v6536_v50 }
 0x5d7   :  { %2313 = vmatpush.msra.mxu0 %v6537_v27  ;;  %2333 = vmatpush.msrb.mxu1 %v6538_v31 }
 0x5d8   :  { %2353 = vmatpush.msrb.mxu2 %v5230_v4  ;;  %2373 = vmatpush.msrb.mxu3 %v6539_v34 }
 0x5db   :  { %v5386_v23 = vpop.f32.mrf.mxu0  ;;  %v5390_v30 = vpop.f32.mrf.mxu3 }
 0x5dc   :  { %6546 = vst [vmem:[#allocation46_spill] sm:$0xff] %v5386_v23  ;;  %v5388_v53 = vpop.f32.mrf.mxu1 }
 0x5dd   :  { %6547 = vst [vmem:[#allocation49_spill] sm:$0xff] %v5388_v53  ;;  %v5396_v27 = vpop.f32.mrf.mxu2 }
 0x5de   :  { %6548 = vst [vmem:[#allocation48_spill] sm:$0xff] %v5390_v30 }
 0x5df   :  { %6551 = vst [vmem:[#allocation53_spill] sm:$0xff] %v5396_v27 }
 0x5e3   :  { %v5392_v12 = vpop.f32.mrf.mxu0  ;;  %v5398_v31 = vpop.f32.mrf.mxu3 }
 0x5e4   :  { %6549 = vst [vmem:[#allocation47_spill] sm:$0xff] %v5392_v12  ;;  %v5394_v50 = vpop.f32.mrf.mxu1 }
 0x5e5   :  { %6550 = vst [vmem:[#allocation50_spill] sm:$0xff] %v5394_v50  ;;  %v5404_v19 = vpop.f32.mrf.mxu2 }
 0x5e6   :  { %6552 = vst [vmem:[#allocation62_spill] sm:$0xff] %v5398_v31 }
 0x5e7   :  { %6555 = vst [vmem:[#allocation61_spill] sm:$0xff] %v5404_v19 }
 0x5eb   :  { %v5400_v4 = vpop.f32.mrf.mxu0  ;;  %v5406_v23 = vpop.f32.mrf.mxu3 }
 0x5ec   :  { %6553 = vst [vmem:[#allocation42_spill] sm:$0xff] %v5400_v4  ;;  %v5402_v34 = vpop.f32.mrf.mxu1 }
 0x5ed   :  { %6554 = vst [vmem:[#allocation69_spill] sm:$0xff] %v5402_v34  ;;  %v5412_v30 = vpop.f32.mrf.mxu2 }
 0x5ee   :  { %6556 = vst [vmem:[#allocation71_spill] sm:$0xff] %v5406_v23 }
 0x5ef   :  { %6559 = vst [vmem:[#allocation63_spill] sm:$0xff] %v5412_v30 }
 0x5f3   :  { %v5408_v53 = vpop.f32.mrf.mxu0  ;;  %v5414_v12 = vpop.f32.mrf.mxu3 }
 0x5f4   :  { %6557 = vst [vmem:[#allocation64_spill] sm:$0xff] %v5408_v53  ;;  %v5410_v40 = vpop.f32.mrf.mxu1 }
 0x5f5   :  { %6558 = vst [vmem:[#allocation73_spill] sm:$0xff] %v5410_v40  ;;  %v5420_v31 = vpop.f32.mrf.mxu2 }
 0x5f6   :  { %6560 = vst [vmem:[#allocation43_spill] sm:$0xff] %v5414_v12  ;;  %v1722_v12 = vld [vmem:[%s6001_s6] sm:$0xf] }
 0x5f7   :  { %6563 = vst [vmem:[#allocation68_spill] sm:$0xff] %v5420_v31  ;;  %v5441_v31 = vperm.slane %v1722_v12, 1  ;;  %v5449_v37 = vperm.slane %v1722_v12, 3 }
 0x5f9   :  { %6572 = vst [vmem:[#allocation19_spill] sm:$0xff] %v5441_v31  ;;  %v1873_v48 = vadd.f32 %v1872_v42, %v5449_v37 }
 0x5fa   :  { %6575 = vst [vmem:[#allocation27_spill] sm:$0xff] %v5449_v37 }
 0x5fb   :  { %v5416_v50 = vpop.f32.mrf.mxu0  ;;  %v5422_v4 = vpop.f32.mrf.mxu3 }
 0x5fc   :  { %6561 = vst [vmem:[#allocation65_spill] sm:$0xff] %v5416_v50  ;;  %v5418_v27 = vpop.f32.mrf.mxu1 }
 0x5fd   :  { %6562 = vst [vmem:[#allocation66_spill] sm:$0xff] %v5418_v27  ;;  %v5428_v23 = vpop.f32.mrf.mxu2  ;;  %v5439_v27 = vperm.slane %v1722_v12, 0 }
 0x5fe   :  { %6564 = vst [vmem:[#allocation74_spill] sm:$0xff] %v5422_v4 }
 0x5ff   :  { %6567 = vst [vmem:[#allocation52_spill] sm:$0xff] %v5428_v23 }
 0x600   :  { %6571 = vst [vmem:[#allocation72_spill] sm:$0xff] %v5439_v27 }
 0x603   :  { %v5424_v34 = vpop.f32.mrf.mxu0  ;;  %v5430_v53 = vpop.f32.mrf.mxu3 }
 0x604   :  { %6565 = vst [vmem:[#allocation18_spill] sm:$0xff] %v5424_v34  ;;  %v5426_v19 = vpop.f32.mrf.mxu1  ;;  %v1750_v34 = vadd.f32 %v1749_v1, %v5439_v27 }
 0x605   :  { %6566 = vst [vmem:[#allocation20_spill] sm:$0xff] %v5426_v19  ;;  %v1791_v19 = vadd.f32 %v1790_v60, %v5441_v31  ;;  %v5445_v4 = vpop.f32.mrf.mxu2 }
 0x606   :  { %6568 = vst [vmem:[#allocation44_spill] sm:$0xff] %v5430_v53 }
 0x607   :  { %6573 = vst [vmem:[#allocation17_spill] sm:$0xff] %v5445_v4 }
 0x62c   :  { %v5435_v40 = vpop.f32.mrf.mxu0  ;;  %v5437_v50 = vpop.f32.mrf.mxu1 }
 0x62d   :  { %6569 = vst [vmem:[#allocation67_spill] sm:$0xff] %v5435_v40 }
 0x62e   :  { %6570 = vst [vmem:[#allocation70_spill] sm:$0xff] %v5437_v50 }
 0x633   :  { %v5447_v23 = vpop.f32.mrf.mxu3  ;;  %v5452_v63 = vpop.f32.mrf.mxu2 }
 0x634   :  { %6574 = vst [vmem:[#allocation21_spill] sm:$0xff] %v5447_v23  ;;  %v2013_v53 = vpop.f32.mrf.mxu0  ;;  %v2033_v30 = vpop.f32.mrf.mxu1 }
 0x635   :  { %v2076_v57 = vadd.f32 %v2013_v53, %v1750_v34  ;;  %v2077_v24 = vadd.f32 %v2033_v30, %v1791_v19  ;;  %6576 = vst [vmem:[#allocation51_spill] sm:$0xff] %v5452_v63  ;;  %v5454_v53 = vperm.slane %v1722_v12, 2 }
 0x637   :  { %v3323_v40 = vmul.f32 -1.442695, %v2076_v57  ;;  %v3324_v50 = vmul.f32 -1.442695, %v2077_v24  ;;  %6577 = vst [vmem:[#allocation54_spill] sm:$0xff] %v5454_v53  ;;  %v1832_v57 = vadd.f32 %v1831_v9, %v5454_v53 }
 0x639   :  { %3489 = vpow2.f32 %v3323_v40 }
 0x63a   :  { %3491 = vpow2.f32 %v3324_v50 }
 0x63b   :  { %v2073_v1 = vpop.f32.mrf.mxu3  ;;  %v2053_v19 = vpop.f32.mrf.mxu2 }
 0x63c   :  { %v2079_v60 = vadd.f32 %v2073_v1, %v1873_v48  ;;  %v2078_v42 = vadd.f32 %v2053_v19, %v1832_v57 }
 0x63e   :  { %v3325_v31 = vmul.f32 -1.442695, %v2079_v60 }
 0x63f   :  { %v3490_v4 = vpop.eup %3489 }
 0x640   :  { %v3492_v27 = vpop.eup %3491  ;;  %v2083_v23 = vadd.f32 1.0, %v3490_v4  ;;  %3493 = vpow2.f32 %v3325_v31 }
 0x641   :  { %v2102_v13 = vadd.f32 1.0, %v3492_v27 }
 0x642   :  { %3495 = vrcp.f32 %v2083_v23  ;;  %v2095_v4 = vand.u32 2147483648, %v2083_v23  ;;  %v2093_v31 = vand.u32 2147483647, %v2083_v23  ;;  %vm2089_vm3 = vweird.f32 %v2083_v23 }
 0x643   :  { %3497 = vrcp.f32 %v2102_v13  ;;  %v2114_v27 = vand.u32 2147483648, %v2102_v13  ;;  %v2112_v37 = vand.u32 2147483647, %v2102_v13  ;;  %vm2108_vm4 = vweird.f32 %v2102_v13 }
 0x644   :  { %v2096_v19 = vor.u32 1.1754944e-38, %v2095_v4  ;;  %vm2094_vm6 = vcmp.eq.f32.partialorder %v2093_v31, 8.507059e+37 }
 0x645   :  { %v2115_v53 = vor.u32 1.1754944e-38, %v2114_v27  ;;  %vm2113_vm8 = vcmp.eq.f32.partialorder %v2112_v37, 8.507059e+37 }
 0x646   :  { %v3494_v24 = vpop.eup %3493 }
 0x647   :  { %v2122_v40 = vadd.f32 1.0, %v3494_v24 }
 0x648   :  { %v3496_v30 = vpop.eup %3495 }
 0x649   :  { %v3498_v50 = vpop.eup %3497  ;;  %v2085_v34 = vmul.f32 %v3496_v30, %v2083_v23  ;;  %3499 = vrcp.f32 %v2122_v40  ;;  %vm2090_vm1 = vweird.f32 %v3496_v30  ;;  %vm2128_vm10 = vweird.f32 %v2122_v40 }
 0x64a   :  { %v2104_v48 = vmul.f32 %v3498_v50, %v2102_v13  ;;  %3501 = vtanh.f32 %v2078_v42  ;;  %vm2109_vm2 = vweird.f32 %v3498_v50  ;;  %vm2091_vm5 = vmor %vm2089_vm3, %vm2090_vm1  ;;  %v2132_v23 = vand.u32 2147483647, %v2122_v40 }
 0x64b   :  { %v2086_v1 = vsub.f32 1.0, %v2085_v34  ;;  %vm2110_vm7 = vmor %vm2108_vm4, %vm2109_vm2 }
 0x64c   :  { %v2105_v60 = vsub.f32 1.0, %v2104_v48  ;;  %vm2133_vm12 = vcmp.eq.f32.partialorder %v2132_v23, 8.507059e+37 }
 0x64d   :  { %v2087_v12 = vmul.f32 %v3496_v30, %v2086_v1 }
 0x64e   :  { %v2106_v63 = vmul.f32 %v3498_v50, %v2105_v60 }
 0x64f   :  { %v3500_v45 = vpop.eup %3499  ;;  %v2088_v9 = vadd.f32 %v3496_v30, %v2087_v12 }
 0x650   :  { %v2107_v24 = vadd.f32 %v3498_v50, %v2106_v63  ;;  %v2124_v57 = vmul.f32 %v3500_v45, %v2122_v40  ;;  %v3502_v42 = vpop.eup %3501  ;;  %vm2129_vm9 = vweird.f32 %v3500_v45  ;;  %v2134_v63 = vand.u32 2147483648, %v2122_v40 }
 0x651   :  { %v2092_v34 = vsel %vm2091_vm5, %v3496_v30, %v2088_v9  ;;  %vm2130_vm11 = vmor %vm2128_vm10, %vm2129_vm9 }
 0x652   :  { %v2097_v48 = vsel %vm2094_vm6, %v2096_v19, %v2092_v34  ;;  %v2111_v1 = vsel %vm2110_vm7, %v3498_v50, %v2107_v24  ;;  %v2125_v17 = vsub.f32 1.0, %v2124_v57  ;;  %v2135_v4 = vor.u32 1.1754944e-38, %v2134_v63  ;;  %v6610_v34 = vld [vmem:[#allocation54_spill] sm:$0xff] }
 0x653   :  { %v2116_v60 = vsel %vm2113_vm8, %v2115_v53, %v2111_v1  ;;  %v2139_v16 = vmul.f32 %v3502_v42, %v2097_v48  ;;  %v6611_v42 = vld [vmem:[#allocation53_spill] sm:$0xff] }
 0x654   :  { %v2138_v6 = vmul.f32 0.0, %v2116_v60  ;;  %v2126_v8 = vmul.f32 %v3500_v45, %v2125_v17  ;;  %v1835_v48 = vadd.f32 %v6611_v42, %v6610_v34  ;;  %v5593_v42 = vld [vmem:[#allocation9 + $0x178] sm:$0xff] }
 0x656   :  { %v5457_v12 = vadd.f32 %v2139_v16, %v2138_v6  ;;  %v2127_v13 = vadd.f32 %v3500_v45, %v2126_v8  ;;  %v6607_v6 = vld [vmem:[#allocation49_spill] sm:$0xff] }
 0x658   :  { %3503 = vtanh.f32 %v5457_v12  ;;  %v2131_v30 = vsel %vm2130_vm11, %v3500_v45, %v2127_v13 }
 0x659   :  { %v2136_v37 = vsel %vm2133_vm12, %v2135_v4, %v2131_v30 }
 0x65e   :  { %v3504_v50 = vpop.eup %3503 }
 0x65f   :  { %v2142_v27 = vmul.f32 %v3504_v50, %v2136_v37 }
 0x661   :  { %2163 = vmatmul.f32.vlgmr.msrb.gmra.mxu0 %v2142_v27  ;;  %2183 = vmatmul.f32.vlgmr.msra.gmra.mxu1 %v2142_v27 }
 0x662   :  { %2203 = vmatmul.f32.vlgmr.msra.gmra.mxu2 %v2142_v27  ;;  %2223 = vmatmul.f32.vlgmr.msra.gmra.mxu3 %v2142_v27 }
 0x663   :  { %2449 = vmatpush.msrb.mxu0 %v6540_v38  ;;  %2469 = vmatpush.msra.mxu1 %v5013_v47  ;;  %v6578_v47 = vld [vmem:[#allocation25_spill] sm:$0xff] }
 0x664   :  { %2489 = vmatpush.msra.mxu2 %v5047_v22  ;;  %2509 = vmatpush.msra.mxu3 %v5021_v3  ;;  %v6580_v3 = vld [vmem:[#allocation56_spill] sm:$0xff] }
 0x665   :  { %2450 = vmatpush.msrb.mxu0 %v5015_v28  ;;  %2470 = vmatpush.msra.mxu1 %v6541_v20  ;;  %v6579_v28 = vld [vmem:[#allocation57_spill] sm:$0xff]  ;;  %v6582_v22 = vld [vmem:[#allocation24_spill] sm:$0xff]  ;;  %v6608_v20 = vld [vmem:[#allocation27_spill] sm:$0xff] }
 0x666   :  { %2490 = vmatpush.msra.mxu2 %v5050_v11  ;;  %2510 = vmatpush.msra.mxu3 %v6542_v2  ;;  %v6583_v11 = vld [vmem:[#allocation58_spill] sm:$0xff]  ;;  %v6609_v2 = vld [vmem:[#allocation48_spill] sm:$0xff] }
 0x667   :  { %2451 = vmatpush.msrb.mxu0 %v5024_v26  ;;  %2471 = vmatpush.msra.mxu1 %v6543_v14  ;;  %v6581_v26 = vld [vmem:[#allocation55_spill] sm:$0xff]  ;;  %v1876_v14 = vadd.f32 %v6609_v2, %v6608_v20  ;;  %v5560_v2 = vld [vmem:[#allocation9 + $0x1a0] sm:$0xff] }
 0x668   :  { %2491 = vmatpush.msra.mxu2 %v5055_v35  ;;  %2511 = vmatpush.msra.mxu3 %v6544_v39  ;;  %v6584_v35 = vld [vmem:[#allocation60_spill] sm:$0xff] }
 0x669   :  { %2452 = vmatpush.msrb.mxu0 %v6545_v54  ;;  %2472 = vmatpush.msra.mxu1 %v5059_v25  ;;  %v6585_v25 = vld [vmem:[#allocation59_spill] sm:$0xff] }
 0x66a   :  { %2492 = vmatpush.msra.mxu2 %v5071_v32  ;;  %2512 = vmatpush.msra.mxu3 %v5069_v21  ;;  %v6588_v21 = vld [vmem:[#allocation23_spill] sm:$0xff]  ;;  %v6589_v32 = vld [vmem:[#allocation22_spill] sm:$0xff] }
 0x66b   :  { %2453 = vmatpush.msrb.mxu0 %v5062_v46  ;;  %2473 = vmatpush.msra.mxu1 %v5067_v33  ;;  %v6586_v46 = vld [vmem:[#allocation28_spill] sm:$0xff]  ;;  %v6587_v33 = vld [vmem:[#allocation31_spill] sm:$0xff] }
 0x66c   :  { %2493 = vmatpush.msra.mxu2 %v5079_v15  ;;  %2513 = vmatpush.msra.mxu3 %v5077_v51  ;;  %v6590_v51 = vld [vmem:[#allocation32_spill] sm:$0xff]  ;;  %v6591_v15 = vld [vmem:[#allocation35_spill] sm:$0xff] }
 0x66d   :  { %2454 = vmatpush.msrb.mxu0 %v5087_v41  ;;  %2474 = vmatpush.msra.mxu1 %v5089_v43  ;;  %v6592_v41 = vld [vmem:[#allocation29_spill] sm:$0xff]  ;;  %v6593_v43 = vld [vmem:[#allocation26_spill] sm:$0xff] }
 0x66e   :  { %2494 = vmatpush.msra.mxu2 %v5095_v49  ;;  %2514 = vmatpush.msra.mxu3 %v5091_v44  ;;  %v6594_v44 = vld [vmem:[#allocation34_spill] sm:$0xff] }
 0x66f   :  { %2455 = vmatpush.msrb.mxu0 %v5097_v5  ;;  %2475 = vmatpush.msra.mxu1 %v5099_v7  ;;  %v6595_v49 = vld [vmem:[#allocation30_spill] sm:$0xff]  ;;  %v6597_v7 = vld [vmem:[#allocation33_spill] sm:$0xff] }
 0x670   :  { %2495 = vmatpush.msra.mxu2 %v5107_v56  ;;  %2515 = vmatpush.msra.mxu3 %v5102_v36  ;;  %v6596_v5 = vld [vmem:[#allocation38_spill] sm:$0xff]  ;;  %v6598_v36 = vld [vmem:[#allocation39_spill] sm:$0xff]  ;;  %v6599_v56 = vld [vmem:[#allocation36_spill] sm:$0xff] }
 0x671   :  { %2456 = vmatpush.msrb.mxu0 %v5109_v58  ;;  %2476 = vmatpush.msra.mxu1 %v5111_v62  ;;  %v6600_v58 = vld [vmem:[#allocation40_spill] sm:$0xff]  ;;  %v6601_v62 = vld [vmem:[#allocation37_spill] sm:$0xff] }
 0x672   :  { %2496 = vmatpush.msra.mxu2 %v5141_v18  ;;  %2516 = vmatpush.msra.mxu3 %v5121_v29  ;;  %v6604_v29 = vld [vmem:[#allocation72_spill] sm:$0xff] }
 0x673   :  { %2457 = vmatpush.msrb.mxu0 %v5117_v52  ;;  %2477 = vmatpush.msra.mxu1 %v5119_v0  ;;  %v6602_v52 = vld [vmem:[#allocation45_spill] sm:$0xff] }
 0x674   :  { %2497 = vmatpush.msra.mxu2 %v5147_v59  ;;  %2517 = vmatpush.msra.mxu3 %v5128_v10  ;;  %v6603_v0 = vld [vmem:[#allocation41_spill] sm:$0xff]  ;;  %v6606_v10 = vld [vmem:[#allocation19_spill] sm:$0xff] }
 0x675   :  { %2458 = vmatpush.msrb.mxu0 %v5124_v55  ;;  %2478 = vmatpush.msra.mxu1 %v5126_v61  ;;  %v6605_v55 = vld [vmem:[#allocation46_spill] sm:$0xff]  ;;  %v1794_v16 = vadd.f32 %v6607_v6, %v6606_v10 }
 0x676   :  { %2498 = vmatpush.msra.mxu2 %v6578_v47  ;;  %2518 = vmatpush.msra.mxu3 %v6579_v28  ;;  %v1753_v61 = vadd.f32 %v6605_v55, %v6604_v29 }
 0x677   :  { %2459 = vmatpush.msrb.mxu0 %v6580_v3  ;;  %2479 = vmatpush.msra.mxu1 %v6581_v26 }
 0x678   :  { %2499 = vmatpush.msra.mxu2 %v6582_v22  ;;  %2519 = vmatpush.msra.mxu3 %v6583_v11 }
 0x679   :  { %2460 = vmatpush.msrb.mxu0 %v6584_v35  ;;  %2480 = vmatpush.msra.mxu1 %v6585_v25 }
 0x67a   :  { %2500 = vmatpush.msra.mxu2 %v6586_v46  ;;  %2520 = vmatpush.msra.mxu3 %v6587_v33 }
 0x67b   :  { %2461 = vmatpush.msrb.mxu0 %v6588_v21  ;;  %2481 = vmatpush.msra.mxu1 %v6589_v32 }
 0x67c   :  { %2501 = vmatpush.msra.mxu2 %v6590_v51  ;;  %2521 = vmatpush.msra.mxu3 %v6591_v15 }
 0x67d   :  { %2462 = vmatpush.msrb.mxu0 %v6592_v41  ;;  %2482 = vmatpush.msra.mxu1 %v6593_v43 }
 0x67e   :  { %2502 = vmatpush.msra.mxu2 %v6594_v44  ;;  %2522 = vmatpush.msra.mxu3 %v6595_v49 }
 0x67f   :  { %2463 = vmatpush.msrb.mxu0 %v6596_v5  ;;  %2483 = vmatpush.msra.mxu1 %v6597_v7 }
 0x680   :  { %2503 = vmatpush.msra.mxu2 %v6598_v36  ;;  %2523 = vmatpush.msra.mxu3 %v6599_v56 }
 0x681   :  { %2464 = vmatpush.msrb.mxu0 %v6600_v58  ;;  %2484 = vmatpush.msra.mxu1 %v6601_v62 }
 0x682   :  { %2504 = vmatpush.msra.mxu2 %v6602_v52  ;;  %2524 = vmatpush.msra.mxu3 %v6603_v0 }
 0x6de   :  { %v2164_v17 = vpop.f32.mrf.mxu0  ;;  %v2184_v18 = vpop.f32.mrf.mxu1 }
 0x6df   :  { %v2227_v59 = vadd.f32 %v2164_v17, %v1753_v61  ;;  %v2228_v8 = vadd.f32 %v2184_v18, %v1794_v16  ;;  %v5539_v16 = vld [vmem:[#allocation9 + $0x1e8] sm:$0xff]  ;;  %v5542_v17 = vld [vmem:[#allocation9 + $0x1f0] sm:$0xff]  ;;  %v5545_v18 = vld [vmem:[#allocation9 + $0x1f8] sm:$0xff] }
 0x6e1   :  { %v3326_v45 = vmul.f32 -1.442695, %v2227_v59  ;;  %v3327_v38 = vmul.f32 -1.442695, %v2228_v8  ;;  %v5548_v59 = vld [vmem:[#allocation9 + $0x1c0] sm:$0xff]  ;;  %v5551_v8 = vld [vmem:[#allocation9 + $0x1c8] sm:$0xff] }
 0x6e3   :  { %3505 = vpow2.f32 %v3326_v45  ;;  %v5554_v45 = vld [vmem:[#allocation9 + $0x1d0] sm:$0xff] }
 0x6e4   :  { %3507 = vpow2.f32 %v3327_v38  ;;  %v5557_v38 = vld [vmem:[#allocation9 + $0x1d8] sm:$0xff] }
 0x6e5   :  { %v2224_v39 = vpop.f32.mrf.mxu3  ;;  %v2204_v24 = vpop.f32.mrf.mxu2 }
 0x6e6   :  { %v2230_v54 = vadd.f32 %v2224_v39, %v1876_v14  ;;  %v2229_v13 = vadd.f32 %v2204_v24, %v1835_v48  ;;  %v5563_v14 = vld [vmem:[#allocation9 + $0x1a8] sm:$0xff]  ;;  %v5566_v39 = vld [vmem:[#allocation9 + $0x1b0] sm:$0xff]  ;;  %v5596_v48 = vld [vmem:[#allocation9 + $0x140] sm:$0xff] }
 0x6e7   :  { %v5587_v24 = vld [vmem:[#allocation9 + $0x168] sm:$0xff] }
 0x6e8   :  { %v3328_v53 = vmul.f32 -1.442695, %v2230_v54  ;;  %v5569_v54 = vld [vmem:[#allocation9 + $0x1b8] sm:$0xff] }
 0x6e9   :  { %v3506_v40 = vpop.eup %3505 }
 0x6ea   :  { %v3508_v31 = vpop.eup %3507  ;;  %v2234_v9 = vadd.f32 1.0, %v3506_v40  ;;  %3509 = vpow2.f32 %v3328_v53  ;;  %v5572_v53 = vld [vmem:[#allocation9 + $0x180] sm:$0xff]  ;;  %v5575_v40 = vld [vmem:[#allocation9 + $0x188] sm:$0xff] }
 0x6eb   :  { %v2253_v19 = vadd.f32 1.0, %v3508_v31  ;;  %v5578_v31 = vld [vmem:[#allocation9 + $0x190] sm:$0xff] }
 0x6ec   :  { %3511 = vrcp.f32 %v2234_v9  ;;  %v2246_v37 = vand.u32 2147483648, %v2234_v9  ;;  %v2244_v28 = vand.u32 2147483647, %v2234_v9  ;;  %vm2240_vm15 = vweird.f32 %v2234_v9 }
 0x6ed   :  { %3513 = vrcp.f32 %v2253_v19  ;;  %v2265_v27 = vand.u32 2147483648, %v2253_v19  ;;  %v2263_v26 = vand.u32 2147483647, %v2253_v19  ;;  %vm2259_vm0 = vweird.f32 %v2253_v19 }
 0x6ee   :  { %v2247_v35 = vor.u32 1.1754944e-38, %v2246_v37  ;;  %vm2245_vm3 = vcmp.eq.f32.partialorder %v2244_v28, 8.507059e+37  ;;  %v5623_v37 = vld [vmem:[#allocation9 + $0x108] sm:$0xff]  ;;  %v5632_v28 = vld [vmem:[#allocation9 + $0xe0] sm:$0xff] }
 0x6ef   :  { %v2266_v33 = vor.u32 1.1754944e-38, %v2265_v27  ;;  %vm2264_vm4 = vcmp.eq.f32.partialorder %v2263_v26, 8.507059e+37  ;;  %v5626_v27 = vld [vmem:[#allocation9 + $0x110] sm:$0xff] }
 0x6f0   :  { %v3510_v57 = vpop.eup %3509  ;;  %v5638_v26 = vld [vmem:[#allocation9 + $0xf0] sm:$0xff] }
 0x6f1   :  { %v2273_v1 = vadd.f32 1.0, %v3510_v57  ;;  %v5590_v57 = vld [vmem:[#allocation9 + $0x170] sm:$0xff] }
 0x6f2   :  { %v3512_v60 = vpop.eup %3511 }
 0x6f3   :  { %v3514_v63 = vpop.eup %3513  ;;  %v2236_v23 = vmul.f32 %v3512_v60, %v2234_v9  ;;  %3515 = vrcp.f32 %v2273_v1  ;;  %vm2241_vm13 = vweird.f32 %v3512_v60  ;;  %v2285_v56 = vand.u32 2147483648, %v2273_v1  ;;  %v5581_v9 = vld [vmem:[#allocation9 + $0x198] sm:$0xff] }
 0x6f4   :  { %v2255_v30 = vmul.f32 %v3514_v63, %v2253_v19  ;;  %3517 = vtanh.f32 %v2229_v13  ;;  %vm2260_vm14 = vweird.f32 %v3514_v63  ;;  %vm2242_vm1 = vmor %vm2240_vm15, %vm2241_vm13  ;;  %vm2279_vm6 = vweird.f32 %v2273_v1  ;;  %v5584_v19 = vld [vmem:[#allocation9 + $0x160] sm:$0xff]  ;;  %v5605_v13 = vld [vmem:[#allocation9 + $0x158] sm:$0xff] }
 0x6f5   :  { %v2237_v4 = vsub.f32 1.0, %v2236_v23  ;;  %vm2261_vm2 = vmor %vm2259_vm0, %vm2260_vm14  ;;  %v2283_v58 = vand.u32 2147483647, %v2273_v1  ;;  %v2286_v0 = vor.u32 1.1754944e-38, %v2285_v56  ;;  %v5611_v23 = vld [vmem:[#allocation9 + $0x128] sm:$0xff]  ;;  %v5689_v56 = vld [vmem:[#allocation9 + $0x78] sm:$0xff] }
 0x6f6   :  { %v2256_v50 = vsub.f32 1.0, %v2255_v30  ;;  %v5614_v30 = vld [vmem:[#allocation9 + $0x130] sm:$0xff]  ;;  %6625 = vst [vmem:[#allocation35_spill] sm:$0xff] %v5689_v56 }
 0x6f7   :  { %v2238_v47 = vmul.f32 %v3512_v60, %v2237_v4  ;;  %vm2284_vm8 = vcmp.eq.f32.partialorder %v2283_v58, 8.507059e+37  ;;  %v5617_v4 = vld [vmem:[#allocation9 + $0x138] sm:$0xff]  ;;  %v5692_v58 = vld [vmem:[#allocation9 + $0x40] sm:$0xff] }
 0x6f8   :  { %v2257_v3 = vmul.f32 %v3514_v63, %v2256_v50  ;;  %v5620_v50 = vld [vmem:[#allocation9 + $0x100] sm:$0xff]  ;;  %6626 = vst [vmem:[#allocation29_spill] sm:$0xff] %v5692_v58 }
 0x6f9   :  { %v3516_v22 = vpop.eup %3515  ;;  %v2239_v11 = vadd.f32 %v3512_v60, %v2238_v47  ;;  %v5629_v47 = vld [vmem:[#allocation9 + $0x118] sm:$0xff] }
 0x6fa   :  { %v2258_v25 = vadd.f32 %v3514_v63, %v2257_v3  ;;  %v2275_v46 = vmul.f32 %v3516_v22, %v2273_v1  ;;  %v3518_v32 = vpop.eup %3517  ;;  %vm2280_vm5 = vweird.f32 %v3516_v22  ;;  %v5599_v1 = vld [vmem:[#allocation9 + $0x148] sm:$0xff] }
 0x6fb   :  { %v2243_v21 = vsel %vm2242_vm1, %v3512_v60, %v2239_v11  ;;  %vm2281_vm7 = vmor %vm2279_vm6, %vm2280_vm5  ;;  %v5602_v60 = vld [vmem:[#allocation9 + $0x150] sm:$0xff]  ;;  %v5635_v3 = vld [vmem:[#allocation9 + $0xe8] sm:$0xff] }
 0x6fc   :  { %v2248_v51 = vsel %vm2245_vm3, %v2247_v35, %v2243_v21  ;;  %v2262_v15 = vsel %vm2261_vm2, %v3514_v63, %v2258_v25  ;;  %v2276_v41 = vsub.f32 1.0, %v2275_v46  ;;  %v5608_v63 = vld [vmem:[#allocation9 + $0x120] sm:$0xff]  ;;  %v5647_v35 = vld [vmem:[#allocation9 + $0xc8] sm:$0xff]  ;;  %v5650_v25 = vld [vmem:[#allocation9 + $0xd0] sm:$0xff] }
 0x6fd   :  { %v2267_v43 = vsel %vm2264_vm4, %v2266_v33, %v2262_v15  ;;  %v2290_v44 = vmul.f32 %v3518_v32, %v2248_v51  ;;  %v5644_v11 = vld [vmem:[#allocation9 + $0xc0] sm:$0xff]  ;;  %6612 = vst [vmem:[#allocation25_spill] sm:$0xff] %v5650_v25  ;;  %v5653_v46 = vld [vmem:[#allocation9 + $0xd8] sm:$0xff]  ;;  %v5659_v21 = vld [vmem:[#allocation9 + $0xa8] sm:$0xff] }
 0x6fe   :  { %v2289_v49 = vmul.f32 %v2267_v43, %v5457_v12  ;;  %v2277_v5 = vmul.f32 %v3516_v22, %v2276_v41  ;;  %v5536_v12 = vld [vmem:[#allocation9 + $0x1e0] sm:$0xff]  ;;  %6613 = vst [vmem:[#allocation57_spill] sm:$0xff] %v5653_v46  ;;  %v5662_v32 = vld [vmem:[#allocation9 + $0xb0] sm:$0xff]  ;;  %v5665_v51 = vld [vmem:[#allocation9 + $0xb8] sm:$0xff] }
 0x6ff   :  { %v5656_v33 = vld [vmem:[#allocation9 + $0xa0] sm:$0xff]  ;;  %6615 = vst [vmem:[#allocation55_spill] sm:$0xff] %v5659_v21  ;;  %v5671_v41 = vld [vmem:[#allocation9 + $0x88] sm:$0xff]  ;;  %v5674_v43 = vld [vmem:[#allocation9 + $0x90] sm:$0xff] }
 0x700   :  { %v5533_v7 = vadd.f32 %v2290_v44, %v2289_v49  ;;  %v2278_v36 = vadd.f32 %v3516_v22, %v2277_v5  ;;  %6614 = vst [vmem:[#allocation56_spill] sm:$0xff] %v5656_v33  ;;  %v5668_v15 = vld [vmem:[#allocation9 + $0x80] sm:$0xff]  ;;  %v5677_v44 = vld [vmem:[#allocation9 + $0x98] sm:$0xff]  ;;  %v5683_v5 = vld [vmem:[#allocation9 + $0x68] sm:$0xff] }
 0x701   :  { %6616 = vst [vmem:[#allocation24_spill] sm:$0xff] %v5662_v32  ;;  %v5680_v49 = vld [vmem:[#allocation9 + $0x60] sm:$0xff] }
 0x702   :  { %3519 = vtanh.f32 %v5533_v7  ;;  %v2282_v62 = vsel %vm2281_vm7, %v3516_v22, %v2278_v36  ;;  %v5641_v22 = vld [vmem:[#allocation9 + $0xf8] sm:$0xff]  ;;  %6617 = vst [vmem:[#allocation58_spill] sm:$0xff] %v5665_v51  ;;  %v5686_v36 = vld [vmem:[#allocation9 + $0x70] sm:$0xff] }
 0x703   :  { %v2287_v61 = vsel %vm2284_vm8, %v2286_v0, %v2282_v62  ;;  %6618 = vst [vmem:[#allocation60_spill] sm:$0xff] %v5668_v15  ;;  %v5695_v62 = vld [vmem:[#allocation9 + $0x48] sm:$0xff]  ;;  %v5698_v0 = vld [vmem:[#allocation9 + $0x50] sm:$0xff] }
 0x704   :  { %6619 = vst [vmem:[#allocation59_spill] sm:$0xff] %v5671_v41 }
 0x705   :  { %6620 = vst [vmem:[#allocation28_spill] sm:$0xff] %v5674_v43 }
 0x706   :  { %6621 = vst [vmem:[#allocation31_spill] sm:$0xff] %v5677_v44 }
 0x707   :  { %6622 = vst [vmem:[#allocation23_spill] sm:$0xff] %v5680_v49 }
 0x708   :  { %v3520_v55 = vpop.eup %3519  ;;  %6623 = vst [vmem:[#allocation22_spill] sm:$0xff] %v5683_v5 }
 0x709   :  { %v2293_v6 = vmul.f32 %v3520_v55, %v2287_v61  ;;  %6624 = vst [vmem:[#allocation32_spill] sm:$0xff] %v5686_v36  ;;  %v5701_v55 = vld [vmem:[#allocation9 + $0x58] sm:$0xff]  ;;  %v5704_v61 = vld [vmem:[#allocation9 + $0x20] sm:$0xff] }
 0x70a   :  { %6627 = vst [vmem:[#allocation26_spill] sm:$0xff] %v5695_v62 }
 0x70b   :  { %2314 = vmatmul.f32.vlgmr.msra.gmra.mxu0 %v2293_v6  ;;  %2334 = vmatmul.f32.vlgmr.msrb.gmra.mxu1 %v2293_v6  ;;  %6628 = vst [vmem:[#allocation34_spill] sm:$0xff] %v5698_v0 }
 0x70c   :  { %2354 = vmatmul.f32.vlgmr.msrb.gmra.mxu2 %v2293_v6  ;;  %2374 = vmatmul.f32.vlgmr.msrb.gmra.mxu3 %v2293_v6  ;;  %6629 = vst [vmem:[#allocation30_spill] sm:$0xff] %v5701_v55  ;;  %v5707_v6 = vld [vmem:[#allocation9 + $0x28] sm:$0xff] }
 0x70d   :  { %2600 = vmatpush.msra.mxu0 %v5536_v12  ;;  %2620 = vmatpush.msrb.mxu1 %v5539_v16  ;;  %6630 = vst [vmem:[#allocation38_spill] sm:$0xff] %v5704_v61 }
 0x70e   :  { %2640 = vmatpush.msrb.mxu2 %v5542_v17  ;;  %2660 = vmatpush.msrb.mxu3 %v5545_v18  ;;  %6631 = vst [vmem:[#allocation33_spill] sm:$0xff] %v5707_v6 }
 0x70f   :  { %2601 = vmatpush.msra.mxu0 %v5548_v59  ;;  %2621 = vmatpush.msrb.mxu1 %v5551_v8 }
 0x710   :  { %2641 = vmatpush.msrb.mxu2 %v5554_v45  ;;  %2661 = vmatpush.msrb.mxu3 %v5557_v38 }
 0x711   :  { %2602 = vmatpush.msra.mxu0 %v5560_v2  ;;  %2622 = vmatpush.msrb.mxu1 %v5563_v14 }
 0x712   :  { %2642 = vmatpush.msrb.mxu2 %v5566_v39  ;;  %2662 = vmatpush.msrb.mxu3 %v5569_v54 }
 0x713   :  { %2603 = vmatpush.msra.mxu0 %v5572_v53  ;;  %2623 = vmatpush.msrb.mxu1 %v5575_v40 }
 0x714   :  { %2643 = vmatpush.msrb.mxu2 %v5578_v31  ;;  %2663 = vmatpush.msrb.mxu3 %v5581_v9 }
 0x715   :  { %2604 = vmatpush.msra.mxu0 %v5584_v19  ;;  %2624 = vmatpush.msrb.mxu1 %v5587_v24 }
 0x716   :  { %2644 = vmatpush.msrb.mxu2 %v5590_v57  ;;  %2664 = vmatpush.msrb.mxu3 %v5593_v42 }
 0x717   :  { %2605 = vmatpush.msra.mxu0 %v5596_v48  ;;  %2625 = vmatpush.msrb.mxu1 %v5599_v1 }
 0x718   :  { %2645 = vmatpush.msrb.mxu2 %v5602_v60  ;;  %2665 = vmatpush.msrb.mxu3 %v5605_v13 }
 0x719   :  { %2606 = vmatpush.msra.mxu0 %v5608_v63  ;;  %2626 = vmatpush.msrb.mxu1 %v5611_v23 }
 0x71a   :  { %2646 = vmatpush.msrb.mxu2 %v5614_v30  ;;  %2666 = vmatpush.msrb.mxu3 %v5617_v4 }
 0x71b   :  { %2607 = vmatpush.msra.mxu0 %v5620_v50  ;;  %2627 = vmatpush.msrb.mxu1 %v5623_v37 }
 0x71c   :  { %2647 = vmatpush.msrb.mxu2 %v5626_v27  ;;  %2667 = vmatpush.msrb.mxu3 %v5629_v47 }
 0x71d   :  { %2608 = vmatpush.msra.mxu0 %v5632_v28  ;;  %2628 = vmatpush.msrb.mxu1 %v5635_v3 }
 0x71e   :  { %2648 = vmatpush.msrb.mxu2 %v5638_v26  ;;  %2668 = vmatpush.msrb.mxu3 %v5641_v22 }
 0x71f   :  { %2609 = vmatpush.msra.mxu0 %v5644_v11  ;;  %2629 = vmatpush.msrb.mxu1 %v5647_v35 }
 0x720   :  { %2649 = vmatpush.msrb.mxu2 %v5650_v25  ;;  %2669 = vmatpush.msrb.mxu3 %v5653_v46 }
 0x721   :  { %2610 = vmatpush.msra.mxu0 %v5656_v33  ;;  %2630 = vmatpush.msrb.mxu1 %v5659_v21 }
 0x722   :  { %2650 = vmatpush.msrb.mxu2 %v5662_v32  ;;  %2670 = vmatpush.msrb.mxu3 %v5665_v51 }
 0x723   :  { %2611 = vmatpush.msra.mxu0 %v5668_v15  ;;  %2631 = vmatpush.msrb.mxu1 %v5671_v41 }
 0x724   :  { %2651 = vmatpush.msrb.mxu2 %v5674_v43  ;;  %2671 = vmatpush.msrb.mxu3 %v5677_v44 }
 0x725   :  { %2612 = vmatpush.msra.mxu0 %v5680_v49  ;;  %2632 = vmatpush.msrb.mxu1 %v5683_v5 }
 0x726   :  { %2652 = vmatpush.msrb.mxu2 %v5686_v36  ;;  %2672 = vmatpush.msrb.mxu3 %v5689_v56  ;;  %v6638_v56 = vld [vmem:[#allocation50_spill] sm:$0xff] }
 0x727   :  { %2613 = vmatpush.msra.mxu0 %v5692_v58  ;;  %2633 = vmatpush.msrb.mxu1 %v5695_v62  ;;  %v5710_v58 = vld [vmem:[#allocation9 + $0x30] sm:$0xff]  ;;  %v5713_v62 = vld [vmem:[#allocation9 + $0x38] sm:$0xff] }
 0x728   :  { %2653 = vmatpush.msrb.mxu2 %v5698_v0  ;;  %2673 = vmatpush.msrb.mxu3 %v5701_v55  ;;  %6632 = vst [vmem:[#allocation39_spill] sm:$0xff] %v5710_v58  ;;  %v5716_v0 = vld [vmem:[#allocation9] sm:$0xff]  ;;  %v5719_v55 = vld [vmem:[#allocation9 + $0x8] sm:$0xff] }
 0x729   :  { %2614 = vmatpush.msra.mxu0 %v5704_v61  ;;  %2634 = vmatpush.msrb.mxu1 %v5707_v6  ;;  %6633 = vst [vmem:[#allocation36_spill] sm:$0xff] %v5713_v62  ;;  %v5723_v61 = vld [vmem:[#allocation9 + $0x18] sm:$0xff] }
 0x72a   :  { %2654 = vmatpush.msrb.mxu2 %v5710_v58  ;;  %2674 = vmatpush.msrb.mxu3 %v5713_v62  ;;  %6634 = vst [vmem:[#allocation40_spill] sm:$0xff] %v5716_v0  ;;  %v6637_v58 = vld [vmem:[#allocation47_spill] sm:$0xff]  ;;  %v1797_v62 = vadd.f32 %v6638_v56, %v6606_v10 }
 0x72b   :  { %2615 = vmatpush.msra.mxu0 %v5716_v0  ;;  %6635 = vst [vmem:[#allocation37_spill] sm:$0xff] %v5719_v55  ;;  %2635 = vmatpush.msrb.mxu1 %v5719_v55  ;;  %v1756_v6 = vadd.f32 %v6637_v58, %v6604_v29  ;;  %v6639_v55 = vld [vmem:[#allocation62_spill] sm:$0xff] }
 0x72c   :  { %2655 = vmatpush.msrb.mxu2 %v6602_v52  ;;  %6636 = vst [vmem:[#allocation45_spill] sm:$0xff] %v5723_v61  ;;  %2675 = vmatpush.msrb.mxu3 %v5723_v61  ;;  %v1879_v52 = vadd.f32 %v6639_v55, %v6608_v20 }
 0x788   :  { %v2315_v36 = vpop.f32.mrf.mxu0  ;;  %v2335_v5 = vpop.f32.mrf.mxu1 }
 0x789   :  { %v2378_v49 = vadd.f32 %v2315_v36, %v1756_v6  ;;  %v2379_v0 = vadd.f32 %v2335_v5, %v1797_v62 }
 0x78b   :  { %v3329_v44 = vmul.f32 -1.442695, %v2378_v49  ;;  %v3330_v43 = vmul.f32 -1.442695, %v2379_v0  ;;  %v6640_v49 = vld [vmem:[#allocation61_spill] sm:$0xff] }
 0x78c   :  { %v1838_v5 = vadd.f32 %v6640_v49, %v6610_v34 }
 0x78d   :  { %3521 = vpow2.f32 %v3329_v44 }
 0x78e   :  { %3523 = vpow2.f32 %v3330_v43 }
 0x78f   :  { %v2375_v41 = vpop.f32.mrf.mxu3  ;;  %v2355_v56 = vpop.f32.mrf.mxu2 }
 0x790   :  { %v2381_v15 = vadd.f32 %v2375_v41, %v1879_v52  ;;  %v2380_v0 = vadd.f32 %v2355_v56, %v1838_v5 }
 0x792   :  { %v3331_v61 = vmul.f32 -1.442695, %v2381_v15 }
 0x793   :  { %v3522_v51 = vpop.eup %3521 }
 0x794   :  { %v3524_v32 = vpop.eup %3523  ;;  %v2385_v58 = vadd.f32 1.0, %v3522_v51  ;;  %3525 = vpow2.f32 %v3331_v61 }
 0x795   :  { %v2404_v29 = vadd.f32 1.0, %v3524_v32 }
 0x796   :  { %3527 = vrcp.f32 %v2385_v58  ;;  %v2397_v52 = vand.u32 2147483648, %v2385_v58  ;;  %v2395_v61 = vand.u32 2147483647, %v2385_v58  ;;  %vm2391_vm11 = vweird.f32 %v2385_v58 }
 0x797   :  { %3529 = vrcp.f32 %v2404_v29  ;;  %v2416_v51 = vand.u32 2147483648, %v2404_v29  ;;  %v2414_v10 = vand.u32 2147483647, %v2404_v29  ;;  %vm2410_vm12 = vweird.f32 %v2404_v29 }
 0x798   :  { %v2398_v56 = vor.u32 1.1754944e-38, %v2397_v52  ;;  %vm2396_vm15 = vcmp.eq.f32.partialorder %v2395_v61, 8.507059e+37 }
 0x799   :  { %vm2415_vm0 = vcmp.eq.f32.partialorder %v2414_v10, 8.507059e+37 }
 0x79a   :  { %v3526_v36 = vpop.eup %3525 }
 0x79b   :  { %v2424_v44 = vadd.f32 1.0, %v3526_v36 }
 0x79c   :  { %v3528_v62 = vpop.eup %3527 }
 0x79d   :  { %v3530_v55 = vpop.eup %3529  ;;  %v2387_v43 = vmul.f32 %v3528_v62, %v2385_v58  ;;  %3531 = vrcp.f32 %v2424_v44  ;;  %vm2392_vm9 = vweird.f32 %v3528_v62  ;;  %vm2430_vm2 = vweird.f32 %v2424_v44 }
 0x79e   :  { %v2406_v41 = vmul.f32 %v3530_v55, %v2404_v29  ;;  %3533 = vtanh.f32 %v2380_v0  ;;  %vm2411_vm10 = vweird.f32 %v3530_v55  ;;  %vm2393_vm13 = vmor %vm2391_vm11, %vm2392_vm9 }
 0x79f   :  { %v2388_v15 = vsub.f32 1.0, %v2387_v43  ;;  %vm2412_vm14 = vmor %vm2410_vm12, %vm2411_vm10  ;;  %v2417_v43 = vor.u32 1.1754944e-38, %v2416_v51 }
 0x7a0   :  { %v2407_v6 = vsub.f32 1.0, %v2406_v41 }
 0x7a1   :  { %v2389_v32 = vmul.f32 %v3528_v62, %v2388_v15 }
 0x7a2   :  { %v2408_v20 = vmul.f32 %v3530_v55, %v2407_v6 }
 0x7a3   :  { %v3532_v21 = vpop.eup %3531  ;;  %v2390_v49 = vadd.f32 %v3528_v62, %v2389_v32 }
 0x7a4   :  { %v2409_v36 = vadd.f32 %v3530_v55, %v2408_v20  ;;  %v2426_v5 = vmul.f32 %v3532_v21, %v2424_v44  ;;  %v3534_v0 = vpop.eup %3533  ;;  %vm2431_vm1 = vweird.f32 %v3532_v21  ;;  %v2436_v20 = vand.u32 2147483648, %v2424_v44 }
 0x7a5   :  { %v2394_v41 = vsel %vm2393_vm13, %v3528_v62, %v2390_v49  ;;  %v2434_v62 = vand.u32 2147483647, %v2424_v44  ;;  %vm2432_vm3 = vmor %vm2430_vm2, %vm2431_vm1  ;;  %v6647_v44 = vld [vmem:[#allocation60_spill] sm:$0xff]  ;;  %v6648_v49 = vld [vmem:[#allocation59_spill] sm:$0xff] }
 0x7a6   :  { %v2399_v34 = vsel %vm2396_vm15, %v2398_v56, %v2394_v41  ;;  %v2413_v15 = vsel %vm2412_vm14, %v3530_v55, %v2409_v36  ;;  %v2427_v33 = vsub.f32 1.0, %v2426_v5  ;;  %v2437_v51 = vor.u32 1.1754944e-38, %v2436_v20  ;;  %v6649_v56 = vld [vmem:[#allocation28_spill] sm:$0xff]  ;;  %v6650_v36 = vld [vmem:[#allocation31_spill] sm:$0xff]  ;;  %v6659_v20 = vld [vmem:[#allocation38_spill] sm:$0xff] }
 0x7a7   :  { %v2418_v6 = vsel %vm2415_vm0, %v2417_v43, %v2413_v15  ;;  %v2441_v46 = vmul.f32 %v3534_v0, %v2399_v34  ;;  %vm2435_vm4 = vcmp.eq.f32.partialorder %v2434_v62, 8.507059e+37  ;;  %v6641_v34 = vld [vmem:[#allocation25_spill] sm:$0xff]  ;;  %v6651_v5 = vld [vmem:[#allocation23_spill] sm:$0xff]  ;;  %v6652_v43 = vld [vmem:[#allocation22_spill] sm:$0xff] }
 0x7a8   :  { %v2440_v25 = vmul.f32 %v2418_v6, %v5533_v7  ;;  %v2428_v32 = vmul.f32 %v3532_v21, %v2427_v33  ;;  %v6642_v7 = vld [vmem:[#allocation57_spill] sm:$0xff]  ;;  %v6645_v33 = vld [vmem:[#allocation24_spill] sm:$0xff]  ;;  %v6654_v0 = vld [vmem:[#allocation35_spill] sm:$0xff] }
 0x7a9   :  { %v6653_v41 = vld [vmem:[#allocation32_spill] sm:$0xff]  ;;  %v6655_v15 = vld [vmem:[#allocation29_spill] sm:$0xff]  ;;  %v6656_v6 = vld [vmem:[#allocation26_spill] sm:$0xff] }
 0x7aa   :  { %v5735_v58 = vadd.f32 %v2441_v46, %v2440_v25  ;;  %v2429_v29 = vadd.f32 %v3532_v21, %v2428_v32  ;;  %v6643_v25 = vld [vmem:[#allocation56_spill] sm:$0xff]  ;;  %v6644_v46 = vld [vmem:[#allocation55_spill] sm:$0xff]  ;;  %v6657_v32 = vld [vmem:[#allocation34_spill] sm:$0xff] }
 0x7ab   :  { %v6660_v62 = vld [vmem:[#allocation33_spill] sm:$0xff] }
 0x7ac   :  { %3535 = vtanh.f32 %v5735_v58  ;;  %v2433_v52 = vsel %vm2432_vm3, %v3532_v21, %v2429_v29  ;;  %v6646_v21 = vld [vmem:[#allocation58_spill] sm:$0xff] }
 0x7ad   :  { %v2438_v55 = vsel %vm2435_vm4, %v2437_v51, %v2433_v52  ;;  %v6658_v29 = vld [vmem:[#allocation30_spill] sm:$0xff]  ;;  %v6661_v52 = vld [vmem:[#allocation39_spill] sm:$0xff]  ;;  %v6662_v51 = vld [vmem:[#allocation36_spill] sm:$0xff] }
 0x7b2   :  { %v3536_v10 = vpop.eup %3535 }
 0x7b3   :  { %v2444_v61 = vmul.f32 %v3536_v10, %v2438_v55  ;;  %v6663_v10 = vld [vmem:[#allocation40_spill] sm:$0xff]  ;;  %v6664_v55 = vld [vmem:[#allocation37_spill] sm:$0xff] }
 0x7b5   :  { %2465 = vmatmul.f32.vlgmr.msrb.gmra.mxu0 %v2444_v61  ;;  %2485 = vmatmul.f32.vlgmr.msra.gmra.mxu1 %v2444_v61 }
 0x7b6   :  { %2505 = vmatmul.f32.vlgmr.msra.gmra.mxu2 %v2444_v61  ;;  %2525 = vmatmul.f32.vlgmr.msra.gmra.mxu3 %v2444_v61  ;;  %v5800_v61 = vld [vmem:[#allocation9 + $0x10] sm:$0xff] }
 0x7b7   :  { %2751 = vmatpush.msrb.mxu0 %v5536_v12  ;;  %2771 = vmatpush.msra.mxu1 %v5539_v16  ;;  %6665 = vst [vmem:[#allocation41_spill] sm:$0xff] %v5800_v61 }
 0x7b8   :  { %2791 = vmatpush.msra.mxu2 %v5542_v17  ;;  %2811 = vmatpush.msra.mxu3 %v5545_v18 }
 0x7b9   :  { %2752 = vmatpush.msrb.mxu0 %v5548_v59  ;;  %2772 = vmatpush.msra.mxu1 %v5551_v8 }
 0x7ba   :  { %2792 = vmatpush.msra.mxu2 %v5554_v45  ;;  %2812 = vmatpush.msra.mxu3 %v5557_v38 }
 0x7bb   :  { %2753 = vmatpush.msrb.mxu0 %v5560_v2  ;;  %2773 = vmatpush.msra.mxu1 %v5563_v14 }
 0x7bc   :  { %2793 = vmatpush.msra.mxu2 %v5566_v39  ;;  %2813 = vmatpush.msra.mxu3 %v5569_v54 }
 0x7bd   :  { %2754 = vmatpush.msrb.mxu0 %v5572_v53  ;;  %2774 = vmatpush.msra.mxu1 %v5575_v40 }
 0x7be   :  { %2794 = vmatpush.msra.mxu2 %v5578_v31  ;;  %2814 = vmatpush.msra.mxu3 %v5581_v9 }
 0x7bf   :  { %2755 = vmatpush.msrb.mxu0 %v5584_v19  ;;  %2775 = vmatpush.msra.mxu1 %v5587_v24 }
 0x7c0   :  { %2795 = vmatpush.msra.mxu2 %v5590_v57  ;;  %2815 = vmatpush.msra.mxu3 %v5593_v42 }
 0x7c1   :  { %2756 = vmatpush.msrb.mxu0 %v5596_v48  ;;  %2776 = vmatpush.msra.mxu1 %v5599_v1 }
 0x7c2   :  { %2796 = vmatpush.msra.mxu2 %v5602_v60  ;;  %2816 = vmatpush.msra.mxu3 %v5605_v13 }
 0x7c3   :  { %2757 = vmatpush.msrb.mxu0 %v5608_v63  ;;  %2777 = vmatpush.msra.mxu1 %v5611_v23 }
 0x7c4   :  { %2797 = vmatpush.msra.mxu2 %v5614_v30  ;;  %2817 = vmatpush.msra.mxu3 %v5617_v4 }
 0x7c5   :  { %2758 = vmatpush.msrb.mxu0 %v5620_v50  ;;  %2778 = vmatpush.msra.mxu1 %v5623_v37 }
 0x7c6   :  { %2798 = vmatpush.msra.mxu2 %v5626_v27  ;;  %2818 = vmatpush.msra.mxu3 %v5629_v47 }
 0x7c7   :  { %2759 = vmatpush.msrb.mxu0 %v5632_v28  ;;  %2779 = vmatpush.msra.mxu1 %v5635_v3 }
 0x7c8   :  { %2799 = vmatpush.msra.mxu2 %v5638_v26  ;;  %2819 = vmatpush.msra.mxu3 %v5641_v22 }
 0x7c9   :  { %2760 = vmatpush.msrb.mxu0 %v5644_v11  ;;  %2780 = vmatpush.msra.mxu1 %v5647_v35 }
 0x7ca   :  { %2800 = vmatpush.msra.mxu2 %v6641_v34  ;;  %2820 = vmatpush.msra.mxu3 %v6642_v7 }
 0x7cb   :  { %2761 = vmatpush.msrb.mxu0 %v6643_v25  ;;  %2781 = vmatpush.msra.mxu1 %v6644_v46 }
 0x7cc   :  { %2801 = vmatpush.msra.mxu2 %v6645_v33  ;;  %2821 = vmatpush.msra.mxu3 %v6646_v21 }
 0x7cd   :  { %2762 = vmatpush.msrb.mxu0 %v6647_v44  ;;  %2782 = vmatpush.msra.mxu1 %v6648_v49 }
 0x7ce   :  { %2802 = vmatpush.msra.mxu2 %v6649_v56  ;;  %2822 = vmatpush.msra.mxu3 %v6650_v36  ;;  %v6672_v36 = vld [vmem:[#allocation71_spill] sm:$0xff] }
 0x7cf   :  { %2763 = vmatpush.msrb.mxu0 %v6651_v5  ;;  %2783 = vmatpush.msra.mxu1 %v6652_v43 }
 0x7d0   :  { %2803 = vmatpush.msra.mxu2 %v6653_v41  ;;  %2823 = vmatpush.msra.mxu3 %v6654_v0  ;;  %v6670_v0 = vld [vmem:[#allocation69_spill] sm:$0xff] }
 0x7d1   :  { %2764 = vmatpush.msrb.mxu0 %v6655_v15  ;;  %2784 = vmatpush.msra.mxu1 %v6656_v6  ;;  %v6666_v6 = vld [vmem:[#allocation45_spill] sm:$0xff] }
 0x7d2   :  { %2804 = vmatpush.msra.mxu2 %v6657_v32  ;;  %2824 = vmatpush.msra.mxu3 %v6658_v29  ;;  %v6667_v32 = vld [vmem:[#allocation72_spill] sm:$0xff]  ;;  %v6668_v29 = vld [vmem:[#allocation42_spill] sm:$0xff] }
 0x7d3   :  { %2765 = vmatpush.msrb.mxu0 %v6659_v20  ;;  %2785 = vmatpush.msra.mxu1 %v6660_v62  ;;  %v1759_v15 = vadd.f32 %v6668_v29, %v6667_v32  ;;  %v6669_v20 = vld [vmem:[#allocation19_spill] sm:$0xff] }
 0x7d4   :  { %2805 = vmatpush.msra.mxu2 %v6661_v52  ;;  %2825 = vmatpush.msra.mxu3 %v6662_v51  ;;  %v1800_v62 = vadd.f32 %v6670_v0, %v6669_v20 }
 0x7d5   :  { %2766 = vmatpush.msrb.mxu0 %v6663_v10  ;;  %2786 = vmatpush.msra.mxu1 %v6664_v55  ;;  %v6671_v55 = vld [vmem:[#allocation27_spill] sm:$0xff] }
 0x7d6   :  { %2806 = vmatpush.msra.mxu2 %v5800_v61  ;;  %2826 = vmatpush.msra.mxu3 %v6666_v6  ;;  %v1882_v56 = vadd.f32 %v6672_v36, %v6671_v55 }
 0x832   :  { %v2466_v41 = vpop.f32.mrf.mxu0  ;;  %v2486_v52 = vpop.f32.mrf.mxu1 }
 0x833   :  { %v2529_v43 = vadd.f32 %v2466_v41, %v1759_v15  ;;  %v2530_v51 = vadd.f32 %v2486_v52, %v1800_v62  ;;  %v6673_v15 = vld [vmem:[#allocation54_spill] sm:$0xff] }
 0x835   :  { %v3332_v5 = vmul.f32 -1.442695, %v2529_v43  ;;  %v3333_v10 = vmul.f32 -1.442695, %v2530_v51  ;;  %v6674_v43 = vld [vmem:[#allocation63_spill] sm:$0xff] }
 0x836   :  { %v1841_v62 = vadd.f32 %v6674_v43, %v6673_v15 }
 0x837   :  { %3537 = vpow2.f32 %v3332_v5 }
 0x838   :  { %3539 = vpow2.f32 %v3333_v10 }
 0x839   :  { %v2526_v61 = vpop.f32.mrf.mxu3  ;;  %v2506_v0 = vpop.f32.mrf.mxu2 }
 0x83a   :  { %v2532_v49 = vadd.f32 %v2526_v61, %v1882_v56  ;;  %v2531_v51 = vadd.f32 %v2506_v0, %v1841_v62 }
 0x83c   :  { %v3334_v6 = vmul.f32 -1.442695, %v2532_v49 }
 0x83d   :  { %v3538_v44 = vpop.eup %3537 }
 0x83e   :  { %v3540_v21 = vpop.eup %3539  ;;  %v2536_v29 = vadd.f32 1.0, %v3538_v44  ;;  %3541 = vpow2.f32 %v3334_v6 }
 0x83f   :  { %v2555_v32 = vadd.f32 1.0, %v3540_v21 }
 0x840   :  { %3543 = vrcp.f32 %v2536_v29  ;;  %v2548_v55 = vand.u32 2147483648, %v2536_v29  ;;  %v2546_v6 = vand.u32 2147483647, %v2536_v29  ;;  %vm2542_vm7 = vweird.f32 %v2536_v29 }
 0x841   :  { %3545 = vrcp.f32 %v2555_v32  ;;  %v2567_v44 = vand.u32 2147483648, %v2555_v32  ;;  %v2565_v33 = vand.u32 2147483647, %v2555_v32  ;;  %vm2561_vm8 = vweird.f32 %v2555_v32 }
 0x842   :  { %v2549_v0 = vor.u32 1.1754944e-38, %v2548_v55  ;;  %vm2547_vm11 = vcmp.eq.f32.partialorder %v2546_v6, 8.507059e+37 }
 0x843   :  { %vm2566_vm12 = vcmp.eq.f32.partialorder %v2565_v33, 8.507059e+37 }
 0x844   :  { %v3542_v41 = vpop.eup %3541 }
 0x845   :  { %v2575_v5 = vadd.f32 1.0, %v3542_v41 }
 0x846   :  { %v3544_v52 = vpop.eup %3543 }
 0x847   :  { %v3546_v36 = vpop.eup %3545  ;;  %v2538_v10 = vmul.f32 %v3544_v52, %v2536_v29  ;;  %3547 = vrcp.f32 %v2575_v5  ;;  %vm2543_vm5 = vweird.f32 %v3544_v52  ;;  %vm2581_vm14 = vweird.f32 %v2575_v5 }
 0x848   :  { %v2557_v56 = vmul.f32 %v3546_v36, %v2555_v32  ;;  %3549 = vtanh.f32 %v2531_v51  ;;  %vm2562_vm6 = vweird.f32 %v3546_v36  ;;  %vm2544_vm9 = vmor %vm2542_vm7, %vm2543_vm5  ;;  %v2585_v55 = vand.u32 2147483647, %v2575_v5 }
 0x849   :  { %v2539_v49 = vsub.f32 1.0, %v2538_v10  ;;  %vm2563_vm10 = vmor %vm2561_vm8, %vm2562_vm6  ;;  %v2568_v10 = vor.u32 1.1754944e-38, %v2567_v44 }
 0x84a   :  { %v2558_v61 = vsub.f32 1.0, %v2557_v56  ;;  %vm2586_vm0 = vcmp.eq.f32.partialorder %v2585_v55, 8.507059e+37  ;;  %v6694_v55 = vld [vmem:[#allocation33_spill] sm:$0xff] }
 0x84b   :  { %v2540_v21 = vmul.f32 %v3544_v52, %v2539_v49 }
 0x84c   :  { %v2559_v20 = vmul.f32 %v3546_v36, %v2558_v61 }
 0x84d   :  { %v3548_v46 = vpop.eup %3547  ;;  %v2541_v43 = vadd.f32 %v3544_v52, %v2540_v21 }
 0x84e   :  { %v2560_v41 = vadd.f32 %v3546_v36, %v2559_v20  ;;  %v2577_v62 = vmul.f32 %v3548_v46, %v2575_v5  ;;  %v3550_v51 = vpop.eup %3549  ;;  %vm2582_vm13 = vweird.f32 %v3548_v46  ;;  %v2587_v20 = vand.u32 2147483648, %v2575_v5  ;;  %v6681_v5 = vld [vmem:[#allocation60_spill] sm:$0xff] }
 0x84f   :  { %v2545_v56 = vsel %vm2544_vm9, %v3544_v52, %v2541_v43  ;;  %vm2583_vm15 = vmor %vm2581_vm14, %vm2582_vm13  ;;  %v6682_v43 = vld [vmem:[#allocation59_spill] sm:$0xff] }
 0x850   :  { %v2550_v15 = vsel %vm2547_vm11, %v2549_v0, %v2545_v56  ;;  %v2564_v49 = vsel %vm2563_vm10, %v3546_v36, %v2560_v41  ;;  %v2578_v25 = vsub.f32 1.0, %v2577_v62  ;;  %v2588_v44 = vor.u32 1.1754944e-38, %v2587_v20  ;;  %v6683_v0 = vld [vmem:[#allocation28_spill] sm:$0xff]  ;;  %v6684_v41 = vld [vmem:[#allocation31_spill] sm:$0xff]  ;;  %v6693_v20 = vld [vmem:[#allocation38_spill] sm:$0xff] }
 0x851   :  { %v2569_v61 = vsel %vm2566_vm12, %v2568_v10, %v2564_v49  ;;  %v2592_v7 = vmul.f32 %v3550_v51, %v2550_v15  ;;  %v6680_v15 = vld [vmem:[#allocation58_spill] sm:$0xff]  ;;  %v6685_v62 = vld [vmem:[#allocation23_spill] sm:$0xff]  ;;  %v6687_v56 = vld [vmem:[#allocation32_spill] sm:$0xff] }
 0x852   :  { %v2591_v34 = vmul.f32 %v2569_v61, %v5735_v58  ;;  %v2579_v21 = vmul.f32 %v3548_v46, %v2578_v25  ;;  %v6675_v58 = vld [vmem:[#allocation25_spill] sm:$0xff]  ;;  %v6678_v25 = vld [vmem:[#allocation55_spill] sm:$0xff]  ;;  %v6686_v10 = vld [vmem:[#allocation22_spill] sm:$0xff] }
 0x853   :  { %v6688_v51 = vld [vmem:[#allocation35_spill] sm:$0xff]  ;;  %v6689_v49 = vld [vmem:[#allocation29_spill] sm:$0xff]  ;;  %v6690_v61 = vld [vmem:[#allocation26_spill] sm:$0xff] }
 0x854   :  { %v5813_v29 = vadd.f32 %v2592_v7, %v2591_v34  ;;  %v2580_v32 = vadd.f32 %v3548_v46, %v2579_v21  ;;  %v6676_v34 = vld [vmem:[#allocation57_spill] sm:$0xff]  ;;  %v6677_v7 = vld [vmem:[#allocation56_spill] sm:$0xff]  ;;  %v6691_v21 = vld [vmem:[#allocation34_spill] sm:$0xff] }
 0x856   :  { %3551 = vtanh.f32 %v5813_v29  ;;  %v2584_v52 = vsel %vm2583_vm15, %v3548_v46, %v2580_v32  ;;  %v6679_v46 = vld [vmem:[#allocation24_spill] sm:$0xff]  ;;  %v6692_v32 = vld [vmem:[#allocation30_spill] sm:$0xff] }
 0x857   :  { %v2589_v36 = vsel %vm2586_vm0, %v2588_v44, %v2584_v52  ;;  %v6695_v52 = vld [vmem:[#allocation39_spill] sm:$0xff]  ;;  %v6696_v44 = vld [vmem:[#allocation36_spill] sm:$0xff] }
 0x85c   :  { %v3552_v33 = vpop.eup %3551 }
 0x85d   :  { %v2595_v6 = vmul.f32 %v3552_v33, %v2589_v36  ;;  %v6697_v33 = vld [vmem:[#allocation40_spill] sm:$0xff]  ;;  %v6698_v36 = vld [vmem:[#allocation37_spill] sm:$0xff] }
 0x85f   :  { %2616 = vmatmul.f32.vlgmr.msra.gmra.mxu0 %v2595_v6  ;;  %2636 = vmatmul.f32.vlgmr.msrb.gmra.mxu1 %v2595_v6 }
 0x860   :  { %2656 = vmatmul.f32.vlgmr.msrb.gmra.mxu2 %v2595_v6  ;;  %2676 = vmatmul.f32.vlgmr.msrb.gmra.mxu3 %v2595_v6  ;;  %v6699_v6 = vld [vmem:[#allocation41_spill] sm:$0xff] }
 0x861   :  { %2902 = vmatpush.msra.mxu0 %v5536_v12  ;;  %2922 = vmatpush.msrb.mxu1 %v5539_v16 }
 0x862   :  { %2942 = vmatpush.msrb.mxu2 %v5542_v17  ;;  %2962 = vmatpush.msrb.mxu3 %v5545_v18 }
 0x863   :  { %2903 = vmatpush.msra.mxu0 %v5548_v59  ;;  %2923 = vmatpush.msrb.mxu1 %v5551_v8 }
 0x864   :  { %2943 = vmatpush.msrb.mxu2 %v5554_v45  ;;  %2963 = vmatpush.msrb.mxu3 %v5557_v38 }
 0x865   :  { %2904 = vmatpush.msra.mxu0 %v5560_v2  ;;  %2924 = vmatpush.msrb.mxu1 %v5563_v14 }
 0x866   :  { %2944 = vmatpush.msrb.mxu2 %v5566_v39  ;;  %2964 = vmatpush.msrb.mxu3 %v5569_v54 }
 0x867   :  { %2905 = vmatpush.msra.mxu0 %v5572_v53  ;;  %2925 = vmatpush.msrb.mxu1 %v5575_v40 }
 0x868   :  { %2945 = vmatpush.msrb.mxu2 %v5578_v31  ;;  %2965 = vmatpush.msrb.mxu3 %v5581_v9 }
 0x869   :  { %2906 = vmatpush.msra.mxu0 %v5584_v19  ;;  %2926 = vmatpush.msrb.mxu1 %v5587_v24 }
 0x86a   :  { %2946 = vmatpush.msrb.mxu2 %v5590_v57  ;;  %2966 = vmatpush.msrb.mxu3 %v5593_v42 }
 0x86b   :  { %2907 = vmatpush.msra.mxu0 %v5596_v48  ;;  %2927 = vmatpush.msrb.mxu1 %v5599_v1 }
 0x86c   :  { %2947 = vmatpush.msrb.mxu2 %v5602_v60  ;;  %2967 = vmatpush.msrb.mxu3 %v5605_v13 }
 0x86d   :  { %2908 = vmatpush.msra.mxu0 %v5608_v63  ;;  %2928 = vmatpush.msrb.mxu1 %v5611_v23 }
 0x86e   :  { %2948 = vmatpush.msrb.mxu2 %v5614_v30  ;;  %2968 = vmatpush.msrb.mxu3 %v5617_v4 }
 0x86f   :  { %2909 = vmatpush.msra.mxu0 %v5620_v50  ;;  %2929 = vmatpush.msrb.mxu1 %v5623_v37 }
 0x870   :  { %2949 = vmatpush.msrb.mxu2 %v5626_v27  ;;  %2969 = vmatpush.msrb.mxu3 %v5629_v47 }
 0x871   :  { %2910 = vmatpush.msra.mxu0 %v5632_v28  ;;  %2930 = vmatpush.msrb.mxu1 %v5635_v3 }
 0x872   :  { %2950 = vmatpush.msrb.mxu2 %v5638_v26  ;;  %2970 = vmatpush.msrb.mxu3 %v5641_v22 }
 0x873   :  { %2911 = vmatpush.msra.mxu0 %v5644_v11  ;;  %2931 = vmatpush.msrb.mxu1 %v5647_v35 }
 0x874   :  { %2951 = vmatpush.msrb.mxu2 %v6675_v58  ;;  %2971 = vmatpush.msrb.mxu3 %v6676_v34 }
 0x875   :  { %2912 = vmatpush.msra.mxu0 %v6677_v7  ;;  %2932 = vmatpush.msrb.mxu1 %v6678_v25 }
 0x876   :  { %2952 = vmatpush.msrb.mxu2 %v6679_v46  ;;  %2972 = vmatpush.msrb.mxu3 %v6680_v15 }
 0x877   :  { %2913 = vmatpush.msra.mxu0 %v6681_v5  ;;  %2933 = vmatpush.msrb.mxu1 %v6682_v43 }
 0x878   :  { %2953 = vmatpush.msrb.mxu2 %v6683_v0  ;;  %2973 = vmatpush.msrb.mxu3 %v6684_v41  ;;  %v6706_v0 = vld [vmem:[#allocation43_spill] sm:$0xff] }
 0x879   :  { %2914 = vmatpush.msra.mxu0 %v6685_v62  ;;  %2934 = vmatpush.msrb.mxu1 %v6686_v10 }
 0x87a   :  { %2954 = vmatpush.msrb.mxu2 %v6687_v56  ;;  %2974 = vmatpush.msrb.mxu3 %v6688_v51  ;;  %v6704_v56 = vld [vmem:[#allocation73_spill] sm:$0xff] }
 0x87b   :  { %2915 = vmatpush.msra.mxu0 %v6689_v49  ;;  %2935 = vmatpush.msrb.mxu1 %v6690_v61  ;;  %v6700_v49 = vld [vmem:[#allocation45_spill] sm:$0xff]  ;;  %v6701_v61 = vld [vmem:[#allocation72_spill] sm:$0xff] }
 0x87c   :  { %2955 = vmatpush.msrb.mxu2 %v6691_v21  ;;  %2975 = vmatpush.msrb.mxu3 %v6692_v32  ;;  %v6702_v21 = vld [vmem:[#allocation64_spill] sm:$0xff]  ;;  %v6703_v32 = vld [vmem:[#allocation19_spill] sm:$0xff] }
 0x87d   :  { %2916 = vmatpush.msra.mxu0 %v6693_v20  ;;  %2936 = vmatpush.msrb.mxu1 %v6694_v55  ;;  %v1762_v51 = vadd.f32 %v6702_v21, %v6701_v61  ;;  %v1803_v20 = vadd.f32 %v6704_v56, %v6703_v32 }
 0x87e   :  { %2956 = vmatpush.msrb.mxu2 %v6695_v52  ;;  %2976 = vmatpush.msrb.mxu3 %v6696_v44 }
 0x87f   :  { %2917 = vmatpush.msra.mxu0 %v6697_v33  ;;  %2937 = vmatpush.msrb.mxu1 %v6698_v36  ;;  %v6705_v33 = vld [vmem:[#allocation27_spill] sm:$0xff] }
 0x880   :  { %2957 = vmatpush.msrb.mxu2 %v6699_v6  ;;  %2977 = vmatpush.msrb.mxu3 %v6700_v49  ;;  %v1885_v36 = vadd.f32 %v6706_v0, %v6705_v33 }
 0x8dc   :  { %v2617_v10 = vpop.f32.mrf.mxu0  ;;  %v2637_v55 = vpop.f32.mrf.mxu1 }
 0x8dd   :  { %v2680_v62 = vadd.f32 %v2617_v10, %v1762_v51  ;;  %v2681_v52 = vadd.f32 %v2637_v55, %v1803_v20  ;;  %v6707_v51 = vld [vmem:[#allocation54_spill] sm:$0xff] }
 0x8df   :  { %v3335_v41 = vmul.f32 -1.442695, %v2680_v62  ;;  %v3336_v44 = vmul.f32 -1.442695, %v2681_v52  ;;  %v6708_v62 = vld [vmem:[#allocation68_spill] sm:$0xff] }
 0x8e0   :  { %v1844_v20 = vadd.f32 %v6708_v62, %v6707_v51 }
 0x8e1   :  { %3553 = vpow2.f32 %v3335_v41 }
 0x8e2   :  { %3555 = vpow2.f32 %v3336_v44 }
 0x8e3   :  { %v2677_v6 = vpop.f32.mrf.mxu3  ;;  %v2657_v56 = vpop.f32.mrf.mxu2 }
 0x8e4   :  { %v2683_v43 = vadd.f32 %v2677_v6, %v1885_v36  ;;  %v2682_v52 = vadd.f32 %v2657_v56, %v1844_v20 }
 0x8e6   :  { %v3337_v49 = vmul.f32 -1.442695, %v2683_v43 }
 0x8e7   :  { %v3554_v5 = vpop.eup %3553 }
 0x8e8   :  { %v3556_v15 = vpop.eup %3555  ;;  %v2687_v21 = vadd.f32 1.0, %v3554_v5  ;;  %3557 = vpow2.f32 %v3337_v49 }
 0x8e9   :  { %v2706_v61 = vadd.f32 1.0, %v3556_v15 }
 0x8ea   :  { %3559 = vrcp.f32 %v2687_v21  ;;  %v2699_v33 = vand.u32 2147483648, %v2687_v21  ;;  %v2697_v49 = vand.u32 2147483647, %v2687_v21  ;;  %vm2693_vm3 = vweird.f32 %v2687_v21 }
 0x8eb   :  { %3561 = vrcp.f32 %v2706_v61  ;;  %v2718_v5 = vand.u32 2147483648, %v2706_v61  ;;  %v2716_v46 = vand.u32 2147483647, %v2706_v61  ;;  %vm2712_vm4 = vweird.f32 %v2706_v61 }
 0x8ec   :  { %v2700_v56 = vor.u32 1.1754944e-38, %v2699_v33  ;;  %vm2698_vm7 = vcmp.eq.f32.partialorder %v2697_v49, 8.507059e+37 }
 0x8ed   :  { %vm2717_vm8 = vcmp.eq.f32.partialorder %v2716_v46, 8.507059e+37 }
 0x8ee   :  { %v3558_v10 = vpop.eup %3557 }
 0x8ef   :  { %v2726_v41 = vadd.f32 1.0, %v3558_v10 }
 0x8f0   :  { %v3560_v55 = vpop.eup %3559 }
 0x8f1   :  { %v3562_v0 = vpop.eup %3561  ;;  %v2689_v44 = vmul.f32 %v3560_v55, %v2687_v21  ;;  %3563 = vrcp.f32 %v2726_v41  ;;  %vm2694_vm1 = vweird.f32 %v3560_v55  ;;  %vm2732_vm10 = vweird.f32 %v2726_v41 }
 0x8f2   :  { %v2708_v36 = vmul.f32 %v3562_v0, %v2706_v61  ;;  %3565 = vtanh.f32 %v2682_v52  ;;  %vm2713_vm2 = vweird.f32 %v3562_v0  ;;  %vm2695_vm5 = vmor %vm2693_vm3, %vm2694_vm1  ;;  %v2736_v33 = vand.u32 2147483647, %v2726_v41 }
 0x8f3   :  { %v2690_v43 = vsub.f32 1.0, %v2689_v44  ;;  %vm2714_vm6 = vmor %vm2712_vm4, %vm2713_vm2  ;;  %v2719_v44 = vor.u32 1.1754944e-38, %v2718_v5 }
 0x8f4   :  { %v2709_v6 = vsub.f32 1.0, %v2708_v36  ;;  %vm2737_vm12 = vcmp.eq.f32.partialorder %v2736_v33, 8.507059e+37 }
 0x8f5   :  { %v2691_v15 = vmul.f32 %v3560_v55, %v2690_v43 }
 0x8f6   :  { %v2710_v32 = vmul.f32 %v3562_v0, %v2709_v6 }
 0x8f7   :  { %v3564_v25 = vpop.eup %3563  ;;  %v2692_v62 = vadd.f32 %v3560_v55, %v2691_v15 }
 0x8f8   :  { %v2711_v10 = vadd.f32 %v3562_v0, %v2710_v32  ;;  %v2728_v20 = vmul.f32 %v3564_v25, %v2726_v41  ;;  %v3566_v52 = vpop.eup %3565  ;;  %vm2733_vm9 = vweird.f32 %v3564_v25  ;;  %v2738_v32 = vand.u32 2147483648, %v2726_v41 }
 0x8f9   :  { %v2696_v36 = vsel %vm2695_vm5, %v3560_v55, %v2692_v62  ;;  %vm2734_vm11 = vmor %vm2732_vm10, %vm2733_vm9 }
 0x8fa   :  { %v2701_v51 = vsel %vm2698_vm7, %v2700_v56, %v2696_v36  ;;  %v2715_v43 = vsel %vm2714_vm6, %v3562_v0, %v2711_v10  ;;  %v2729_v7 = vsub.f32 1.0, %v2728_v20  ;;  %v2739_v5 = vor.u32 1.1754944e-38, %v2738_v32  ;;  %v6741_v36 = vld [vmem:[#allocation54_spill] sm:$0xff] }
 0x8fb   :  { %v2720_v6 = vsel %vm2717_vm8, %v2719_v44, %v2715_v43  ;;  %v2743_v34 = vmul.f32 %v3566_v52, %v2701_v51  ;;  %v6742_v52 = vld [vmem:[#allocation52_spill] sm:$0xff] }
 0x8fc   :  { %v2742_v58 = vmul.f32 %v2720_v6, %v5813_v29  ;;  %v2730_v15 = vmul.f32 %v3564_v25, %v2729_v7  ;;  %v6739_v29 = vld [vmem:[#allocation27_spill] sm:$0xff]  ;;  %v1847_v43 = vadd.f32 %v6742_v52, %v6741_v36 }
 0x8fe   :  { %v5889_v21 = vadd.f32 %v2743_v34, %v2742_v58  ;;  %v2731_v61 = vadd.f32 %v3564_v25, %v2730_v15  ;;  %v6740_v58 = vld [vmem:[#allocation74_spill] sm:$0xff] }
 0x8ff   :  { %v1888_v34 = vadd.f32 %v6740_v58, %v6739_v29 }
 0x900   :  { %3567 = vtanh.f32 %v5889_v21  ;;  %v2735_v55 = vsel %vm2734_vm11, %v3564_v25, %v2731_v61 }
 0x901   :  { %v2740_v0 = vsel %vm2737_vm12, %v2739_v5, %v2735_v55 }
 0x906   :  { %v3568_v46 = vpop.eup %3567 }
 0x907   :  { %v2746_v49 = vmul.f32 %v3568_v46, %v2740_v0 }
 0x909   :  { %2767 = vmatmul.f32.vlgmr.msrb.gmra.mxu0 %v2746_v49  ;;  %2787 = vmatmul.f32.vlgmr.msra.gmra.mxu1 %v2746_v49 }
 0x90a   :  { %2807 = vmatmul.f32.vlgmr.msra.gmra.mxu2 %v2746_v49  ;;  %2827 = vmatmul.f32.vlgmr.msra.gmra.mxu3 %v2746_v49 }
 0x90b   :  { %3053 = vmatpush.msrb.mxu0 %v5536_v12  ;;  %3073 = vmatpush.msra.mxu1 %v5539_v16  ;;  %v6709_v12 = vld [vmem:[#allocation25_spill] sm:$0xff] }
 0x90c   :  { %3093 = vmatpush.msra.mxu2 %v5542_v17  ;;  %3113 = vmatpush.msra.mxu3 %v5545_v18  ;;  %v6710_v16 = vld [vmem:[#allocation57_spill] sm:$0xff]  ;;  %v6711_v17 = vld [vmem:[#allocation56_spill] sm:$0xff]  ;;  %v6712_v18 = vld [vmem:[#allocation55_spill] sm:$0xff] }
 0x90d   :  { %3054 = vmatpush.msrb.mxu0 %v5548_v59  ;;  %3074 = vmatpush.msra.mxu1 %v5551_v8  ;;  %v6713_v59 = vld [vmem:[#allocation24_spill] sm:$0xff]  ;;  %v6714_v8 = vld [vmem:[#allocation58_spill] sm:$0xff] }
 0x90e   :  { %3094 = vmatpush.msra.mxu2 %v5554_v45  ;;  %3114 = vmatpush.msra.mxu3 %v5557_v38  ;;  %v6715_v45 = vld [vmem:[#allocation60_spill] sm:$0xff]  ;;  %v6716_v38 = vld [vmem:[#allocation59_spill] sm:$0xff] }
 0x90f   :  { %3055 = vmatpush.msrb.mxu0 %v5560_v2  ;;  %3075 = vmatpush.msra.mxu1 %v5563_v14  ;;  %v6717_v2 = vld [vmem:[#allocation28_spill] sm:$0xff]  ;;  %v6718_v14 = vld [vmem:[#allocation31_spill] sm:$0xff] }
 0x910   :  { %3095 = vmatpush.msra.mxu2 %v5566_v39  ;;  %3115 = vmatpush.msra.mxu3 %v5569_v54  ;;  %v6719_v39 = vld [vmem:[#allocation23_spill] sm:$0xff]  ;;  %v6720_v54 = vld [vmem:[#allocation22_spill] sm:$0xff] }
 0x911   :  { %3056 = vmatpush.msrb.mxu0 %v5572_v53  ;;  %3076 = vmatpush.msra.mxu1 %v5575_v40  ;;  %v6721_v53 = vld [vmem:[#allocation32_spill] sm:$0xff]  ;;  %v6722_v40 = vld [vmem:[#allocation35_spill] sm:$0xff] }
 0x912   :  { %3096 = vmatpush.msra.mxu2 %v5578_v31  ;;  %3116 = vmatpush.msra.mxu3 %v5581_v9  ;;  %v6723_v31 = vld [vmem:[#allocation29_spill] sm:$0xff]  ;;  %v6724_v9 = vld [vmem:[#allocation26_spill] sm:$0xff] }
 0x913   :  { %3057 = vmatpush.msrb.mxu0 %v5584_v19  ;;  %3077 = vmatpush.msra.mxu1 %v5587_v24  ;;  %v6725_v19 = vld [vmem:[#allocation34_spill] sm:$0xff] }
 0x914   :  { %3097 = vmatpush.msra.mxu2 %v5590_v57  ;;  %3117 = vmatpush.msra.mxu3 %v5593_v42  ;;  %v6726_v24 = vld [vmem:[#allocation30_spill] sm:$0xff]  ;;  %v6728_v42 = vld [vmem:[#allocation33_spill] sm:$0xff] }
 0x915   :  { %3058 = vmatpush.msrb.mxu0 %v5596_v48  ;;  %3078 = vmatpush.msra.mxu1 %v5599_v1  ;;  %v6727_v57 = vld [vmem:[#allocation38_spill] sm:$0xff]  ;;  %v6729_v48 = vld [vmem:[#allocation39_spill] sm:$0xff]  ;;  %v6730_v1 = vld [vmem:[#allocation36_spill] sm:$0xff] }
 0x916   :  { %3098 = vmatpush.msra.mxu2 %v5602_v60  ;;  %3118 = vmatpush.msra.mxu3 %v5605_v13  ;;  %v6731_v60 = vld [vmem:[#allocation40_spill] sm:$0xff]  ;;  %v6732_v13 = vld [vmem:[#allocation37_spill] sm:$0xff] }
 0x917   :  { %3059 = vmatpush.msrb.mxu0 %v5608_v63  ;;  %3079 = vmatpush.msra.mxu1 %v5611_v23  ;;  %v6733_v63 = vld [vmem:[#allocation41_spill] sm:$0xff] }
 0x918   :  { %3099 = vmatpush.msra.mxu2 %v5614_v30  ;;  %3119 = vmatpush.msra.mxu3 %v5617_v4  ;;  %v6734_v23 = vld [vmem:[#allocation45_spill] sm:$0xff]  ;;  %v6735_v30 = vld [vmem:[#allocation72_spill] sm:$0xff] }
 0x919   :  { %3060 = vmatpush.msrb.mxu0 %v5620_v50  ;;  %3080 = vmatpush.msra.mxu1 %v5623_v37  ;;  %v6736_v4 = vld [vmem:[#allocation65_spill] sm:$0xff]  ;;  %v6737_v37 = vld [vmem:[#allocation19_spill] sm:$0xff] }
 0x91a   :  { %3100 = vmatpush.msra.mxu2 %v5626_v27  ;;  %3120 = vmatpush.msra.mxu3 %v5629_v47  ;;  %v1765_v50 = vadd.f32 %v6736_v4, %v6735_v30  ;;  %v6738_v27 = vld [vmem:[#allocation66_spill] sm:$0xff] }
 0x91b   :  { %3061 = vmatpush.msrb.mxu0 %v5632_v28  ;;  %3081 = vmatpush.msra.mxu1 %v5635_v3  ;;  %v1806_v47 = vadd.f32 %v6738_v27, %v6737_v37 }
 0x91c   :  { %3101 = vmatpush.msra.mxu2 %v5638_v26  ;;  %3121 = vmatpush.msra.mxu3 %v5641_v22 }
 0x91d   :  { %3062 = vmatpush.msrb.mxu0 %v5644_v11  ;;  %3082 = vmatpush.msra.mxu1 %v5647_v35 }
 0x91e   :  { %3102 = vmatpush.msra.mxu2 %v6709_v12  ;;  %3122 = vmatpush.msra.mxu3 %v6710_v16 }
 0x91f   :  { %3063 = vmatpush.msrb.mxu0 %v6711_v17  ;;  %3083 = vmatpush.msra.mxu1 %v6712_v18 }
 0x920   :  { %3103 = vmatpush.msra.mxu2 %v6713_v59  ;;  %3123 = vmatpush.msra.mxu3 %v6714_v8 }
 0x921   :  { %3064 = vmatpush.msrb.mxu0 %v6715_v45  ;;  %3084 = vmatpush.msra.mxu1 %v6716_v38 }
 0x922   :  { %3104 = vmatpush.msra.mxu2 %v6717_v2  ;;  %3124 = vmatpush.msra.mxu3 %v6718_v14 }
 0x923   :  { %3065 = vmatpush.msrb.mxu0 %v6719_v39  ;;  %3085 = vmatpush.msra.mxu1 %v6720_v54 }
 0x924   :  { %3105 = vmatpush.msra.mxu2 %v6721_v53  ;;  %3125 = vmatpush.msra.mxu3 %v6722_v40 }
 0x925   :  { %3066 = vmatpush.msrb.mxu0 %v6723_v31  ;;  %3086 = vmatpush.msra.mxu1 %v6724_v9 }
 0x926   :  { %3106 = vmatpush.msra.mxu2 %v6725_v19  ;;  %3126 = vmatpush.msra.mxu3 %v6726_v24 }
 0x927   :  { %3067 = vmatpush.msrb.mxu0 %v6727_v57  ;;  %3087 = vmatpush.msra.mxu1 %v6728_v42 }
 0x928   :  { %3107 = vmatpush.msra.mxu2 %v6729_v48  ;;  %3127 = vmatpush.msra.mxu3 %v6730_v1 }
 0x929   :  { %3068 = vmatpush.msrb.mxu0 %v6731_v60  ;;  %3088 = vmatpush.msra.mxu1 %v6732_v13 }
 0x92a   :  { %3108 = vmatpush.msra.mxu2 %v6733_v63  ;;  %3128 = vmatpush.msra.mxu3 %v6734_v23 }
 0x986   :  { %v2768_v28 = vpop.f32.mrf.mxu0  ;;  %v2788_v3 = vpop.f32.mrf.mxu1 }
 0x987   :  { %v2831_v26 = vadd.f32 %v2768_v28, %v1765_v50  ;;  %v2832_v22 = vadd.f32 %v2788_v3, %v1806_v47  ;;  %v6744_v47 = vld [vmem:[#allocation20_spill] sm:$0xff] }
 0x988   :  { %v1809_v28 = vadd.f32 %v6744_v47, %v6737_v37  ;;  %v3214_v47 = vld [vmem:[#allocation10 + $0x70] sm:$0xff] }
 0x989   :  { %v3338_v11 = vmul.f32 -1.442695, %v2831_v26  ;;  %v3339_v35 = vmul.f32 -1.442695, %v2832_v22 }
 0x98b   :  { %3569 = vpow2.f32 %v3338_v11 }
 0x98c   :  { %3571 = vpow2.f32 %v3339_v35 }
 0x98d   :  { %v2828_v7 = vpop.f32.mrf.mxu3  ;;  %v2808_v20 = vpop.f32.mrf.mxu2 }
 0x98e   :  { %v2834_v25 = vadd.f32 %v2828_v7, %v1888_v34  ;;  %v2833_v61 = vadd.f32 %v2808_v20, %v1847_v43  ;;  %v6745_v34 = vld [vmem:[#allocation44_spill] sm:$0xff]  ;;  %v6746_v43 = vld [vmem:[#allocation17_spill] sm:$0xff] }
 0x98f   :  { %v1891_v7 = vadd.f32 %v6745_v34, %v6739_v29  ;;  %v6747_v34 = vld [vmem:[#allocation67_spill] sm:$0xff] }
 0x990   :  { %v3340_v51 = vmul.f32 -1.442695, %v2834_v25 }
 0x991   :  { %v3570_v41 = vpop.eup %3569 }
 0x992   :  { %v3572_v62 = vpop.eup %3571  ;;  %v2838_v56 = vadd.f32 1.0, %v3570_v41  ;;  %3573 = vpow2.f32 %v3340_v51 }
 0x993   :  { %v2857_v10 = vadd.f32 1.0, %v3572_v62 }
 0x994   :  { %3575 = vrcp.f32 %v2838_v56  ;;  %v2850_v0 = vand.u32 2147483648, %v2838_v56  ;;  %v2848_v16 = vand.u32 2147483647, %v2838_v56  ;;  %vm2844_vm15 = vweird.f32 %v2838_v56 }
 0x995   :  { %3577 = vrcp.f32 %v2857_v10  ;;  %v2869_v49 = vand.u32 2147483648, %v2857_v10  ;;  %v2867_v18 = vand.u32 2147483647, %v2857_v10  ;;  %vm2863_vm0 = vweird.f32 %v2857_v10 }
 0x996   :  { %v2851_v45 = vor.u32 1.1754944e-38, %v2850_v0  ;;  %vm2849_vm3 = vcmp.eq.f32.partialorder %v2848_v16, 8.507059e+37 }
 0x997   :  { %v2870_v14 = vor.u32 1.1754944e-38, %v2869_v49  ;;  %vm2868_vm4 = vcmp.eq.f32.partialorder %v2867_v18, 8.507059e+37 }
 0x998   :  { %v3574_v44 = vpop.eup %3573 }
 0x999   :  { %v2877_v6 = vadd.f32 1.0, %v3574_v44 }
 0x99a   :  { %v3576_v15 = vpop.eup %3575 }
 0x99b   :  { %v3578_v32 = vpop.eup %3577  ;;  %v2840_v33 = vmul.f32 %v3576_v15, %v2838_v56  ;;  %3579 = vrcp.f32 %v2877_v6  ;;  %vm2845_vm13 = vweird.f32 %v3576_v15  ;;  %v2889_v1 = vand.u32 2147483648, %v2877_v6 }
 0x99c   :  { %v2859_v55 = vmul.f32 %v3578_v32, %v2857_v10  ;;  %3581 = vtanh.f32 %v2833_v61  ;;  %vm2864_vm14 = vweird.f32 %v3578_v32  ;;  %vm2846_vm1 = vmor %vm2844_vm15, %vm2845_vm13  ;;  %vm2883_vm6 = vweird.f32 %v2877_v6 }
 0x99d   :  { %v2841_v5 = vsub.f32 1.0, %v2840_v33  ;;  %vm2865_vm2 = vmor %vm2863_vm0, %vm2864_vm14  ;;  %v2887_v60 = vand.u32 2147483647, %v2877_v6  ;;  %v2890_v63 = vor.u32 1.1754944e-38, %v2889_v1 }
 0x99e   :  { %v2860_v46 = vsub.f32 1.0, %v2859_v55 }
 0x99f   :  { %v2842_v12 = vmul.f32 %v3576_v15, %v2841_v5  ;;  %vm2888_vm8 = vcmp.eq.f32.partialorder %v2887_v60, 8.507059e+37 }
 0x9a0   :  { %v2861_v17 = vmul.f32 %v3578_v32, %v2860_v46 }
 0x9a1   :  { %v3580_v59 = vpop.eup %3579  ;;  %v2843_v8 = vadd.f32 %v3576_v15, %v2842_v12 }
 0x9a2   :  { %v2862_v38 = vadd.f32 %v3578_v32, %v2861_v17  ;;  %v2879_v2 = vmul.f32 %v3580_v59, %v2877_v6  ;;  %v3582_v54 = vpop.eup %3581  ;;  %vm2884_vm5 = vweird.f32 %v3580_v59  ;;  %v1850_v6 = vadd.f32 %v6746_v43, %v6741_v36 }
 0x9a3   :  { %v2847_v39 = vsel %vm2846_vm1, %v3576_v15, %v2843_v8  ;;  %vm2885_vm7 = vmor %vm2883_vm6, %vm2884_vm5 }
 0x9a4   :  { %v2852_v53 = vsel %vm2849_vm3, %v2851_v45, %v2847_v39  ;;  %v2866_v40 = vsel %vm2865_vm2, %v3578_v32, %v2862_v38  ;;  %v2880_v31 = vsub.f32 1.0, %v2879_v2 }
 0x9a5   :  { %v2871_v9 = vsel %vm2868_vm4, %v2870_v14, %v2866_v40  ;;  %v2894_v19 = vmul.f32 %v3582_v54, %v2852_v53 }
 0x9a6   :  { %v2893_v24 = vmul.f32 %v2871_v9, %v5889_v21  ;;  %v2881_v57 = vmul.f32 %v3580_v59, %v2880_v31  ;;  %v6743_v21 = vld [vmem:[#allocation18_spill] sm:$0xff] }
 0x9a7   :  { %v1768_v27 = vadd.f32 %v6743_v21, %v6735_v30 }
 0x9a8   :  { %v5965_v42 = vadd.f32 %v2894_v19, %v2893_v24  ;;  %v2882_v48 = vadd.f32 %v3580_v59, %v2881_v57 }
 0x9aa   :  { %3583 = vtanh.f32 %v5965_v42  ;;  %v2886_v13 = vsel %vm2885_vm7, %v3580_v59, %v2882_v48 }
 0x9ab   :  { %v2891_v4 = vsel %vm2888_vm8, %v2890_v63, %v2886_v13 }
 0x9b0   :  { %v3584_v23 = vpop.eup %3583 }
 0x9b1   :  { %v2897_v50 = vmul.f32 %v3584_v23, %v2891_v4 }
 0x9b3   :  { %2918 = vmatmul.f32.vlgmr.msra.gmra.mxu0 %v2897_v50  ;;  %2938 = vmatmul.f32.vlgmr.msrb.gmra.mxu1 %v2897_v50 }
 0x9b4   :  { %2958 = vmatmul.f32.vlgmr.msrb.gmra.mxu2 %v2897_v50  ;;  %2978 = vmatmul.f32.vlgmr.msrb.gmra.mxu3 %v2897_v50 }
 0xa30   :  { %v2919_v3 = vpop.f32.mrf.mxu0  ;;  %v2939_v26 = vpop.f32.mrf.mxu1 }
 0xa31   :  { %v2982_v22 = vadd.f32 %v2919_v3, %v1768_v27  ;;  %v2983_v11 = vadd.f32 %v2939_v26, %v1809_v28  ;;  %v3213_v28 = vld [vmem:[#allocation10 + $0x68] sm:$0xff]  ;;  %v3212_v3 = vld [vmem:[#allocation10 + $0x60] sm:$0xff]  ;;  %v3211_v26 = vld [vmem:[#allocation10 + $0x58] sm:$0xff] }
 0xa33   :  { %v3341_v35 = vmul.f32 -1.442695, %v2982_v22  ;;  %v3342_v58 = vmul.f32 -1.442695, %v2983_v11  ;;  %v3210_v22 = vld [vmem:[#allocation10 + $0x50] sm:$0xff]  ;;  %v3209_v11 = vld [vmem:[#allocation10 + $0x48] sm:$0xff] }
 0xa35   :  { %3585 = vpow2.f32 %v3341_v35  ;;  %v3208_v35 = vld [vmem:[#allocation10 + $0x40] sm:$0xff] }
 0xa36   :  { %3587 = vpow2.f32 %v3342_v58  ;;  %v3207_v58 = vld [vmem:[#allocation10 + $0x38] sm:$0xff] }
 0xa37   :  { %v2979_v25 = vpop.f32.mrf.mxu3  ;;  %v2959_v44 = vpop.f32.mrf.mxu2 }
 0xa38   :  { %v2985_v51 = vadd.f32 %v2979_v25, %v1891_v7  ;;  %v2984_v32 = vadd.f32 %v2959_v44, %v1850_v6  ;;  %v1771_v7 = vadd.f32 %v6747_v34, %v6735_v30  ;;  %v6748_v25 = vld [vmem:[#allocation70_spill] sm:$0xff]  ;;  %v3205_v44 = vld [vmem:[#allocation10 + $0x28] sm:$0xff]  ;;  %v3204_v6 = vld [vmem:[#allocation10 + $0x20] sm:$0xff] }
 0xa39   :  { %v6749_v30 = vld [vmem:[#allocation21_spill] sm:$0xff] }
 0xa3a   :  { %v3343_v41 = vmul.f32 -1.442695, %v2985_v51  ;;  %v1812_v51 = vadd.f32 %v6748_v25, %v6737_v37  ;;  %v3202_v37 = vld [vmem:[#allocation10 + $0x10] sm:$0xff] }
 0xa3b   :  { %v3586_v62 = vpop.eup %3585 }
 0xa3c   :  { %v3588_v56 = vpop.eup %3587  ;;  %v2989_v10 = vadd.f32 1.0, %v3586_v62  ;;  %3589 = vpow2.f32 %v3343_v41 }
 0xa3d   :  { %v3008_v20 = vadd.f32 1.0, %v3588_v56  ;;  %v3206_v56 = vld [vmem:[#allocation10 + $0x30] sm:$0xff] }
 0xa3e   :  { %3591 = vrcp.f32 %v2989_v10  ;;  %v3001_v49 = vand.u32 2147483648, %v2989_v10  ;;  %v2999_v17 = vand.u32 2147483647, %v2989_v10  ;;  %vm2995_vm11 = vweird.f32 %v2989_v10 }
 0xa3f   :  { %3593 = vrcp.f32 %v3008_v20  ;;  %v3020_v12 = vand.u32 2147483648, %v3008_v20  ;;  %v3018_v59 = vand.u32 2147483647, %v3008_v20  ;;  %vm3014_vm12 = vweird.f32 %v3008_v20 }
 0xa40   :  { %v3002_v38 = vor.u32 1.1754944e-38, %v3001_v49  ;;  %vm3000_vm15 = vcmp.eq.f32.partialorder %v2999_v17, 8.507059e+37 }
 0xa41   :  { %v3021_v39 = vor.u32 1.1754944e-38, %v3020_v12  ;;  %vm3019_vm0 = vcmp.eq.f32.partialorder %v3018_v59, 8.507059e+37 }
 0xa42   :  { %v3590_v52 = vpop.eup %3589 }
 0xa43   :  { %v3028_v15 = vadd.f32 1.0, %v3590_v52 }
 0xa44   :  { %v3592_v61 = vpop.eup %3591 }
 0xa45   :  { %v3594_v33 = vpop.eup %3593  ;;  %v2991_v55 = vmul.f32 %v3592_v61, %v2989_v10  ;;  %3595 = vrcp.f32 %v3028_v15  ;;  %vm2996_vm9 = vweird.f32 %v3592_v61  ;;  %v3040_v13 = vand.u32 2147483648, %v3028_v15 }
 0xa46   :  { %v3010_v5 = vmul.f32 %v3594_v33, %v3008_v20  ;;  %3597 = vtanh.f32 %v2984_v32  ;;  %vm3015_vm10 = vweird.f32 %v3594_v33  ;;  %vm2997_vm13 = vmor %vm2995_vm11, %vm2996_vm9  ;;  %vm3034_vm2 = vweird.f32 %v3028_v15 }
 0xa47   :  { %v2992_v46 = vsub.f32 1.0, %v2991_v55  ;;  %vm3016_vm14 = vmor %vm3014_vm12, %vm3015_vm10  ;;  %v3038_v63 = vand.u32 2147483647, %v3028_v15  ;;  %v3041_v4 = vor.u32 1.1754944e-38, %v3040_v13  ;;  %v3201_v55 = vld [vmem:[#allocation10 + $0x8] sm:$0xff] }
 0xa48   :  { %v3011_v0 = vsub.f32 1.0, %v3010_v5 }
 0xa49   :  { %v2993_v16 = vmul.f32 %v3592_v61, %v2992_v46  ;;  %vm3039_vm4 = vcmp.eq.f32.partialorder %v3038_v63, 8.507059e+37  ;;  %v3200_v46 = vld [vmem:[#allocation10] sm:$0xff] }
 0xa4a   :  { %v3012_v18 = vmul.f32 %v3594_v33, %v3011_v0 }
 0xa4b   :  { %v3596_v8 = vpop.eup %3595  ;;  %v2994_v45 = vadd.f32 %v3592_v61, %v2993_v16 }
 0xa4c   :  { %v3013_v2 = vadd.f32 %v3594_v33, %v3012_v18  ;;  %v3030_v14 = vmul.f32 %v3596_v8, %v3028_v15  ;;  %v3598_v53 = vpop.eup %3597  ;;  %vm3035_vm1 = vweird.f32 %v3596_v8  ;;  %v3203_v15 = vld [vmem:[#allocation10 + $0x18] sm:$0xff] }
 0xa4d   :  { %v2998_v54 = vsel %vm2997_vm13, %v3592_v61, %v2994_v45  ;;  %vm3036_vm3 = vmor %vm3034_vm2, %vm3035_vm1  ;;  %v1894_v61 = vadd.f32 %v6749_v30, %v6739_v29  ;;  %v6750_v18 = vld [vmem:[#allocation51_spill] sm:$0xff] }
 0xa4e   :  { %v3003_v40 = vsel %vm3000_vm15, %v3002_v38, %v2998_v54  ;;  %v3017_v31 = vsel %vm3016_vm14, %v3594_v33, %v3013_v2  ;;  %v3031_v9 = vsub.f32 1.0, %v3030_v14  ;;  %v1853_v59 = vadd.f32 %v6750_v18, %v6741_v36 }
 0xa4f   :  { %v3022_v19 = vsel %vm3019_vm0, %v3021_v39, %v3017_v31  ;;  %v3045_v24 = vmul.f32 %v3598_v53, %v3003_v40 }
 0xa50   :  { %v3044_v57 = vmul.f32 %v3022_v19, %v5965_v42  ;;  %v3032_v48 = vmul.f32 %v3596_v8, %v3031_v9  ;;  %v3215_v42 = vld [vmem:[#allocation10 + $0x78] sm:$0xff] }
 0xa51   :  { %3220 = vmatpush.msra.mxu0 %v3215_v42 }
 0xa52   :  { %v5977_v1 = vadd.f32 %v3045_v24, %v3044_v57  ;;  %v3033_v60 = vadd.f32 %v3596_v8, %v3032_v48 }
 0xa53   :  { %3221 = vmatpush.msra.mxu0 %v3214_v47 }
 0xa54   :  { %3599 = vtanh.f32 %v5977_v1  ;;  %v3037_v23 = vsel %vm3036_vm3, %v3596_v8, %v3033_v60 }
 0xa55   :  { %v3042_v21 = vsel %vm3039_vm4, %v3041_v4, %v3037_v23  ;;  %3222 = vmatpush.msra.mxu0 %v3213_v28 }
 0xa57   :  { %3223 = vmatpush.msra.mxu0 %v3212_v3 }
 0xa59   :  { %3224 = vmatpush.msra.mxu0 %v3211_v26 }
 0xa5a   :  { %v3600_v50 = vpop.eup %3599 }
 0xa5b   :  { %v3048_v27 = vmul.f32 %v3600_v50, %v3042_v21  ;;  %3225 = vmatpush.msra.mxu0 %v3210_v22 }
 0xa5d   :  { %3069 = vmatmul.f32.vlgmr.msrb.gmra.mxu0 %v3048_v27  ;;  %3089 = vmatmul.f32.vlgmr.msra.gmra.mxu1 %v3048_v27 }
 0xa5e   :  { %3109 = vmatmul.f32.vlgmr.msra.gmra.mxu2 %v3048_v27  ;;  %3129 = vmatmul.f32.vlgmr.msra.gmra.mxu3 %v3048_v27 }
 0xa5f   :  { %3226 = vmatpush.msra.mxu0 %v3209_v11 }
 0xa61   :  { %3227 = vmatpush.msra.mxu0 %v3208_v35 }
 0xa63   :  { %3228 = vmatpush.msra.mxu0 %v3207_v58 }
 0xa65   :  { %3229 = vmatpush.msra.mxu0 %v3206_v56 }
 0xa67   :  { %3230 = vmatpush.msra.mxu0 %v3205_v44 }
 0xa69   :  { %3231 = vmatpush.msra.mxu0 %v3204_v6 }
 0xa6b   :  { %3232 = vmatpush.msra.mxu0 %v3203_v15 }
 0xa6d   :  { %3233 = vmatpush.msra.mxu0 %v3202_v37 }
 0xa6f   :  { %3234 = vmatpush.msra.mxu0 %v3201_v55 }
 0xa71   :  { %3235 = vmatpush.msra.mxu0 %v3200_v46 }
 0xada   :  { %v3070_v41 = vpop.f32.mrf.mxu0  ;;  %v3090_v62 = vpop.f32.mrf.mxu1 }
 0xadb   :  { %v3133_v10 = vadd.f32 %v3070_v41, %v1771_v7  ;;  %v3134_v20 = vadd.f32 %v3090_v62, %v1812_v51 }
 0xadd   :  { %v3344_v52 = vmul.f32 -1.442695, %v3133_v10  ;;  %v3345_v43 = vmul.f32 -1.442695, %v3134_v20 }
 0xadf   :  { %3601 = vpow2.f32 %v3344_v52 }
 0xae0   :  { %3603 = vpow2.f32 %v3345_v43 }
 0xae1   :  { %v3130_v32 = vpop.f32.mrf.mxu3  ;;  %v3110_v17 = vpop.f32.mrf.mxu2 }
 0xae2   :  { %v3136_v33 = vadd.f32 %v3130_v32, %v1894_v61  ;;  %v3135_v38 = vadd.f32 %v3110_v17, %v1853_v59 }
 0xae4   :  { %v3346_v5 = vmul.f32 -1.442695, %v3136_v33 }
 0xae5   :  { %v3602_v0 = vpop.eup %3601 }
 0xae6   :  { %v3604_v49 = vpop.eup %3603  ;;  %v3140_v12 = vadd.f32 1.0, %v3602_v0  ;;  %3605 = vpow2.f32 %v3346_v5 }
 0xae7   :  { %v3159_v16 = vadd.f32 1.0, %v3604_v49 }
 0xae8   :  { %3607 = vrcp.f32 %v3140_v12  ;;  %v3152_v40 = vand.u32 2147483648, %v3140_v12  ;;  %v3150_v19 = vand.u32 2147483647, %v3140_v12  ;;  %vm3146_vm7 = vweird.f32 %v3140_v12 }
 0xae9   :  { %3609 = vrcp.f32 %v3159_v16  ;;  %v3171_v31 = vand.u32 2147483648, %v3159_v16  ;;  %v3169_v57 = vand.u32 2147483647, %v3159_v16  ;;  %vm3165_vm8 = vweird.f32 %v3159_v16 }
 0xaea   :  { %v3153_v60 = vor.u32 1.1754944e-38, %v3152_v40  ;;  %vm3151_vm11 = vcmp.eq.f32.partialorder %v3150_v19, 8.507059e+37 }
 0xaeb   :  { %v3172_v23 = vor.u32 1.1754944e-38, %v3171_v31  ;;  %vm3170_vm12 = vcmp.eq.f32.partialorder %v3169_v57, 8.507059e+37 }
 0xaec   :  { %v3606_v29 = vpop.eup %3605 }
 0xaed   :  { %v3179_v8 = vadd.f32 1.0, %v3606_v29 }
 0xaee   :  { %v3608_v45 = vpop.eup %3607 }
 0xaef   :  { %v3610_v2 = vpop.eup %3609  ;;  %v3142_v14 = vmul.f32 %v3608_v45, %v3140_v12  ;;  %3611 = vrcp.f32 %v3179_v8  ;;  %vm3147_vm5 = vweird.f32 %v3608_v45  ;;  %v3191_v35 = vand.u32 2147483648, %v3179_v8 }
 0xaf0   :  { %v3161_v39 = vmul.f32 %v3610_v2, %v3159_v16  ;;  %3613 = vtanh.f32 %v3135_v38  ;;  %vm3166_vm6 = vweird.f32 %v3610_v2  ;;  %vm3148_vm9 = vmor %vm3146_vm7, %vm3147_vm5  ;;  %vm3185_vm14 = vweird.f32 %v3179_v8 }
 0xaf1   :  { %v3143_v54 = vsub.f32 1.0, %v3142_v14  ;;  %vm3167_vm10 = vmor %vm3165_vm8, %vm3166_vm6  ;;  %v3189_v58 = vand.u32 2147483647, %v3179_v8  ;;  %v3192_v7 = vor.u32 1.1754944e-38, %v3191_v35 }
 0xaf2   :  { %v3162_v53 = vsub.f32 1.0, %v3161_v39 }
 0xaf3   :  { %v3144_v9 = vmul.f32 %v3608_v45, %v3143_v54  ;;  %vm3190_vm0 = vcmp.eq.f32.partialorder %v3189_v58, 8.507059e+37 }
 0xaf4   :  { %v3163_v24 = vmul.f32 %v3610_v2, %v3162_v53 }
 0xaf5   :  { %v3612_v48 = vpop.eup %3611  ;;  %v3145_v36 = vadd.f32 %v3608_v45, %v3144_v9 }
 0xaf6   :  { %v3164_v13 = vadd.f32 %v3610_v2, %v3163_v24  ;;  %v3181_v63 = vmul.f32 %v3612_v48, %v3179_v8  ;;  %v3614_v50 = vpop.eup %3613  ;;  %vm3186_vm13 = vweird.f32 %v3612_v48 }
 0xaf7   :  { %v3149_v4 = vsel %vm3148_vm9, %v3608_v45, %v3145_v36  ;;  %vm3187_vm15 = vmor %vm3185_vm14, %vm3186_vm13 }
 0xaf8   :  { %v3154_v21 = vsel %vm3151_vm11, %v3153_v60, %v3149_v4  ;;  %v3168_v27 = vsel %vm3167_vm10, %v3610_v2, %v3164_v13  ;;  %v3182_v42 = vsub.f32 1.0, %v3181_v63 }
 0xaf9   :  { %v3173_v47 = vsel %vm3170_vm12, %v3172_v23, %v3168_v27  ;;  %v3196_v28 = vmul.f32 %v3614_v50, %v3154_v21 }
 0xafa   :  { %v3195_v3 = vmul.f32 %v3173_v47, %v5977_v1  ;;  %v3183_v26 = vmul.f32 %v3612_v48, %v3182_v42  ;;  %v3360_v1 = vld [vmem:[%s6003_s8] ss:$0 sm:$0xff] }
 0xafc   :  { %v3197_v22 = vadd.f32 %v3196_v28, %v3195_v3  ;;  %v3184_v11 = vadd.f32 %v3612_v48, %v3183_v26 }
 0xafe   :  { %3615 = vtanh.f32 %v3197_v22  ;;  %v3188_v34 = vsel %vm3187_vm15, %v3612_v48, %v3184_v11 }
 0xaff   :  { %v3193_v51 = vsel %vm3190_vm0, %v3192_v7, %v3188_v34 }
 0xb04   :  { %v3616_v25 = vpop.eup %3615 }
 0xb05   :  { %v3199_v41 = vmul.f32 %v3616_v25, %v3193_v51 }
 0xb07   :  { %3236 = vmatmul.f32.vlgmr.msra.gmra.mxu0 %v3199_v41 }
 0xb84   :  { %v3237_v62 = vpop.f32.mrf.mxu0 }
 0xb85   :  { %v3238_v56 = vadd.f32 %v3360_v1, %v3237_v62 }
 0xb87   :  { %3240 = vst [vmem:[#allocation12] sm:$0xff] %v3238_v56 }
 0xb88   :  { %3251 = dma.vmem_to_hbm [thread:$0]  %s3247_s7, 128, %s3249_s13, [#allocation6]  }
 0xb89   :  { %3871 = dma.done.wait [#allocation6], 128  }
 0xb8a   :  { %3872 = vsyncadd [#allocation6], 4294967168 }
 0xb8b   :  { %3256 = vsyncpa [#allocation5], 1 }
 0xb8c   :  { %3257 = vsyncpa [#allocation8], 1 }
 0xb8d   :  { %3258 = vsyncpa [#allocation11], 1 }
 0xb8e   :  { %3259 = vsyncpa [#allocation6], 1 }

</bundles_post_ra>
